<compile_context>
chip_gen: v7x
topology: tpu7x:2x2x1
jax: 0.10.0
libtpu: 0.0.40
codegen_flags: <defaults>
</compile_context>

<pallas_src>
import functools

import jax
import jax.numpy as jnp
from jax.experimental import pallas as pl
from jax.experimental.pallas import tpu as pltpu

LANE = 128                     # channel padding target (TPU lane width)
_VMEM = pltpu.MemorySpace.VMEM
_BN_EPS = 1e-5


def _round_up(x, m):
    return ((x + m - 1) // m) * m


def _cdiv(a, b):
    return -(-a // b)


def _vspecs(n):
    return [pl.BlockSpec(memory_space=_VMEM) for _ in range(n)]


# --------------------------------------------------------------------------
# Pallas kernels
# --------------------------------------------------------------------------
def _conv_stage_kernel(*refs, taps, stride, n_groups, relu_groups, residual, eps):
    """Fused stride-s conv (shifted bf16 matmuls) + masked BN + activation
    [+ residual add] for one or two output-channel groups."""
    G = n_groups
    xph_ref = refs[0]
    w_refs = refs[1:1 + G]
    g_refs = refs[1 + G:1 + 2 * G]
    b_refs = refs[1 + 2 * G:1 + 3 * G]
    mask_ref = refs[1 + 3 * G]
    pos = 2 + 3 * G
    res_ref = None
    if residual:
        res_ref = refs[pos]
        pos += 1
    out_refs = refs[pos:]

    mask = mask_ref[...]                                            # (M, 1) f32
    count = jnp.maximum(jnp.sum(mask, axis=0, keepdims=True), 1.0)  # (1, 1)
    M = out_refs[0].shape[0]

    # phase r holds rows xp[b, u*stride + r]; conv tap k reads phase k%stride
    # shifted down by k//stride rows (all static unit-stride slices).
    phases = [xph_ref[r] for r in range(stride)]                    # (Mq, C) f32

    for g in range(G):
        acc = jnp.zeros((M, LANE), jnp.float32)
        for k in range(taps):                       # static unroll over taps
            q, r = k // stride, k % stride
            xk = phases[r][q:q + M, :].astype(jnp.bfloat16)
            wk = w_refs[g][k]                       # (C, C) bf16
            acc = acc + jnp.dot(xk, wk, preferred_element_type=jnp.float32)

        # length-masked, training-mode batch norm (per channel over valid rows)
        mean = jnp.sum(acc * mask, axis=0, keepdims=True) / count
        cen = (acc - mean) * mask
        var = jnp.sum(cen * cen, axis=0, keepdims=True) / count
        y = (acc - mean) * jax.lax.rsqrt(var + eps)
        y = y * g_refs[g][...] + b_refs[g][...]
        if relu_groups[g]:
            y = jnp.maximum(y, 0.0)
        if residual:
            y = res_ref[...] + y                    # h = l + relu(bn(conv2(r)))
        y = y * mask                                # keep pad rows/channels at 0
        out_refs[g][...] = y.astype(out_refs[g].dtype)


def _pool_head_kernel(h_ref, m_ref, w1m_ref, w1x_ref, b1_ref, w2_ref, b2_ref,
                      o_ref, *, B, Ls):
    """Fused masked mean/max pooling over time + lin1 + ReLU + lin2."""
    w1m = w1m_ref[...]
    w1x = w1x_ref[...]
    w2 = w2_ref[...]
    b1 = b1_ref[...]
    b2 = b2_ref[...]
    for b in range(B):                              # static unroll over batch
        hb = h_ref[pl.ds(b * Ls, Ls), :]            # (Ls, LANE) f32
        mb = m_ref[pl.ds(b * Ls, Ls), :]            # (Ls, 1) f32
        cnt = jnp.maximum(jnp.sum(mb, axis=0, keepdims=True), 1.0)   # (1, 1)
        hmean = jnp.sum(hb * mb, axis=0, keepdims=True) / cnt        # (1, LANE)
        hmax = jnp.max(jnp.where(mb > 0.0, hb, jnp.full_like(hb, -1e30)),
                       axis=0, keepdims=True)                        # (1, LANE)
        hid = (jnp.dot(hmean.astype(jnp.bfloat16), w1m,
                       preferred_element_type=jnp.float32)
               + jnp.dot(hmax.astype(jnp.bfloat16), w1x,
                         preferred_element_type=jnp.float32) + b1)
        hid = jnp.maximum(hid, 0.0)
        z = jnp.dot(hid.astype(jnp.bfloat16), w2,
                    preferred_element_type=jnp.float32) + b2
        o_ref[pl.ds(b, 1), :] = z.astype(o_ref.dtype)


# --------------------------------------------------------------------------
# pallas_call wrappers
# --------------------------------------------------------------------------
def conv_bn_stage(xph, weights, gammas, betas, mask, *, taps, stride,
                  relu_flags, residual=None):
    G = len(weights)
    M = mask.shape[0]
    inputs = [xph] + list(weights) + list(gammas) + list(betas) + [mask]
    if residual is not None:
        inputs.append(residual)
    kernel = functools.partial(
        _conv_stage_kernel, taps=taps, stride=stride, n_groups=G,
        relu_groups=tuple(bool(f) for f in relu_flags),
        residual=residual is not None, eps=_BN_EPS)
    if G == 1:
        out = pl.pallas_call(
            kernel,
            out_shape=jax.ShapeDtypeStruct((M, LANE), jnp.float32),
            in_specs=_vspecs(len(inputs)),
            out_specs=pl.BlockSpec(memory_space=_VMEM),
        )(*inputs)
        return [out]
    outs = pl.pallas_call(
        kernel,
        out_shape=tuple(jax.ShapeDtypeStruct((M, LANE), jnp.float32)
                        for _ in range(G)),
        in_specs=_vspecs(len(inputs)),
        out_specs=tuple(pl.BlockSpec(memory_space=_VMEM) for _ in range(G)),
    )(*inputs)
    return list(outs)


def pool_head(h, mask, w1m, w1x, b1, w2, b2, *, B, Ls):
    kernel = functools.partial(_pool_head_kernel, B=B, Ls=Ls)
    return pl.pallas_call(
        kernel,
        out_shape=jax.ShapeDtypeStruct((B, LANE), jnp.float32),
        in_specs=_vspecs(7),
        out_specs=pl.BlockSpec(memory_space=_VMEM),
    )(h, mask, w1m, w1x, b1, w2, b2)


# --------------------------------------------------------------------------
# XLA-side glue: slab geometry, phase prep, weight packing
# --------------------------------------------------------------------------
def _stage_len(L_in, K, s):
    p = (K - 1) // 2
    lo_full = (L_in + 2 * p - K) // s + 1
    return _round_up(lo_full + _cdiv(K, s), 8)


def _n_out(n, K, s):
    # TODO(synk): seq.Conv(pad_delta=1) assumed to be "same"-style symmetric
    # padding of (K-1)//2 per side (seq library source not available).
    p = (K - 1) // 2
    return jnp.maximum((n + 2 * p - K) // s + 1, 1)


def _valid_mask(n, Lq):
    t = jnp.arange(Lq, dtype=jnp.int32)[None, :]
    m = (t < n[:, None]).astype(jnp.float32)        # (B, Lq)
    return m.reshape(-1, 1)                         # (B*Lq, 1)


def _prep_phases(h_flat, B, L_in, K, s, Lq):
    """Zero-pad + phase-decompose so the kernel does a stride-s conv with K
    static unit-stride shifted matmuls on a flat [B*Lq, C] layout."""
    p = (K - 1) // 2
    lip = s * Lq
    x = h_flat.reshape(B, L_in, LANE)
    xp = jnp.pad(x, ((0, 0), (p, lip - p - L_in), (0, 0)))
    xph = xp.reshape(B, Lq, s, LANE).transpose(2, 0, 1, 3).reshape(s, B * Lq, LANE)
    return jnp.pad(xph, ((0, 0), (0, _cdiv(K, s)), (0, 0)))


def _reslab(h_flat, B, L_old, L_new):
    h3 = h_flat.reshape(B, L_old, LANE)
    h3 = jnp.pad(h3, ((0, 0), (0, L_new - L_old), (0, 0)))
    return h3.reshape(B * L_new, LANE)


def _prep_conv_weight(w):
    # (C_out, C_in, K) f32 -> (K, LANE, LANE) bf16, zero-padded channel dims
    c_out, c_in, k = w.shape
    wt = jnp.transpose(w, (2, 1, 0))
    wt = jnp.pad(wt, ((0, 0), (0, LANE - c_in), (0, LANE - c_out)))
    return wt.astype(jnp.bfloat16)


def _prep_bn(g, b):
    c = g.shape[0]
    gp = jnp.pad(g, (0, LANE - c)).reshape(1, LANE).astype(jnp.float32)
    bp = jnp.pad(b, (0, LANE - c)).reshape(1, LANE).astype(jnp.float32)
    return gp, bp


def _prep_head(params, hidden, outproj, classes):
    w1 = params["lin1_w"]                 # (2*hidden, outproj)
    w1m = jnp.pad(w1[:hidden],
                  ((0, LANE - hidden), (0, LANE - outproj))).astype(jnp.bfloat16)
    w1x = jnp.pad(w1[hidden:],
                  ((0, LANE - hidden), (0, LANE - outproj))).astype(jnp.bfloat16)
    b1 = jnp.pad(params["lin1_b"], (0, LANE - outproj)).reshape(1, LANE)
    w2 = jnp.pad(params["lin2_w"],
                 ((0, LANE - outproj), (0, LANE - classes))).astype(jnp.bfloat16)
    b2 = jnp.pad(params["lin2_b"], (0, LANE - classes)).reshape(1, LANE)
    return w1m, w1x, b1.astype(jnp.float32), w2, b2.astype(jnp.float32)


def _stride_flag(layer, n_layers, stride_on):
    if stride_on == 'all':
        return True
    elif stride_on == 'first':
        return layer == 0
    elif stride_on == 'last':
        return layer == n_layers - 1
    else:
        raise ValueError(f'bad stride_on: {stride_on}')


# --------------------------------------------------------------------------
# Parameters (deterministic synthetic init; PyTorch-like layouts)
# --------------------------------------------------------------------------
def init_params(key, *, features, classes, hidden, inproj_size, kernel_size,
                layers, outproj_size):
    keys = jax.random.split(key, 3 + 2 * layers)
    ki = iter(keys)

    def w(k, shape, scale=0.1):
        return jax.random.normal(k, shape, jnp.float32) * scale

    p = {
        'inproj_w': w(next(ki), (hidden, features, inproj_size)),
        'inproj_g': jnp.ones((hidden,), jnp.float32),
        'inproj_b': jnp.zeros((hidden,), jnp.float32),
        'blocks': [],
    }
    for _ in range(layers):
        p['blocks'].append({
            'w1': w(next(ki), (hidden * 2, hidden, kernel_size)),
            'g1': jnp.ones((hidden * 2,), jnp.float32),
            'b1': jnp.zeros((hidden * 2,), jnp.float32),
            'w2': w(next(ki), (hidden, hidden, kernel_size)),
            'g2': jnp.ones((hidden,), jnp.float32),
            'b2': jnp.zeros((hidden,), jnp.float32),
        })
    p['lin1_w'] = w(next(ki), (hidden * 2, outproj_size))
    p['lin1_b'] = jnp.zeros((outproj_size,), jnp.float32)
    p['lin2_w'] = w(next(ki), (outproj_size, classes))
    p['lin2_b'] = jnp.zeros((classes,), jnp.float32)
    return p


# --------------------------------------------------------------------------
# Classify.forward
# --------------------------------------------------------------------------
@functools.partial(jax.jit, static_argnames=("inproj_stride", "stride", "stride_on"))
def _forward_padded(params, x_pad, lengths, *, inproj_stride, stride, stride_on):
    B, T, F = x_pad.shape
    inproj_w = params["inproj_w"]
    hidden = inproj_w.shape[0]
    K_in = inproj_w.shape[2]
    blocks = params["blocks"]
    layers = len(blocks)
    K = blocks[0]["w1"].shape[2] if layers else 1
    outproj = params["lin1_w"].shape[1]
    classes = params["lin2_w"].shape[1]
    assert F <= LANE and hidden <= LANE and outproj <= LANE and classes <= LANE
    # TODO(synk): channel dims > 128 would need lane tiling; not needed here.

    # sort by sequence length (ascending), like the reference
    order = jnp.argsort(lengths)
    n = lengths[order].astype(jnp.int32)
    x = x_pad[order]                                       # (B, T, F)  NWC
    x = jnp.pad(x, ((0, 0), (0, 0), (0, LANE - F)))
    h = x.reshape(B * T, LANE).astype(jnp.float32)
    L = T

    # ---- inproj: conv(K_in, s=inproj_stride) -> masked BN -> ReLU (fused)
    Lq = _stage_len(L, K_in, inproj_stride)
    xph = _prep_phases(h, B, L, K_in, inproj_stride, Lq)
    n = _n_out(n, K_in, inproj_stride)
    mask = _valid_mask(n, Lq)
    g0, b0 = _prep_bn(params["inproj_g"], params["inproj_b"])
    (h,) = conv_bn_stage(xph, [_prep_conv_weight(inproj_w)], [g0], [b0], mask,
                         taps=K_in, stride=inproj_stride, relu_flags=[True])
    L = Lq

    # ---- residual blocks: 2 fused pallas_calls each
    for li in range(layers):
        bp = blocks[li]
        s = stride if _stride_flag(li, layers, stride_on) else 1
        # TODO(synk): nn.Dropout omitted (eval-mode identity; stochastic in training).

        # conv1 -> BN -> split into (l, relu(r)) as two channel groups
        Lq1 = _stage_len(L, K, s)
        xph1 = _prep_phases(h, B, L, K, s, Lq1)
        n = _n_out(n, K, s)
        mask1 = _valid_mask(n, Lq1)
        g1l, b1l = _prep_bn(bp["g1"][:hidden], bp["b1"][:hidden])
        g1r, b1r = _prep_bn(bp["g1"][hidden:], bp["b1"][hidden:])
        l_half, r_half = conv_bn_stage(
            xph1,
            [_prep_conv_weight(bp["w1"][:hidden]),
             _prep_conv_weight(bp["w1"][hidden:])],
            [g1l, g1r], [b1l, b1r], mask1,
            taps=K, stride=s, relu_flags=[False, True])

        # conv2 (stride 1) -> BN -> h = l + relu(.)   (residual fused in-kernel)
        Lq2 = _stage_len(Lq1, K, 1)
        xph2 = _prep_phases(r_half, B, Lq1, K, 1, Lq2)
        mask2 = _valid_mask(n, Lq2)          # stride-1 'same' conv keeps lengths
        l_res = _reslab(l_half, B, Lq1, Lq2)
        g2, b2 = _prep_bn(bp["g2"], bp["b2"])
        (h,) = conv_bn_stage(xph2, [_prep_conv_weight(bp["w2"])], [g2], [b2],
                             mask2, taps=K, stride=1, relu_flags=[True],
                             residual=l_res)
        L = Lq2

    # ---- fused masked mean/max pooling + lin1 + ReLU + lin2
    mask_p = _valid_mask(n, L)
    w1m, w1x, lb1, w2p, lb2 = _prep_head(params, hidden, outproj, classes)
    z = pool_head(h, mask_p, w1m, w1x, lb1, w2p, lb2, B=B, Ls=L)    # (B, LANE)
    z = z[:, :classes]

    inv = jnp.argsort(order)                 # invert_permutation
    return z[inv]


def classify_forward(params, xs, *, inproj_stride, stride, stride_on='all'):
    lengths = jnp.array([x.shape[0] for x in xs], dtype=jnp.int32)
    t_max = _round_up(max(x.shape[0] for x in xs), 8)
    x_pad = jnp.stack(
        [jnp.pad(x, ((0, t_max - x.shape[0]), (0, 0))) for x in xs])
    return _forward_padded(params, x_pad, lengths,
                           inproj_stride=inproj_stride, stride=stride,
                           stride_on=stride_on)


# --------------------------------------------------------------------------
if __name__ == "__main__":
    features, classes = 4, 3
    hidden, kernel_size, stride, layers = 32, 5, 2, 2
    inproj_size, inproj_stride, outproj_size = 7, 4, 16

    key = jax.random.PRNGKey(0)
    k1, k2, kp = jax.random.split(key, 3)
    # variable-length sequences: [T_i, features]
    xs = [
        jax.random.normal(k1, (64, features), jnp.float32),
        jax.random.normal(k2, (48, features), jnp.float32),
    ]

    params = init_params(kp, features=features, classes=classes, hidden=hidden,
                         inproj_size=inproj_size, kernel_size=kernel_size,
                         layers=layers, outproj_size=outproj_size)

    z = classify_forward(params, xs, inproj_stride=inproj_stride,
                         stride=stride, stride_on='all')
    z = jax.block_until_ready(z)
    assert z.shape == (len(xs), classes)
    assert bool(jnp.all(jnp.isfinite(z)))
    print("KERNEL_OK")
</pallas_src>

<mosaic_0001>
module attributes {stable_mosaic.version = 11 : i64} {
  func.func @_conv_stage_kernel(%arg0: memref<4x50x128xf32, #tpu.memory_space<vmem>>, %arg1: memref<7x128x128xbf16, #tpu.memory_space<vmem>>, %arg2: memref<1x128xf32, #tpu.memory_space<vmem>>, %arg3: memref<1x128xf32, #tpu.memory_space<vmem>>, %arg4: memref<48x1xf32, #tpu.memory_space<vmem>>, %arg5: memref<48x128xf32, #tpu.memory_space<vmem>>) attributes {dimension_semantics = [], scalar_prefetch = 0 : i64, scratch_operands = 0 : i64, tpu.core_type = #tpu.core_type<tc>} {
    %c0 = arith.constant 0 : index
    %c0_0 = arith.constant 0 : index
    %0 = vector.load %arg4[%c0, %c0_0] : memref<48x1xf32, #tpu.memory_space<vmem>>, vector<48x1xf32>
    %cst = arith.constant dense<0.000000e+00> : vector<1xf32>
    %1 = vector.multi_reduction <add>, %0, %cst [0] : vector<48x1xf32> to vector<1xf32>
    %2 = vector.shape_cast %1 : vector<1xf32> to vector<1x1xf32>
    %cst_1 = arith.constant 1.000000e+00 : f32
    %3 = vector.broadcast %cst_1 : f32 to vector<1x1xf32>
    %4 = arith.maximumf %2, %3 : vector<1x1xf32>
    %c0_2 = arith.constant 0 : index
    %c0_3 = arith.constant 0 : index
    %c0_4 = arith.constant 0 : index
    %5 = vector.load %arg0[%c0_2, %c0_3, %c0_4] : memref<4x50x128xf32, #tpu.memory_space<vmem>>, vector<1x50x128xf32>
    %6 = vector.shape_cast %5 : vector<1x50x128xf32> to vector<50x128xf32>
    %c1 = arith.constant 1 : index
    %c0_5 = arith.constant 0 : index
    %c0_6 = arith.constant 0 : index
    %7 = vector.load %arg0[%c1, %c0_5, %c0_6] : memref<4x50x128xf32, #tpu.memory_space<vmem>>, vector<1x50x128xf32>
    %8 = vector.shape_cast %7 : vector<1x50x128xf32> to vector<50x128xf32>
    %c2 = arith.constant 2 : index
    %c0_7 = arith.constant 0 : index
    %c0_8 = arith.constant 0 : index
    %9 = vector.load %arg0[%c2, %c0_7, %c0_8] : memref<4x50x128xf32, #tpu.memory_space<vmem>>, vector<1x50x128xf32>
    %10 = vector.shape_cast %9 : vector<1x50x128xf32> to vector<50x128xf32>
    %c3 = arith.constant 3 : index
    %c0_9 = arith.constant 0 : index
    %c0_10 = arith.constant 0 : index
    %11 = vector.load %arg0[%c3, %c0_9, %c0_10] : memref<4x50x128xf32, #tpu.memory_space<vmem>>, vector<1x50x128xf32>
    %12 = vector.shape_cast %11 : vector<1x50x128xf32> to vector<50x128xf32>
    %cst_11 = arith.constant 0.000000e+00 : f32
    %13 = vector.broadcast %cst_11 : f32 to vector<48x128xf32>
    %14 = vector.extract_strided_slice %6 {offsets = [0, 0], sizes = [48, 128], strides = [1, 1]} : vector<50x128xf32> to vector<48x128xf32>
    %15 = arith.truncf %14 : vector<48x128xf32> to vector<48x128xbf16>
    %c0_12 = arith.constant 0 : index
    %c0_13 = arith.constant 0 : index
    %c0_14 = arith.constant 0 : index
    %16 = vector.load %arg1[%c0_12, %c0_13, %c0_14] : memref<7x128x128xbf16, #tpu.memory_space<vmem>>, vector<1x128x128xbf16>
    %17 = vector.shape_cast %16 : vector<1x128x128xbf16> to vector<128x128xbf16>
    %cst_15 = arith.constant dense<0.000000e+00> : vector<48x128xf32>
    %18 = tpu.matmul %15, %17, %cst_15 {dimension_numbers = #tpu.dot_dimension_numbers<[1], [0], [0], [1], [0, 0, 1, 1], [], []>} : vector<48x128xbf16>, vector<128x128xbf16>, vector<48x128xf32> -> vector<48x128xf32>
    %19 = arith.addf %13, %18 : vector<48x128xf32>
    %20 = vector.extract_strided_slice %8 {offsets = [0, 0], sizes = [48, 128], strides = [1, 1]} : vector<50x128xf32> to vector<48x128xf32>
    %21 = arith.truncf %20 : vector<48x128xf32> to vector<48x128xbf16>
    %c1_16 = arith.constant 1 : index
    %c0_17 = arith.constant 0 : index
    %c0_18 = arith.constant 0 : index
    %22 = vector.load %arg1[%c1_16, %c0_17, %c0_18] : memref<7x128x128xbf16, #tpu.memory_space<vmem>>, vector<1x128x128xbf16>
    %23 = vector.shape_cast %22 : vector<1x128x128xbf16> to vector<128x128xbf16>
    %cst_19 = arith.constant dense<0.000000e+00> : vector<48x128xf32>
    %24 = tpu.matmul %21, %23, %cst_19 {dimension_numbers = #tpu.dot_dimension_numbers<[1], [0], [0], [1], [0, 0, 1, 1], [], []>} : vector<48x128xbf16>, vector<128x128xbf16>, vector<48x128xf32> -> vector<48x128xf32>
    %25 = arith.addf %19, %24 : vector<48x128xf32>
    %26 = vector.extract_strided_slice %10 {offsets = [0, 0], sizes = [48, 128], strides = [1, 1]} : vector<50x128xf32> to vector<48x128xf32>
    %27 = arith.truncf %26 : vector<48x128xf32> to vector<48x128xbf16>
    %c2_20 = arith.constant 2 : index
    %c0_21 = arith.constant 0 : index
    %c0_22 = arith.constant 0 : index
    %28 = vector.load %arg1[%c2_20, %c0_21, %c0_22] : memref<7x128x128xbf16, #tpu.memory_space<vmem>>, vector<1x128x128xbf16>
    %29 = vector.shape_cast %28 : vector<1x128x128xbf16> to vector<128x128xbf16>
    %cst_23 = arith.constant dense<0.000000e+00> : vector<48x128xf32>
    %30 = tpu.matmul %27, %29, %cst_23 {dimension_numbers = #tpu.dot_dimension_numbers<[1], [0], [0], [1], [0, 0, 1, 1], [], []>} : vector<48x128xbf16>, vector<128x128xbf16>, vector<48x128xf32> -> vector<48x128xf32>
    %31 = arith.addf %25, %30 : vector<48x128xf32>
    %32 = vector.extract_strided_slice %12 {offsets = [0, 0], sizes = [48, 128], strides = [1, 1]} : vector<50x128xf32> to vector<48x128xf32>
    %33 = arith.truncf %32 : vector<48x128xf32> to vector<48x128xbf16>
    %c3_24 = arith.constant 3 : index
    %c0_25 = arith.constant 0 : index
    %c0_26 = arith.constant 0 : index
    %34 = vector.load %arg1[%c3_24, %c0_25, %c0_26] : memref<7x128x128xbf16, #tpu.memory_space<vmem>>, vector<1x128x128xbf16>
    %35 = vector.shape_cast %34 : vector<1x128x128xbf16> to vector<128x128xbf16>
    %cst_27 = arith.constant dense<0.000000e+00> : vector<48x128xf32>
    %36 = tpu.matmul %33, %35, %cst_27 {dimension_numbers = #tpu.dot_dimension_numbers<[1], [0], [0], [1], [0, 0, 1, 1], [], []>} : vector<48x128xbf16>, vector<128x128xbf16>, vector<48x128xf32> -> vector<48x128xf32>
    %37 = arith.addf %31, %36 : vector<48x128xf32>
    %38 = vector.extract_strided_slice %6 {offsets = [1, 0], sizes = [48, 128], strides = [1, 1]} : vector<50x128xf32> to vector<48x128xf32>
    %39 = arith.truncf %38 : vector<48x128xf32> to vector<48x128xbf16>
    %c4 = arith.constant 4 : index
    %c0_28 = arith.constant 0 : index
    %c0_29 = arith.constant 0 : index
    %40 = vector.load %arg1[%c4, %c0_28, %c0_29] : memref<7x128x128xbf16, #tpu.memory_space<vmem>>, vector<1x128x128xbf16>
    %41 = vector.shape_cast %40 : vector<1x128x128xbf16> to vector<128x128xbf16>
    %cst_30 = arith.constant dense<0.000000e+00> : vector<48x128xf32>
    %42 = tpu.matmul %39, %41, %cst_30 {dimension_numbers = #tpu.dot_dimension_numbers<[1], [0], [0], [1], [0, 0, 1, 1], [], []>} : vector<48x128xbf16>, vector<128x128xbf16>, vector<48x128xf32> -> vector<48x128xf32>
    %43 = arith.addf %37, %42 : vector<48x128xf32>
    %44 = vector.extract_strided_slice %8 {offsets = [1, 0], sizes = [48, 128], strides = [1, 1]} : vector<50x128xf32> to vector<48x128xf32>
    %45 = arith.truncf %44 : vector<48x128xf32> to vector<48x128xbf16>
    %c5 = arith.constant 5 : index
    %c0_31 = arith.constant 0 : index
    %c0_32 = arith.constant 0 : index
    %46 = vector.load %arg1[%c5, %c0_31, %c0_32] : memref<7x128x128xbf16, #tpu.memory_space<vmem>>, vector<1x128x128xbf16>
    %47 = vector.shape_cast %46 : vector<1x128x128xbf16> to vector<128x128xbf16>
    %cst_33 = arith.constant dense<0.000000e+00> : vector<48x128xf32>
    %48 = tpu.matmul %45, %47, %cst_33 {dimension_numbers = #tpu.dot_dimension_numbers<[1], [0], [0], [1], [0, 0, 1, 1], [], []>} : vector<48x128xbf16>, vector<128x128xbf16>, vector<48x128xf32> -> vector<48x128xf32>
    %49 = arith.addf %43, %48 : vector<48x128xf32>
    %50 = vector.extract_strided_slice %10 {offsets = [1, 0], sizes = [48, 128], strides = [1, 1]} : vector<50x128xf32> to vector<48x128xf32>
    %51 = arith.truncf %50 : vector<48x128xf32> to vector<48x128xbf16>
    %c6 = arith.constant 6 : index
    %c0_34 = arith.constant 0 : index
    %c0_35 = arith.constant 0 : index
    %52 = vector.load %arg1[%c6, %c0_34, %c0_35] : memref<7x128x128xbf16, #tpu.memory_space<vmem>>, vector<1x128x128xbf16>
    %53 = vector.shape_cast %52 : vector<1x128x128xbf16> to vector<128x128xbf16>
    %cst_36 = arith.constant dense<0.000000e+00> : vector<48x128xf32>
    %54 = tpu.matmul %51, %53, %cst_36 {dimension_numbers = #tpu.dot_dimension_numbers<[1], [0], [0], [1], [0, 0, 1, 1], [], []>} : vector<48x128xbf16>, vector<128x128xbf16>, vector<48x128xf32> -> vector<48x128xf32>
    %55 = arith.addf %49, %54 : vector<48x128xf32>
    %56 = vector.broadcast %0 : vector<48x1xf32> to vector<48x128xf32>
    %57 = arith.mulf %55, %56 : vector<48x128xf32>
    %cst_37 = arith.constant dense<0.000000e+00> : vector<128xf32>
    %58 = vector.multi_reduction <add>, %57, %cst_37 [0] : vector<48x128xf32> to vector<128xf32>
    %59 = vector.shape_cast %58 : vector<128xf32> to vector<1x128xf32>
    %60 = vector.broadcast %4 : vector<1x1xf32> to vector<1x128xf32>
    %61 = arith.divf %59, %60 : vector<1x128xf32>
    %62 = vector.broadcast %61 : vector<1x128xf32> to vector<48x128xf32>
    %63 = arith.subf %55, %62 : vector<48x128xf32>
    %64 = vector.broadcast %0 : vector<48x1xf32> to vector<48x128xf32>
    %65 = arith.mulf %63, %64 : vector<48x128xf32>
    %66 = arith.mulf %65, %65 : vector<48x128xf32>
    %cst_38 = arith.constant dense<0.000000e+00> : vector<128xf32>
    %67 = vector.multi_reduction <add>, %66, %cst_38 [0] : vector<48x128xf32> to vector<128xf32>
    %68 = vector.shape_cast %67 : vector<128xf32> to vector<1x128xf32>
    %69 = vector.broadcast %4 : vector<1x1xf32> to vector<1x128xf32>
    %70 = arith.divf %68, %69 : vector<1x128xf32>
    %71 = vector.broadcast %61 : vector<1x128xf32> to vector<48x128xf32>
    %72 = arith.subf %55, %71 : vector<48x128xf32>
    %cst_39 = arith.constant 9.99999974E-6 : f32
    %73 = vector.broadcast %cst_39 : f32 to vector<1x128xf32>
    %74 = arith.addf %70, %73 : vector<1x128xf32>
    %75 = math.rsqrt %74 : vector<1x128xf32>
    %76 = vector.broadcast %75 : vector<1x128xf32> to vector<48x128xf32>
    %77 = arith.mulf %72, %76 : vector<48x128xf32>
    %c0_40 = arith.constant 0 : index
    %c0_41 = arith.constant 0 : index
    %78 = vector.load %arg2[%c0_40, %c0_41] : memref<1x128xf32, #tpu.memory_space<vmem>>, vector<1x128xf32>
    %79 = vector.broadcast %78 : vector<1x128xf32> to vector<48x128xf32>
    %80 = arith.mulf %77, %79 : vector<48x128xf32>
    %c0_42 = arith.constant 0 : index
    %c0_43 = arith.constant 0 : index
    %81 = vector.load %arg3[%c0_42, %c0_43] : memref<1x128xf32, #tpu.memory_space<vmem>>, vector<1x128xf32>
    %82 = vector.broadcast %81 : vector<1x128xf32> to vector<48x128xf32>
    %83 = arith.addf %80, %82 : vector<48x128xf32>
    %cst_44 = arith.constant 0.000000e+00 : f32
    %84 = vector.broadcast %cst_44 : f32 to vector<48x128xf32>
    %85 = arith.maximumf %83, %84 : vector<48x128xf32>
    %86 = vector.broadcast %0 : vector<48x1xf32> to vector<48x128xf32>
    %87 = arith.mulf %85, %86 : vector<48x128xf32>
    %c0_45 = arith.constant 0 : index
    %c0_46 = arith.constant 0 : index
    %88 = vector.load %arg5[%c0_45, %c0_46] : memref<48x128xf32, #tpu.memory_space<vmem>>, vector<48x128xf32>
    tpu.vector_store %arg5[%c0_45, %c0_46], %87 {strides = array<i32>} : memref<48x128xf32, #tpu.memory_space<vmem>>, vector<48x128xf32>,
    return
  }
}

module attributes {stable_mosaic.version = 11 : i64} {
  func.func @_conv_stage_kernel(%arg0: memref<2x35x128xf32, #tpu.memory_space<vmem>>, %arg1: memref<5x128x128xbf16, #tpu.memory_space<vmem>>, %arg2: memref<5x128x128xbf16, #tpu.memory_space<vmem>>, %arg3: memref<1x128xf32, #tpu.memory_space<vmem>>, %arg4: memref<1x128xf32, #tpu.memory_space<vmem>>, %arg5: memref<1x128xf32, #tpu.memory_space<vmem>>, %arg6: memref<1x128xf32, #tpu.memory_space<vmem>>, %arg7: memref<32x1xf32, #tpu.memory_space<vmem>>, %arg8: memref<32x128xf32, #tpu.memory_space<vmem>>, %arg9: memref<32x128xf32, #tpu.memory_space<vmem>>) attributes {dimension_semantics = [], scalar_prefetch = 0 : i64, scratch_operands = 0 : i64, tpu.core_type = #tpu.core_type<tc>} {
    %c0 = arith.constant 0 : index
    %c0_0 = arith.constant 0 : index
    %0 = vector.load %arg7[%c0, %c0_0] : memref<32x1xf32, #tpu.memory_space<vmem>>, vector<32x1xf32>
    %cst = arith.constant dense<0.000000e+00> : vector<1xf32>
    %1 = vector.multi_reduction <add>, %0, %cst [0] : vector<32x1xf32> to vector<1xf32>
    %2 = vector.shape_cast %1 : vector<1xf32> to vector<1x1xf32>
    %cst_1 = arith.constant 1.000000e+00 : f32
    %3 = vector.broadcast %cst_1 : f32 to vector<1x1xf32>
    %4 = arith.maximumf %2, %3 : vector<1x1xf32>
    %c0_2 = arith.constant 0 : index
    %c0_3 = arith.constant 0 : index
    %c0_4 = arith.constant 0 : index
    %5 = vector.load %arg0[%c0_2, %c0_3, %c0_4] : memref<2x35x128xf32, #tpu.memory_space<vmem>>, vector<1x35x128xf32>
    %6 = vector.shape_cast %5 : vector<1x35x128xf32> to vector<35x128xf32>
    %c1 = arith.constant 1 : index
    %c0_5 = arith.constant 0 : index
    %c0_6 = arith.constant 0 : index
    %7 = vector.load %arg0[%c1, %c0_5, %c0_6] : memref<2x35x128xf32, #tpu.memory_space<vmem>>, vector<1x35x128xf32>
    %8 = vector.shape_cast %7 : vector<1x35x128xf32> to vector<35x128xf32>
    %cst_7 = arith.constant 0.000000e+00 : f32
    %9 = vector.broadcast %cst_7 : f32 to vector<32x128xf32>
    %10 = vector.extract_strided_slice %6 {offsets = [0, 0], sizes = [32, 128], strides = [1, 1]} : vector<35x128xf32> to vector<32x128xf32>
    %11 = arith.truncf %10 : vector<32x128xf32> to vector<32x128xbf16>
    %c0_8 = arith.constant 0 : index
    %c0_9 = arith.constant 0 : index
    %c0_10 = arith.constant 0 : index
    %12 = vector.load %arg1[%c0_8, %c0_9, %c0_10] : memref<5x128x128xbf16, #tpu.memory_space<vmem>>, vector<1x128x128xbf16>
    %13 = vector.shape_cast %12 : vector<1x128x128xbf16> to vector<128x128xbf16>
    %cst_11 = arith.constant dense<0.000000e+00> : vector<32x128xf32>
    %14 = tpu.matmul %11, %13, %cst_11 {dimension_numbers = #tpu.dot_dimension_numbers<[1], [0], [0], [1], [0, 0, 1, 1], [], []>} : vector<32x128xbf16>, vector<128x128xbf16>, vector<32x128xf32> -> vector<32x128xf32>
    %15 = arith.addf %9, %14 : vector<32x128xf32>
    %16 = vector.extract_strided_slice %8 {offsets = [0, 0], sizes = [32, 128], strides = [1, 1]} : vector<35x128xf32> to vector<32x128xf32>
    %17 = arith.truncf %16 : vector<32x128xf32> to vector<32x128xbf16>
    %c1_12 = arith.constant 1 : index
    %c0_13 = arith.constant 0 : index
    %c0_14 = arith.constant 0 : index
    %18 = vector.load %arg1[%c1_12, %c0_13, %c0_14] : memref<5x128x128xbf16, #tpu.memory_space<vmem>>, vector<1x128x128xbf16>
    %19 = vector.shape_cast %18 : vector<1x128x128xbf16> to vector<128x128xbf16>
    %cst_15 = arith.constant dense<0.000000e+00> : vector<32x128xf32>
    %20 = tpu.matmul %17, %19, %cst_15 {dimension_numbers = #tpu.dot_dimension_numbers<[1], [0], [0], [1], [0, 0, 1, 1], [], []>} : vector<32x128xbf16>, vector<128x128xbf16>, vector<32x128xf32> -> vector<32x128xf32>
    %21 = arith.addf %15, %20 : vector<32x128xf32>
    %22 = vector.extract_strided_slice %6 {offsets = [1, 0], sizes = [32, 128], strides = [1, 1]} : vector<35x128xf32> to vector<32x128xf32>
    %23 = arith.truncf %22 : vector<32x128xf32> to vector<32x128xbf16>
    %c2 = arith.constant 2 : index
    %c0_16 = arith.constant 0 : index
    %c0_17 = arith.constant 0 : index
    %24 = vector.load %arg1[%c2, %c0_16, %c0_17] : memref<5x128x128xbf16, #tpu.memory_space<vmem>>, vector<1x128x128xbf16>
    %25 = vector.shape_cast %24 : vector<1x128x128xbf16> to vector<128x128xbf16>
    %cst_18 = arith.constant dense<0.000000e+00> : vector<32x128xf32>
    %26 = tpu.matmul %23, %25, %cst_18 {dimension_numbers = #tpu.dot_dimension_numbers<[1], [0], [0], [1], [0, 0, 1, 1], [], []>} : vector<32x128xbf16>, vector<128x128xbf16>, vector<32x128xf32> -> vector<32x128xf32>
    %27 = arith.addf %21, %26 : vector<32x128xf32>
    %28 = vector.extract_strided_slice %8 {offsets = [1, 0], sizes = [32, 128], strides = [1, 1]} : vector<35x128xf32> to vector<32x128xf32>
    %29 = arith.truncf %28 : vector<32x128xf32> to vector<32x128xbf16>
    %c3 = arith.constant 3 : index
    %c0_19 = arith.constant 0 : index
    %c0_20 = arith.constant 0 : index
    %30 = vector.load %arg1[%c3, %c0_19, %c0_20] : memref<5x128x128xbf16, #tpu.memory_space<vmem>>, vector<1x128x128xbf16>
    %31 = vector.shape_cast %30 : vector<1x128x128xbf16> to vector<128x128xbf16>
    %cst_21 = arith.constant dense<0.000000e+00> : vector<32x128xf32>
    %32 = tpu.matmul %29, %31, %cst_21 {dimension_numbers = #tpu.dot_dimension_numbers<[1], [0], [0], [1], [0, 0, 1, 1], [], []>} : vector<32x128xbf16>, vector<128x128xbf16>, vector<32x128xf32> -> vector<32x128xf32>
    %33 = arith.addf %27, %32 : vector<32x128xf32>
    %34 = vector.extract_strided_slice %6 {offsets = [2, 0], sizes = [32, 128], strides = [1, 1]} : vector<35x128xf32> to vector<32x128xf32>
    %35 = arith.truncf %34 : vector<32x128xf32> to vector<32x128xbf16>
    %c4 = arith.constant 4 : index
    %c0_22 = arith.constant 0 : index
    %c0_23 = arith.constant 0 : index
    %36 = vector.load %arg1[%c4, %c0_22, %c0_23] : memref<5x128x128xbf16, #tpu.memory_space<vmem>>, vector<1x128x128xbf16>
    %37 = vector.shape_cast %36 : vector<1x128x128xbf16> to vector<128x128xbf16>
    %cst_24 = arith.constant dense<0.000000e+00> : vector<32x128xf32>
    %38 = tpu.matmul %35, %37, %cst_24 {dimension_numbers = #tpu.dot_dimension_numbers<[1], [0], [0], [1], [0, 0, 1, 1], [], []>} : vector<32x128xbf16>, vector<128x128xbf16>, vector<32x128xf32> -> vector<32x128xf32>
    %39 = arith.addf %33, %38 : vector<32x128xf32>
    %40 = vector.broadcast %0 : vector<32x1xf32> to vector<32x128xf32>
    %41 = arith.mulf %39, %40 : vector<32x128xf32>
    %cst_25 = arith.constant dense<0.000000e+00> : vector<128xf32>
    %42 = vector.multi_reduction <add>, %41, %cst_25 [0] : vector<32x128xf32> to vector<128xf32>
    %43 = vector.shape_cast %42 : vector<128xf32> to vector<1x128xf32>
    %44 = vector.broadcast %4 : vector<1x1xf32> to vector<1x128xf32>
    %45 = arith.divf %43, %44 : vector<1x128xf32>
    %46 = vector.broadcast %45 : vector<1x128xf32> to vector<32x128xf32>
    %47 = arith.subf %39, %46 : vector<32x128xf32>
    %48 = vector.broadcast %0 : vector<32x1xf32> to vector<32x128xf32>
    %49 = arith.mulf %47, %48 : vector<32x128xf32>
    %50 = arith.mulf %49, %49 : vector<32x128xf32>
    %cst_26 = arith.constant dense<0.000000e+00> : vector<128xf32>
    %51 = vector.multi_reduction <add>, %50, %cst_26 [0] : vector<32x128xf32> to vector<128xf32>
    %52 = vector.shape_cast %51 : vector<128xf32> to vector<1x128xf32>
    %53 = vector.broadcast %4 : vector<1x1xf32> to vector<1x128xf32>
    %54 = arith.divf %52, %53 : vector<1x128xf32>
    %55 = vector.broadcast %45 : vector<1x128xf32> to vector<32x128xf32>
    %56 = arith.subf %39, %55 : vector<32x128xf32>
    %cst_27 = arith.constant 9.99999974E-6 : f32
    %57 = vector.broadcast %cst_27 : f32 to vector<1x128xf32>
    %58 = arith.addf %54, %57 : vector<1x128xf32>
    %59 = math.rsqrt %58 : vector<1x128xf32>
    %60 = vector.broadcast %59 : vector<1x128xf32> to vector<32x128xf32>
    %61 = arith.mulf %56, %60 : vector<32x128xf32>
    %c0_28 = arith.constant 0 : index
    %c0_29 = arith.constant 0 : index
    %62 = vector.load %arg3[%c0_28, %c0_29] : memref<1x128xf32, #tpu.memory_space<vmem>>, vector<1x128xf32>
    %63 = vector.broadcast %62 : vector<1x128xf32> to vector<32x128xf32>
    %64 = arith.mulf %61, %63 : vector<32x128xf32>
    %c0_30 = arith.constant 0 : index
    %c0_31 = arith.constant 0 : index
    %65 = vector.load %arg5[%c0_30, %c0_31] : memref<1x128xf32, #tpu.memory_space<vmem>>, vector<1x128xf32>
    %66 = vector.broadcast %65 : vector<1x128xf32> to vector<32x128xf32>
    %67 = arith.addf %64, %66 : vector<32x128xf32>
    %68 = vector.broadcast %0 : vector<32x1xf32> to vector<32x128xf32>
    %69 = arith.mulf %67, %68 : vector<32x128xf32>
    %c0_32 = arith.constant 0 : index
    %c0_33 = arith.constant 0 : index
    %70 = vector.load %arg8[%c0_32, %c0_33] : memref<32x128xf32, #tpu.memory_space<vmem>>, vector<32x128xf32>
    tpu.vector_store %arg8[%c0_32, %c0_33], %69 {strides = array<i32>} : memref<32x128xf32, #tpu.memory_space<vmem>>, vector<32x128xf32>,
    %cst_34 = arith.constant 0.000000e+00 : f32
    %71 = vector.broadcast %cst_34 : f32 to vector<32x128xf32>
    %72 = vector.extract_strided_slice %6 {offsets = [0, 0], sizes = [32, 128], strides = [1, 1]} : vector<35x128xf32> to vector<32x128xf32>
    %73 = arith.truncf %72 : vector<32x128xf32> to vector<32x128xbf16>
    %c0_35 = arith.constant 0 : index
    %c0_36 = arith.constant 0 : index
    %c0_37 = arith.constant 0 : index
    %74 = vector.load %arg2[%c0_35, %c0_36, %c0_37] : memref<5x128x128xbf16, #tpu.memory_space<vmem>>, vector<1x128x128xbf16>
    %75 = vector.shape_cast %74 : vector<1x128x128xbf16> to vector<128x128xbf16>
    %cst_38 = arith.constant dense<0.000000e+00> : vector<32x128xf32>
    %76 = tpu.matmul %73, %75, %cst_38 {dimension_numbers = #tpu.dot_dimension_numbers<[1], [0], [0], [1], [0, 0, 1, 1], [], []>} : vector<32x128xbf16>, vector<128x128xbf16>, vector<32x128xf32> -> vector<32x128xf32>
    %77 = arith.addf %71, %76 : vector<32x128xf32>
    %78 = vector.extract_strided_slice %8 {offsets = [0, 0], sizes = [32, 128], strides = [1, 1]} : vector<35x128xf32> to vector<32x128xf32>
    %79 = arith.truncf %78 : vector<32x128xf32> to vector<32x128xbf16>
    %c1_39 = arith.constant 1 : index
    %c0_40 = arith.constant 0 : index
    %c0_41 = arith.constant 0 : index
    %80 = vector.load %arg2[%c1_39, %c0_40, %c0_41] : memref<5x128x128xbf16, #tpu.memory_space<vmem>>, vector<1x128x128xbf16>
    %81 = vector.shape_cast %80 : vector<1x128x128xbf16> to vector<128x128xbf16>
    %cst_42 = arith.constant dense<0.000000e+00> : vector<32x128xf32>
    %82 = tpu.matmul %79, %81, %cst_42 {dimension_numbers = #tpu.dot_dimension_numbers<[1], [0], [0], [1], [0, 0, 1, 1], [], []>} : vector<32x128xbf16>, vector<128x128xbf16>, vector<32x128xf32> -> vector<32x128xf32>
    %83 = arith.addf %77, %82 : vector<32x128xf32>
    %84 = vector.extract_strided_slice %6 {offsets = [1, 0], sizes = [32, 128], strides = [1, 1]} : vector<35x128xf32> to vector<32x128xf32>
    %85 = arith.truncf %84 : vector<32x128xf32> to vector<32x128xbf16>
    %c2_43 = arith.constant 2 : index
    %c0_44 = arith.constant 0 : index
    %c0_45 = arith.constant 0 : index
    %86 = vector.load %arg2[%c2_43, %c0_44, %c0_45] : memref<5x128x128xbf16, #tpu.memory_space<vmem>>, vector<1x128x128xbf16>
    %87 = vector.shape_cast %86 : vector<1x128x128xbf16> to vector<128x128xbf16>
    %cst_46 = arith.constant dense<0.000000e+00> : vector<32x128xf32>
    %88 = tpu.matmul %85, %87, %cst_46 {dimension_numbers = #tpu.dot_dimension_numbers<[1], [0], [0], [1], [0, 0, 1, 1], [], []>} : vector<32x128xbf16>, vector<128x128xbf16>, vector<32x128xf32> -> vector<32x128xf32>
    %89 = arith.addf %83, %88 : vector<32x128xf32>
    %90 = vector.extract_strided_slice %8 {offsets = [1, 0], sizes = [32, 128], strides = [1, 1]} : vector<35x128xf32> to vector<32x128xf32>
    %91 = arith.truncf %90 : vector<32x128xf32> to vector<32x128xbf16>
    %c3_47 = arith.constant 3 : index
    %c0_48 = arith.constant 0 : index
    %c0_49 = arith.constant 0 : index
    %92 = vector.load %arg2[%c3_47, %c0_48, %c0_49] : memref<5x128x128xbf16, #tpu.memory_space<vmem>>, vector<1x128x128xbf16>
    %93 = vector.shape_cast %92 : vector<1x128x128xbf16> to vector<128x128xbf16>
    %cst_50 = arith.constant dense<0.000000e+00> : vector<32x128xf32>
    %94 = tpu.matmul %91, %93, %cst_50 {dimension_numbers = #tpu.dot_dimension_numbers<[1], [0], [0], [1], [0, 0, 1, 1], [], []>} : vector<32x128xbf16>, vector<128x128xbf16>, vector<32x128xf32> -> vector<32x128xf32>
    %95 = arith.addf %89, %94 : vector<32x128xf32>
    %96 = vector.extract_strided_slice %6 {offsets = [2, 0], sizes = [32, 128], strides = [1, 1]} : vector<35x128xf32> to vector<32x128xf32>
    %97 = arith.truncf %96 : vector<32x128xf32> to vector<32x128xbf16>
    %c4_51 = arith.constant 4 : index
    %c0_52 = arith.constant 0 : index
    %c0_53 = arith.constant 0 : index
    %98 = vector.load %arg2[%c4_51, %c0_52, %c0_53] : memref<5x128x128xbf16, #tpu.memory_space<vmem>>, vector<1x128x128xbf16>
    %99 = vector.shape_cast %98 : vector<1x128x128xbf16> to vector<128x128xbf16>
    %cst_54 = arith.constant dense<0.000000e+00> : vector<32x128xf32>
    %100 = tpu.matmul %97, %99, %cst_54 {dimension_numbers = #tpu.dot_dimension_numbers<[1], [0], [0], [1], [0, 0, 1, 1], [], []>} : vector<32x128xbf16>, vector<128x128xbf16>, vector<32x128xf32> -> vector<32x128xf32>
    %101 = arith.addf %95, %100 : vector<32x128xf32>
    %102 = vector.broadcast %0 : vector<32x1xf32> to vector<32x128xf32>
    %103 = arith.mulf %101, %102 : vector<32x128xf32>
    %cst_55 = arith.constant dense<0.000000e+00> : vector<128xf32>
    %104 = vector.multi_reduction <add>, %103, %cst_55 [0] : vector<32x128xf32> to vector<128xf32>
    %105 = vector.shape_cast %104 : vector<128xf32> to vector<1x128xf32>
    %106 = vector.broadcast %4 : vector<1x1xf32> to vector<1x128xf32>
    %107 = arith.divf %105, %106 : vector<1x128xf32>
    %108 = vector.broadcast %107 : vector<1x128xf32> to vector<32x128xf32>
    %109 = arith.subf %101, %108 : vector<32x128xf32>
    %110 = vector.broadcast %0 : vector<32x1xf32> to vector<32x128xf32>
    %111 = arith.mulf %109, %110 : vector<32x128xf32>
    %112 = arith.mulf %111, %111 : vector<32x128xf32>
    %cst_56 = arith.constant dense<0.000000e+00> : vector<128xf32>
    %113 = vector.multi_reduction <add>, %112, %cst_56 [0] : vector<32x128xf32> to vector<128xf32>
    %114 = vector.shape_cast %113 : vector<128xf32> to vector<1x128xf32>
    %115 = vector.broadcast %4 : vector<1x1xf32> to vector<1x128xf32>
    %116 = arith.divf %114, %115 : vector<1x128xf32>
    %117 = vector.broadcast %107 : vector<1x128xf32> to vector<32x128xf32>
    %118 = arith.subf %101, %117 : vector<32x128xf32>
    %cst_57 = arith.constant 9.99999974E-6 : f32
    %119 = vector.broadcast %cst_57 : f32 to vector<1x128xf32>
    %120 = arith.addf %116, %119 : vector<1x128xf32>
    %121 = math.rsqrt %120 : vector<1x128xf32>
    %122 = vector.broadcast %121 : vector<1x128xf32> to vector<32x128xf32>
    %123 = arith.mulf %118, %122 : vector<32x128xf32>
    %c0_58 = arith.constant 0 : index
    %c0_59 = arith.constant 0 : index
    %124 = vector.load %arg4[%c0_58, %c0_59] : memref<1x128xf32, #tpu.memory_space<vmem>>, vector<1x128xf32>
    %125 = vector.broadcast %124 : vector<1x128xf32> to vector<32x128xf32>
    %126 = arith.mulf %123, %125 : vector<32x128xf32>
    %c0_60 = arith.constant 0 : index
    %c0_61 = arith.constant 0 : index
    %127 = vector.load %arg6[%c0_60, %c0_61] : memref<1x128xf32, #tpu.memory_space<vmem>>, vector<1x128xf32>
    %128 = vector.broadcast %127 : vector<1x128xf32> to vector<32x128xf32>
    %129 = arith.addf %126, %128 : vector<32x128xf32>
    %cst_62 = arith.constant 0.000000e+00 : f32
    %130 = vector.broadcast %cst_62 : f32 to vector<32x128xf32>
    %131 = arith.maximumf %129, %130 : vector<32x128xf32>
    %132 = vector.broadcast %0 : vector<32x1xf32> to vector<32x128xf32>
    %133 = arith.mulf %131, %132 : vector<32x128xf32>
    %c0_63 = arith.constant 0 : index
    %c0_64 = arith.constant 0 : index
    %134 = vector.load %arg9[%c0_63, %c0_64] : memref<32x128xf32, #tpu.memory_space<vmem>>, vector<32x128xf32>
    tpu.vector_store %arg9[%c0_63, %c0_64], %133 {strides = array<i32>} : memref<32x128xf32, #tpu.memory_space<vmem>>, vector<32x128xf32>,
    return
  }
}

module attributes {stable_mosaic.version = 11 : i64} {
  func.func @_conv_stage_kernel(%arg0: memref<1x53x128xf32, #tpu.memory_space<vmem>>, %arg1: memref<5x128x128xbf16, #tpu.memory_space<vmem>>, %arg2: memref<1x128xf32, #tpu.memory_space<vmem>>, %arg3: memref<1x128xf32, #tpu.memory_space<vmem>>, %arg4: memref<48x1xf32, #tpu.memory_space<vmem>>, %arg5: memref<48x128xf32, #tpu.memory_space<vmem>>, %arg6: memref<48x128xf32, #tpu.memory_space<vmem>>) attributes {dimension_semantics = [], scalar_prefetch = 0 : i64, scratch_operands = 0 : i64, tpu.core_type = #tpu.core_type<tc>} {
    %c0 = arith.constant 0 : index
    %c0_0 = arith.constant 0 : index
    %0 = vector.load %arg4[%c0, %c0_0] : memref<48x1xf32, #tpu.memory_space<vmem>>, vector<48x1xf32>
    %cst = arith.constant dense<0.000000e+00> : vector<1xf32>
    %1 = vector.multi_reduction <add>, %0, %cst [0] : vector<48x1xf32> to vector<1xf32>
    %2 = vector.shape_cast %1 : vector<1xf32> to vector<1x1xf32>
    %cst_1 = arith.constant 1.000000e+00 : f32
    %3 = vector.broadcast %cst_1 : f32 to vector<1x1xf32>
    %4 = arith.maximumf %2, %3 : vector<1x1xf32>
    %c0_2 = arith.constant 0 : index
    %c0_3 = arith.constant 0 : index
    %c0_4 = arith.constant 0 : index
    %5 = vector.load %arg0[%c0_2, %c0_3, %c0_4] : memref<1x53x128xf32, #tpu.memory_space<vmem>>, vector<1x53x128xf32>
    %6 = vector.shape_cast %5 : vector<1x53x128xf32> to vector<53x128xf32>
    %cst_5 = arith.constant 0.000000e+00 : f32
    %7 = vector.broadcast %cst_5 : f32 to vector<48x128xf32>
    %8 = vector.extract_strided_slice %6 {offsets = [0, 0], sizes = [48, 128], strides = [1, 1]} : vector<53x128xf32> to vector<48x128xf32>
    %9 = arith.truncf %8 : vector<48x128xf32> to vector<48x128xbf16>
    %c0_6 = arith.constant 0 : index
    %c0_7 = arith.constant 0 : index
    %c0_8 = arith.constant 0 : index
    %10 = vector.load %arg1[%c0_6, %c0_7, %c0_8] : memref<5x128x128xbf16, #tpu.memory_space<vmem>>, vector<1x128x128xbf16>
    %11 = vector.shape_cast %10 : vector<1x128x128xbf16> to vector<128x128xbf16>
    %cst_9 = arith.constant dense<0.000000e+00> : vector<48x128xf32>
    %12 = tpu.matmul %9, %11, %cst_9 {dimension_numbers = #tpu.dot_dimension_numbers<[1], [0], [0], [1], [0, 0, 1, 1], [], []>} : vector<48x128xbf16>, vector<128x128xbf16>, vector<48x128xf32> -> vector<48x128xf32>
    %13 = arith.addf %7, %12 : vector<48x128xf32>
    %14 = vector.extract_strided_slice %6 {offsets = [1, 0], sizes = [48, 128], strides = [1, 1]} : vector<53x128xf32> to vector<48x128xf32>
    %15 = arith.truncf %14 : vector<48x128xf32> to vector<48x128xbf16>
    %c1 = arith.constant 1 : index
    %c0_10 = arith.constant 0 : index
    %c0_11 = arith.constant 0 : index
    %16 = vector.load %arg1[%c1, %c0_10, %c0_11] : memref<5x128x128xbf16, #tpu.memory_space<vmem>>, vector<1x128x128xbf16>
    %17 = vector.shape_cast %16 : vector<1x128x128xbf16> to vector<128x128xbf16>
    %cst_12 = arith.constant dense<0.000000e+00> : vector<48x128xf32>
    %18 = tpu.matmul %15, %17, %cst_12 {dimension_numbers = #tpu.dot_dimension_numbers<[1], [0], [0], [1], [0, 0, 1, 1], [], []>} : vector<48x128xbf16>, vector<128x128xbf16>, vector<48x128xf32> -> vector<48x128xf32>
    %19 = arith.addf %13, %18 : vector<48x128xf32>
    %20 = vector.extract_strided_slice %6 {offsets = [2, 0], sizes = [48, 128], strides = [1, 1]} : vector<53x128xf32> to vector<48x128xf32>
    %21 = arith.truncf %20 : vector<48x128xf32> to vector<48x128xbf16>
    %c2 = arith.constant 2 : index
    %c0_13 = arith.constant 0 : index
    %c0_14 = arith.constant 0 : index
    %22 = vector.load %arg1[%c2, %c0_13, %c0_14] : memref<5x128x128xbf16, #tpu.memory_space<vmem>>, vector<1x128x128xbf16>
    %23 = vector.shape_cast %22 : vector<1x128x128xbf16> to vector<128x128xbf16>
    %cst_15 = arith.constant dense<0.000000e+00> : vector<48x128xf32>
    %24 = tpu.matmul %21, %23, %cst_15 {dimension_numbers = #tpu.dot_dimension_numbers<[1], [0], [0], [1], [0, 0, 1, 1], [], []>} : vector<48x128xbf16>, vector<128x128xbf16>, vector<48x128xf32> -> vector<48x128xf32>
    %25 = arith.addf %19, %24 : vector<48x128xf32>
    %26 = vector.extract_strided_slice %6 {offsets = [3, 0], sizes = [48, 128], strides = [1, 1]} : vector<53x128xf32> to vector<48x128xf32>
    %27 = arith.truncf %26 : vector<48x128xf32> to vector<48x128xbf16>
    %c3 = arith.constant 3 : index
    %c0_16 = arith.constant 0 : index
    %c0_17 = arith.constant 0 : index
    %28 = vector.load %arg1[%c3, %c0_16, %c0_17] : memref<5x128x128xbf16, #tpu.memory_space<vmem>>, vector<1x128x128xbf16>
    %29 = vector.shape_cast %28 : vector<1x128x128xbf16> to vector<128x128xbf16>
    %cst_18 = arith.constant dense<0.000000e+00> : vector<48x128xf32>
    %30 = tpu.matmul %27, %29, %cst_18 {dimension_numbers = #tpu.dot_dimension_numbers<[1], [0], [0], [1], [0, 0, 1, 1], [], []>} : vector<48x128xbf16>, vector<128x128xbf16>, vector<48x128xf32> -> vector<48x128xf32>
    %31 = arith.addf %25, %30 : vector<48x128xf32>
    %32 = vector.extract_strided_slice %6 {offsets = [4, 0], sizes = [48, 128], strides = [1, 1]} : vector<53x128xf32> to vector<48x128xf32>
    %33 = arith.truncf %32 : vector<48x128xf32> to vector<48x128xbf16>
    %c4 = arith.constant 4 : index
    %c0_19 = arith.constant 0 : index
    %c0_20 = arith.constant 0 : index
    %34 = vector.load %arg1[%c4, %c0_19, %c0_20] : memref<5x128x128xbf16, #tpu.memory_space<vmem>>, vector<1x128x128xbf16>
    %35 = vector.shape_cast %34 : vector<1x128x128xbf16> to vector<128x128xbf16>
    %cst_21 = arith.constant dense<0.000000e+00> : vector<48x128xf32>
    %36 = tpu.matmul %33, %35, %cst_21 {dimension_numbers = #tpu.dot_dimension_numbers<[1], [0], [0], [1], [0, 0, 1, 1], [], []>} : vector<48x128xbf16>, vector<128x128xbf16>, vector<48x128xf32> -> vector<48x128xf32>
    %37 = arith.addf %31, %36 : vector<48x128xf32>
    %38 = vector.broadcast %0 : vector<48x1xf32> to vector<48x128xf32>
    %39 = arith.mulf %37, %38 : vector<48x128xf32>
    %cst_22 = arith.constant dense<0.000000e+00> : vector<128xf32>
    %40 = vector.multi_reduction <add>, %39, %cst_22 [0] : vector<48x128xf32> to vector<128xf32>
    %41 = vector.shape_cast %40 : vector<128xf32> to vector<1x128xf32>
    %42 = vector.broadcast %4 : vector<1x1xf32> to vector<1x128xf32>
    %43 = arith.divf %41, %42 : vector<1x128xf32>
    %44 = vector.broadcast %43 : vector<1x128xf32> to vector<48x128xf32>
    %45 = arith.subf %37, %44 : vector<48x128xf32>
    %46 = vector.broadcast %0 : vector<48x1xf32> to vector<48x128xf32>
    %47 = arith.mulf %45, %46 : vector<48x128xf32>
    %48 = arith.mulf %47, %47 : vector<48x128xf32>
    %cst_23 = arith.constant dense<0.000000e+00> : vector<128xf32>
    %49 = vector.multi_reduction <add>, %48, %cst_23 [0] : vector<48x128xf32> to vector<128xf32>
    %50 = vector.shape_cast %49 : vector<128xf32> to vector<1x128xf32>
    %51 = vector.broadcast %4 : vector<1x1xf32> to vector<1x128xf32>
    %52 = arith.divf %50, %51 : vector<1x128xf32>
    %53 = vector.broadcast %43 : vector<1x128xf32> to vector<48x128xf32>
    %54 = arith.subf %37, %53 : vector<48x128xf32>
    %cst_24 = arith.constant 9.99999974E-6 : f32
    %55 = vector.broadcast %cst_24 : f32 to vector<1x128xf32>
    %56 = arith.addf %52, %55 : vector<1x128xf32>
    %57 = math.rsqrt %56 : vector<1x128xf32>
    %58 = vector.broadcast %57 : vector<1x128xf32> to vector<48x128xf32>
    %59 = arith.mulf %54, %58 : vector<48x128xf32>
    %c0_25 = arith.constant 0 : index
    %c0_26 = arith.constant 0 : index
    %60 = vector.load %arg2[%c0_25, %c0_26] : memref<1x128xf32, #tpu.memory_space<vmem>>, vector<1x128xf32>
    %61 = vector.broadcast %60 : vector<1x128xf32> to vector<48x128xf32>
    %62 = arith.mulf %59, %61 : vector<48x128xf32>
    %c0_27 = arith.constant 0 : index
    %c0_28 = arith.constant 0 : index
    %63 = vector.load %arg3[%c0_27, %c0_28] : memref<1x128xf32, #tpu.memory_space<vmem>>, vector<1x128xf32>
    %64 = vector.broadcast %63 : vector<1x128xf32> to vector<48x128xf32>
    %65 = arith.addf %62, %64 : vector<48x128xf32>
    %cst_29 = arith.constant 0.000000e+00 : f32
    %66 = vector.broadcast %cst_29 : f32 to vector<48x128xf32>
    %67 = arith.maximumf %65, %66 : vector<48x128xf32>
    %c0_30 = arith.constant 0 : index
    %c0_31 = arith.constant 0 : index
    %68 = vector.load %arg5[%c0_30, %c0_31] : memref<48x128xf32, #tpu.memory_space<vmem>>, vector<48x128xf32>
    %69 = arith.addf %68, %67 : vector<48x128xf32>
    %70 = vector.broadcast %0 : vector<48x1xf32> to vector<48x128xf32>
    %71 = arith.mulf %69, %70 : vector<48x128xf32>
    %c0_32 = arith.constant 0 : index
    %c0_33 = arith.constant 0 : index
    %72 = vector.load %arg6[%c0_32, %c0_33] : memref<48x128xf32, #tpu.memory_space<vmem>>, vector<48x128xf32>
    tpu.vector_store %arg6[%c0_32, %c0_33], %71 {strides = array<i32>} : memref<48x128xf32, #tpu.memory_space<vmem>>, vector<48x128xf32>,
    return
  }
}

module attributes {stable_mosaic.version = 11 : i64} {
  func.func @_pool_head_kernel(%arg0: memref<48x128xf32, #tpu.memory_space<vmem>>, %arg1: memref<48x1xf32, #tpu.memory_space<vmem>>, %arg2: memref<128x128xbf16, #tpu.memory_space<vmem>>, %arg3: memref<128x128xbf16, #tpu.memory_space<vmem>>, %arg4: memref<1x128xf32, #tpu.memory_space<vmem>>, %arg5: memref<128x128xbf16, #tpu.memory_space<vmem>>, %arg6: memref<1x128xf32, #tpu.memory_space<vmem>>, %arg7: memref<2x128xf32, #tpu.memory_space<vmem>>) attributes {dimension_semantics = [], scalar_prefetch = 0 : i64, scratch_operands = 0 : i64, tpu.core_type = #tpu.core_type<tc>} {
    %c0 = arith.constant 0 : index
    %c0_0 = arith.constant 0 : index
    %0 = vector.load %arg2[%c0, %c0_0] : memref<128x128xbf16, #tpu.memory_space<vmem>>, vector<128x128xbf16>
    %c0_1 = arith.constant 0 : index
    %c0_2 = arith.constant 0 : index
    %1 = vector.load %arg3[%c0_1, %c0_2] : memref<128x128xbf16, #tpu.memory_space<vmem>>, vector<128x128xbf16>
    %c0_3 = arith.constant 0 : index
    %c0_4 = arith.constant 0 : index
    %2 = vector.load %arg5[%c0_3, %c0_4] : memref<128x128xbf16, #tpu.memory_space<vmem>>, vector<128x128xbf16>
    %c0_5 = arith.constant 0 : index
    %c0_6 = arith.constant 0 : index
    %3 = vector.load %arg4[%c0_5, %c0_6] : memref<1x128xf32, #tpu.memory_space<vmem>>, vector<1x128xf32>
    %c0_7 = arith.constant 0 : index
    %c0_8 = arith.constant 0 : index
    %4 = vector.load %arg6[%c0_7, %c0_8] : memref<1x128xf32, #tpu.memory_space<vmem>>, vector<1x128xf32>
    %c0_9 = arith.constant 0 : index
    %c0_10 = arith.constant 0 : index
    %5 = vector.load %arg0[%c0_9, %c0_10] : memref<48x128xf32, #tpu.memory_space<vmem>>, vector<24x128xf32>
    %c0_11 = arith.constant 0 : index
    %c0_12 = arith.constant 0 : index
    %6 = vector.load %arg1[%c0_11, %c0_12] : memref<48x1xf32, #tpu.memory_space<vmem>>, vector<24x1xf32>
    %cst = arith.constant dense<0.000000e+00> : vector<1xf32>
    %7 = vector.multi_reduction <add>, %6, %cst [0] : vector<24x1xf32> to vector<1xf32>
    %8 = vector.shape_cast %7 : vector<1xf32> to vector<1x1xf32>
    %cst_13 = arith.constant 1.000000e+00 : f32
    %9 = vector.broadcast %cst_13 : f32 to vector<1x1xf32>
    %10 = arith.maximumf %8, %9 : vector<1x1xf32>
    %11 = vector.broadcast %6 : vector<24x1xf32> to vector<24x128xf32>
    %12 = arith.mulf %5, %11 : vector<24x128xf32>
    %cst_14 = arith.constant dense<0.000000e+00> : vector<128xf32>
    %13 = vector.multi_reduction <add>, %12, %cst_14 [0] : vector<24x128xf32> to vector<128xf32>
    %14 = vector.shape_cast %13 : vector<128xf32> to vector<1x128xf32>
    %15 = vector.broadcast %10 : vector<1x1xf32> to vector<1x128xf32>
    %16 = arith.divf %14, %15 : vector<1x128xf32>
    %cst_15 = arith.constant 0.000000e+00 : f32
    %17 = vector.broadcast %cst_15 : f32 to vector<24x1xf32>
    %18 = arith.cmpf ogt, %6, %17 : vector<24x1xf32>
    %cst_16 = arith.constant -1.000000e+30 : f32
    %19 = vector.broadcast %cst_16 : f32 to vector<24x128xf32>
    %20 = vector.shape_cast %18 : vector<24x1xi1> to vector<24x1xi1>
    %21 = vector.broadcast %20 : vector<24x1xi1> to vector<24x128xi1>
    %22 = arith.select %21, %5, %19 : vector<24x128xi1>, vector<24x128xf32>
    %cst_17 = arith.constant dense<0xFF800000> : vector<128xf32>
    %23 = vector.multi_reduction <maximumf>, %22, %cst_17 [0] : vector<24x128xf32> to vector<128xf32>
    %24 = vector.shape_cast %23 : vector<128xf32> to vector<1x128xf32>
    %25 = arith.truncf %16 : vector<1x128xf32> to vector<1x128xbf16>
    %cst_18 = arith.constant dense<0.000000e+00> : vector<1x128xf32>
    %26 = tpu.matmul %25, %0, %cst_18 {dimension_numbers = #tpu.dot_dimension_numbers<[1], [0], [0], [1], [0, 0, 1, 1], [], []>} : vector<1x128xbf16>, vector<128x128xbf16>, vector<1x128xf32> -> vector<1x128xf32>
    %27 = arith.truncf %24 : vector<1x128xf32> to vector<1x128xbf16>
    %cst_19 = arith.constant dense<0.000000e+00> : vector<1x128xf32>
    %28 = tpu.matmul %27, %1, %cst_19 {dimension_numbers = #tpu.dot_dimension_numbers<[1], [0], [0], [1], [0, 0, 1, 1], [], []>} : vector<1x128xbf16>, vector<128x128xbf16>, vector<1x128xf32> -> vector<1x128xf32>
    %29 = arith.addf %26, %28 : vector<1x128xf32>
    %30 = arith.addf %29, %3 : vector<1x128xf32>
    %cst_20 = arith.constant 0.000000e+00 : f32
    %31 = vector.broadcast %cst_20 : f32 to vector<1x128xf32>
    %32 = arith.maximumf %30, %31 : vector<1x128xf32>
    %33 = arith.truncf %32 : vector<1x128xf32> to vector<1x128xbf16>
    %cst_21 = arith.constant dense<0.000000e+00> : vector<1x128xf32>
    %34 = tpu.matmul %33, %2, %cst_21 {dimension_numbers = #tpu.dot_dimension_numbers<[1], [0], [0], [1], [0, 0, 1, 1], [], []>} : vector<1x128xbf16>, vector<128x128xbf16>, vector<1x128xf32> -> vector<1x128xf32>
    %35 = arith.addf %34, %4 : vector<1x128xf32>
    %c0_22 = arith.constant 0 : index
    %c0_23 = arith.constant 0 : index
    %36 = vector.load %arg7[%c0_22, %c0_23] : memref<2x128xf32, #tpu.memory_space<vmem>>, vector<1x128xf32>
    tpu.vector_store %arg7[%c0_22, %c0_23], %35 {strides = array<i32>} : memref<2x128xf32, #tpu.memory_space<vmem>>, vector<1x128xf32>,
    %c24 = arith.constant 24 : index
    %c0_24 = arith.constant 0 : index
    %37 = vector.load %arg0[%c24, %c0_24] : memref<48x128xf32, #tpu.memory_space<vmem>>, vector<24x128xf32>
    %c24_25 = arith.constant 24 : index
    %c0_26 = arith.constant 0 : index
    %38 = vector.load %arg1[%c24_25, %c0_26] : memref<48x1xf32, #tpu.memory_space<vmem>>, vector<24x1xf32>
    %cst_27 = arith.constant dense<0.000000e+00> : vector<1xf32>
    %39 = vector.multi_reduction <add>, %38, %cst_27 [0] : vector<24x1xf32> to vector<1xf32>
    %40 = vector.shape_cast %39 : vector<1xf32> to vector<1x1xf32>
    %cst_28 = arith.constant 1.000000e+00 : f32
    %41 = vector.broadcast %cst_28 : f32 to vector<1x1xf32>
    %42 = arith.maximumf %40, %41 : vector<1x1xf32>
    %43 = vector.broadcast %38 : vector<24x1xf32> to vector<24x128xf32>
    %44 = arith.mulf %37, %43 : vector<24x128xf32>
    %cst_29 = arith.constant dense<0.000000e+00> : vector<128xf32>
    %45 = vector.multi_reduction <add>, %44, %cst_29 [0] : vector<24x128xf32> to vector<128xf32>
    %46 = vector.shape_cast %45 : vector<128xf32> to vector<1x128xf32>
    %47 = vector.broadcast %42 : vector<1x1xf32> to vector<1x128xf32>
    %48 = arith.divf %46, %47 : vector<1x128xf32>
    %cst_30 = arith.constant 0.000000e+00 : f32
    %49 = vector.broadcast %cst_30 : f32 to vector<24x1xf32>
    %50 = arith.cmpf ogt, %38, %49 : vector<24x1xf32>
    %cst_31 = arith.constant -1.000000e+30 : f32
    %51 = vector.broadcast %cst_31 : f32 to vector<24x128xf32>
    %52 = vector.shape_cast %50 : vector<24x1xi1> to vector<24x1xi1>
    %53 = vector.broadcast %52 : vector<24x1xi1> to vector<24x128xi1>
    %54 = arith.select %53, %37, %51 : vector<24x128xi1>, vector<24x128xf32>
    %cst_32 = arith.constant dense<0xFF800000> : vector<128xf32>
    %55 = vector.multi_reduction <maximumf>, %54, %cst_32 [0] : vector<24x128xf32> to vector<128xf32>
    %56 = vector.shape_cast %55 : vector<128xf32> to vector<1x128xf32>
    %57 = arith.truncf %48 : vector<1x128xf32> to vector<1x128xbf16>
    %cst_33 = arith.constant dense<0.000000e+00> : vector<1x128xf32>
    %58 = tpu.matmul %57, %0, %cst_33 {dimension_numbers = #tpu.dot_dimension_numbers<[1], [0], [0], [1], [0, 0, 1, 1], [], []>} : vector<1x128xbf16>, vector<128x128xbf16>, vector<1x128xf32> -> vector<1x128xf32>
    %59 = arith.truncf %56 : vector<1x128xf32> to vector<1x128xbf16>
    %cst_34 = arith.constant dense<0.000000e+00> : vector<1x128xf32>
    %60 = tpu.matmul %59, %1, %cst_34 {dimension_numbers = #tpu.dot_dimension_numbers<[1], [0], [0], [1], [0, 0, 1, 1], [], []>} : vector<1x128xbf16>, vector<128x128xbf16>, vector<1x128xf32> -> vector<1x128xf32>
    %61 = arith.addf %58, %60 : vector<1x128xf32>
    %62 = arith.addf %61, %3 : vector<1x128xf32>
    %cst_35 = arith.constant 0.000000e+00 : f32
    %63 = vector.broadcast %cst_35 : f32 to vector<1x128xf32>
    %64 = arith.maximumf %62, %63 : vector<1x128xf32>
    %65 = arith.truncf %64 : vector<1x128xf32> to vector<1x128xbf16>
    %cst_36 = arith.constant dense<0.000000e+00> : vector<1x128xf32>
    %66 = tpu.matmul %65, %2, %cst_36 {dimension_numbers = #tpu.dot_dimension_numbers<[1], [0], [0], [1], [0, 0, 1, 1], [], []>} : vector<1x128xbf16>, vector<128x128xbf16>, vector<1x128xf32> -> vector<1x128xf32>
    %67 = arith.addf %66, %4 : vector<1x128xf32>
    %c1 = arith.constant 1 : index
    %c0_37 = arith.constant 0 : index
    %68 = vector.load %arg7[%c1, %c0_37] : memref<2x128xf32, #tpu.memory_space<vmem>>, vector<1x128xf32>
    tpu.vector_store %arg7[%c1, %c0_37], %67 {strides = array<i32>} : memref<2x128xf32, #tpu.memory_space<vmem>>, vector<1x128xf32>,
    return
  }
}

</mosaic_0001>

<bundles_post_ra>
// kernel: _forward_padded.6
= control target key start
LH: loop header
LB: loop body
LE: loop exit
PB: predicated region body
PF: predicated region fallthrough
CT: control target
= control target key end

     0   :  { %v1798_v0 = vmov 0.0   ;;  %vm1799_vm0 = vmmov 0   ;;  %v1800_v8 = vmov 0   ;;  %vm605_vm1 = vsmask.f32 7424  ;;  %s2332_s1 = inlined_call_operand.vmem [shape: bf16[7,128,128], index: 1, kind: input, shape index: {}]   ;;  %s2333_s0 = inlined_call_operand.vmem [shape: f32[4,50,128], index: 0, kind: input, shape index: {}]   ;;  %s2334_s4 = inlined_call_operand.vmem [shape: f32[48,1], index: 4, kind: input, shape index: {}]   ;;  %s2335_s2 = inlined_call_operand.vmem [shape: f32[1,128], index: 2, kind: input, shape index: {}]   ;;  %s2336_s3 = inlined_call_operand.vmem [shape: f32[1,128], index: 3, kind: input, shape index: {}]   ;;  %s2337_s5 = inlined_call_operand.vmem [shape: f32[48,128], index: 5, kind: output, shape index: {}]  }
   0x1   :  { %1459 = vmatprep.subr.bf16.mxu1 %v1798_v0  ;;  %1543 = vmatprep.subr.bf16.mxu0 %v1798_v0  ;;  %v1738_v1 = vld [vmem:[%s2332_s1 + $0x40] sm:$0xff]   ;;  %v1740_v3 = vld [vmem:[%s2332_s1 + $0x48] sm:$0xff]   ;;  %v1742_v5 = vld [vmem:[%s2332_s1 + $0x50] sm:$0xff]   ;;  %vm27_vm2 = vcmask 7168  }
   0x2   :  { %v1739_v2 = vld [vmem:[%s2332_s1 + $0xc0] sm:$0xff]   ;;  %1475 = vmatprep.mubr.msk.bf16.mxu1 %vm1799_vm0, %v1798_v0  ;;  %1559 = vmatprep.mubr.msk.bf16.mxu0 %vm1799_vm0, %v1798_v0  ;;  %v1741_v4 = vld [vmem:[%s2332_s1 + $0xc8] sm:$0xff]   ;;  %v1743_v6 = vld [vmem:[%s2332_s1 + $0xd0] sm:$0xff]  }
   0x3   :  { %1460 = vmatpush3.bf16.msra.mxu1 %v1738_v1  ;;  %1544 = vmatpush3.bf16.msra.mxu0 %v1739_v2  ;;  %v1744_v7 = vld [vmem:[%s2332_s1 + $0x58] sm:$0xff]   ;;  %v1746_v10 = vld [vmem:[%s2332_s1 + $0x60] sm:$0xff]   ;;  %v1748_v12 = vld [vmem:[%s2332_s1 + $0x68] sm:$0xff]  }
   0x4   :  { %1461 = vmatprep.subr.bf16.mxu1 %v1798_v0  ;;  %1545 = vmatprep.subr.bf16.mxu0 %v1798_v0  ;;  %v1745_v9 = vld [vmem:[%s2332_s1 + $0xd8] sm:$0xff]   ;;  %v1747_v11 = vld [vmem:[%s2332_s1 + $0xe0] sm:$0xff]   ;;  %v1749_v13 = vld [vmem:[%s2332_s1 + $0xe8] sm:$0xff]  }
   0x5   :  { %1736 = vset.pattern.permute.xlu0 %v1800_v8  ;;  %1737 = vset.pattern.permute.xlu1 %v1800_v8  ;;  %v1750_v14 = vld [vmem:[%s2332_s1 + $0x70] sm:$0xff]   ;;  %v1752_v16 = vld [vmem:[%s2332_s1 + $0x78] sm:$0xff]   ;;  %v1209_v19 = vld [vmem:[%s2333_s0 + $0x40] sm:$0xff] }
   0x6   :  { %v1751_v15 = vld [vmem:[%s2332_s1 + $0xf0] sm:$0xff]   ;;  %v1753_v17 = vld [vmem:[%s2332_s1 + $0xf8] sm:$0xff]   ;;  %v1222_v20 = vld [vmem:[%s2333_s0 + $0xa8] sm:$0xff] }
   0x7   :  { %1462 = vmatpush3.bf16.msra.mxu1 %v1740_v3  ;;  %1546 = vmatpush3.bf16.msra.mxu0 %v1741_v4  ;;  %v1208_v18 = vld [vmem:[%s2333_s0 + $0x38] sm:$0xff]  ;;  %v1223_v21 = vld [vmem:[%s2333_s0 + $0xb0] sm:$0xff]  ;;  %v1754_v23 = vld [vmem:[%s2332_s1] sm:$0xff]  }
   0x8   :  { %1463 = vmatprep.subr.bf16.mxu1 %v1798_v0  ;;  %1547 = vmatprep.subr.bf16.mxu0 %v1798_v0  ;;  %v1911_v22 = vpack.c.bf16 %v1209_v19, %v1208_v18  ;;  %v456_v24 = vpack.c.bf16 %v1223_v21, %v1222_v20  ;;  %v1755_v25 = vld [vmem:[%s2332_s1 + $0x100] sm:$0xff]   ;;  %v1756_v26 = vld [vmem:[%s2332_s1 + $0x8] sm:$0xff]   ;;  %v1211_v29 = vld [vmem:[%s2333_s0 + $0x50] sm:$0xff] }
   0x9   :  { %v1210_v27 = vld [vmem:[%s2333_s0 + $0x48] sm:$0xff]  ;;  %v1224_v30 = vld [vmem:[%s2333_s0 + $0xb8] sm:$0xff]  ;;  %v1225_v31 = vld [vmem:[%s2333_s0 + $0xc0] sm:$0xff] }
   0xa   :  { %v1757_v28 = vld [vmem:[%s2332_s1 + $0x108] sm:$0xff]   ;;  %v1946_v32 = vpack.c.bf16 %v1211_v29, %v1210_v27  ;;  %v1758_v33 = vld [vmem:[%s2332_s1 + $0x10] sm:$0xff]   ;;  %v457_v34 = vpack.c.bf16 %v1225_v31, %v1224_v30  ;;  %v1760_v36 = vld [vmem:[%s2332_s1 + $0x18] sm:$0xff]  }
   0xb   :  { %1464 = vmatpush3.bf16.msra.mxu1 %v1742_v5  ;;  %1548 = vmatpush3.bf16.msra.mxu0 %v1743_v6  ;;  %v1759_v35 = vld [vmem:[%s2332_s1 + $0x110] sm:$0xff]   ;;  %v1212_v37 = vld [vmem:[%s2333_s0 + $0x58] sm:$0xff]  ;;  %v1213_v38 = vld [vmem:[%s2333_s0 + $0x60] sm:$0xff] }
   0xc   :  { %1465 = vmatprep.subr.bf16.mxu1 %v1798_v0  ;;  %1549 = vmatprep.subr.bf16.mxu0 %v1798_v0  ;;  %v1761_v39 = vld [vmem:[%s2332_s1 + $0x118] sm:$0xff]   ;;  %v1226_v40 = vld [vmem:[%s2333_s0 + $0xc8] sm:$0xff]  ;;  %v1227_v41 = vld [vmem:[%s2333_s0 + $0xd0] sm:$0xff]  ;;  %v1990_v45 = vpack.c.bf16 %v1213_v38, %v1212_v37 }
   0xd   :  { %v46_v42 = vld [vmem:[%s2333_s0] sm:$0xff]  ;;  %v47_v43 = vld [vmem:[%s2333_s0 + $0x8] sm:$0xff]  ;;  %v458_v47 = vpack.c.bf16 %v1227_v41, %v1226_v40  ;;  %v48_v49 = vld [vmem:[%s2333_s0 + $0x10] sm:$0xff] }
   0xe   :  { %v1762_v44 = vld [vmem:[%s2332_s1 + $0x20] sm:$0xff]   ;;  %v1995_v48 = vpack.c.bf16 %v47_v43, %v46_v42  ;;  %v49_v50 = vld [vmem:[%s2333_s0 + $0x18] sm:$0xff]  ;;  %v1764_v51 = vld [vmem:[%s2332_s1 + $0x28] sm:$0xff]  }
   0xf   :  { %1466 = vmatpush3.bf16.msra.mxu1 %v1744_v7  ;;  %1550 = vmatpush3.bf16.msra.mxu0 %v1745_v9  ;;  %v1763_v46 = vld [vmem:[%s2332_s1 + $0x120] sm:$0xff]   ;;  %v1765_v52 = vld [vmem:[%s2332_s1 + $0x128] sm:$0xff]   ;;  %v2014_v54 = vpack.c.bf16 %v49_v50, %v48_v49  ;;  %v1766_v55 = vld [vmem:[%s2332_s1 + $0x30] sm:$0xff]  }
  0x10   :  { %1467 = vmatprep.subr.bf16.mxu1 %v1798_v0  ;;  %1551 = vmatprep.subr.bf16.mxu0 %v1798_v0  ;;  %v609_v53 = vshll.u32 %v1995_v48, 16  ;;  %v1767_v56 = vld [vmem:[%s2332_s1 + $0x130] sm:$0xff]   ;;  %v607_v57 = vshrl.u32 %v1995_v48, 16  ;;  %v50_v59 = vld [vmem:[%s2333_s0 + $0x20] sm:$0xff]  ;;  %v1216_v61 = vld [vmem:[%s2333_s0 + $0x78] sm:$0xff] }
  0x11   :  { %v1215_v60 = vld [vmem:[%s2333_s0 + $0x70] sm:$0xff]  ;;  %v614_v62 = vshll.u32 %v2014_v54, 16  ;;  %v51_v63 = vld [vmem:[%s2333_s0 + $0x28] sm:$0xff]  ;;  %v1217_v2 = vld [vmem:[%s2333_s0 + $0x80] sm:$0xff] }
  0x12   :  { %v611_v58 = vrot.slane %v609_v53, 1  ;;  %v2042_v1 = vpack.c.bf16 %v1216_v61, %v1215_v60  ;;  %v1218_v3 = vld [vmem:[%s2333_s0 + $0x88] sm:$0xff]  ;;  %v1768_v6 = vld [vmem:[%s2332_s1 + $0x38] sm:$0xff]   ;;  %v2056_v7 = vpack.c.bf16 %v51_v63, %v50_v59  ;;  %v25_v49 = vld [vmem:[%s2334_s4 + $0x20] sm:$0xff] }
  0x13   :  { %1468 = vmatpush3.bf16.msra.mxu1 %v1746_v10  ;;  %1552 = vmatpush3.bf16.msra.mxu0 %v1747_v11  ;;  %v2058_v8 = vpack.c.bf16 %v1218_v3, %v1217_v2  ;;  %v1769_v9 = vld [vmem:[%s2332_s1 + $0x138] sm:$0xff]   ;;  %v616_v11 = vrot.slane %v614_v62, 1  ;;  %v1773_v42 = vld [vmem:[%s2332_s1 + $0x148] sm:$0xff]   ;;  %v35_v61 = vsel %vm27_vm2, %v25_v49, 0.0 }
  0x14   :  { %1469 = vmatprep.subr.bf16.mxu1 %v1798_v0  ;;  %1553 = vmatprep.subr.bf16.mxu0 %v1798_v0  ;;  %v927_v4 = vshrl.u32 %v2042_v1, 16  ;;  %v929_v5 = vshll.u32 %v2042_v1, 16  ;;  %v612_v10 = vor.u32 %v611_v58, %v607_v57  ;;  %v622_v20 = vshll.u32 %v2056_v7, 16  ;;  %v24_v41 = vld [vmem:[%s2334_s4 + $0x18] sm:$0xff]  ;;  %v1775_v57 = vld [vmem:[%s2332_s1 + $0x150] sm:$0xff]  }
  0x15   :  { %v626_v53 = vshrl.u32 %v2056_v7, 16  ;;  %v1776_v2 = vld [vmem:[%s2332_s1 + $0x98] sm:$0xff]  }
  0x16   :  { %v624_v38 = vrot.slane %v622_v20, 1 }
  0x17   :  { %1470 = vmatpush3.bf16.msra.mxu1 %v1748_v12  ;;  %1554 = vmatpush3.bf16.msra.mxu0 %v1749_v13  ;;  %v1219_v12 = vld [vmem:[%s2333_s0 + $0x90] sm:$0xff]  ;;  %v931_v13 = vrot.slane %v929_v5, 1 }
  0x18   :  { %1471 = vmatprep.subr.bf16.mxu1 %v1798_v0  ;;  %1555 = vmatprep.subr.bf16.mxu0 %v1798_v0  ;;  %v628_v5 = vor.u32 %v626_v53, %v624_v38  ;;  %v1793_v53 = vld [vmem:[%s2332_s1 + $0x1b8] sm:$0xff]  }
  0x19   :  { %v932_v19 = vor.u32 %v931_v13, %v927_v4  ;;  %v1777_v4 = vld [vmem:[%s2332_s1 + $0x158] sm:$0xff]  }
  0x1b   :  { %1472 = vmatpush3.bf16.msra.mxu1 %v1750_v14  ;;  %1556 = vmatpush3.bf16.msra.mxu0 %v1751_v15  ;;  %v1770_v14 = vld [vmem:[%s2332_s1 + $0x80] sm:$0xff]   ;;  %v618_v15 = vshrl.u32 %v2014_v54, 16 }
  0x1c   :  { %1473 = vmatprep.subr.bf16.mxu1 %v1798_v0  ;;  %1557 = vmatprep.subr.bf16.mxu0 %v1798_v0 }
  0x1d   :  { %v620_v37 = vor.u32 %v618_v15, %v616_v11 }
  0x1f   :  { %1474 = vmatpush3.bf16.msra.mxu1 %v1752_v16  ;;  %1558 = vmatpush3.bf16.msra.mxu0 %v1753_v17  ;;  %v934_v16 = vshll.u32 %v2058_v8, 16  ;;  %v1220_v17 = vld [vmem:[%s2333_s0 + $0x98] sm:$0xff]  ;;  %v625_v58 = vsel %vm605_vm1, %v620_v37, %v624_v38  ;;  %v778_v37 = vshrl.u32 %v1946_v32, 16  ;;  %v782_v38 = vshll.u32 %v1990_v45, 16 }
  0x20   :  { %1487 = vmatprep.subr.bf16.mxu1 %v1798_v0  ;;  %1571 = vmatprep.subr.bf16.mxu0 %v1798_v0  ;;  %v2076_v18 = vpack.c.bf16 %v1220_v17, %v1219_v12  ;;  %v1781_v17 = vld [vmem:[%s2332_s1 + $0x168] sm:$0xff]  }
  0x21   :  { %v2079_v21 = vrot.slane %v934_v16, 1  ;;  %v769_v16 = vshll.u32 %v1911_v22, 16 }
  0x22   :  { %1476 = vmatmul.mubr.bf16.vlgmr.msra.gmra.mrb[0].mxu1 %v1911_v22  ;;  %1560 = vmatmul.mubr.bf16.vlgmr.msra.gmra.mrb[0].mxu0 %v456_v24  ;;  %v1771_v24 = vld [vmem:[%s2332_s1 + $0x140] sm:$0xff]   ;;  %v946_v31 = vshrl.u32 %v2076_v18, 16 }
  0x23   :  { %1488 = vmatpush3.bf16.msra.mxu1 %v1754_v23  ;;  %1572 = vmatpush3.bf16.msra.mxu0 %v1755_v25  ;;  %v617_v23 = vsel %vm605_vm1, %v612_v10, %v616_v11  ;;  %v52_v25 = vld [vmem:[%s2333_s0 + $0x30] sm:$0x3]  ;;  %v2093_v27 = vsel %vm605_vm1, %v932_v19, %v2079_v21  ;;  %v1779_v11 = vld [vmem:[%s2332_s1 + $0x160] sm:$0xff]  }
  0x24   :  { %1489 = vmatprep.subr.bf16.mxu1 %v1798_v0  ;;  %1573 = vmatprep.subr.bf16.mxu0 %v1798_v0  ;;  %v587_v43 = vpack.c.bf16 %v52_v25, %v52_v25  ;;  %v1782_v19 = vld [vmem:[%s2332_s1 + $0xb0] sm:$0xff]   ;;  %v774_v25 = vshll.u32 %v1946_v32, 16 }
  0x25   :  { %1479 = vmatprep.mubr.msk.bf16.mxu1 %vm1799_vm0, %v1798_v0  ;;  %1563 = vmatprep.mubr.msk.bf16.mxu0 %vm1799_vm0, %v1798_v0 }
  0x26   :  { %v630_v59 = vshll.u32 %v587_v43, 16 }
  0x27   :  { %1490 = vmatpush3.bf16.msra.mxu1 %v1756_v26  ;;  %1574 = vmatpush3.bf16.msra.mxu0 %v1757_v28  ;;  %v942_v26 = vshll.u32 %v2076_v18, 16  ;;  %v1221_v28 = vld [vmem:[%s2333_s0 + $0xa0] sm:$0x3] }
  0x28   :  { %1491 = vmatprep.subr.bf16.mxu1 %v1798_v0  ;;  %1575 = vmatprep.subr.bf16.mxu0 %v1798_v0  ;;  %v908_v30 = vpack.c.bf16 %v1221_v28, %v1221_v28 }
  0x29   :  { %v2099_v29 = vrot.slane %v942_v26, 1  ;;  %v1783_v26 = vld [vmem:[%s2332_s1 + $0x170] sm:$0xff]  }
  0x2a   :  { %1480 = vmatmul.mubr.bf16.gmra.mrb[4].mxu1 %v1946_v32  ;;  %1564 = vmatmul.mubr.bf16.gmra.mrb[4].mxu0 %v457_v34  ;;  %v22_v34 = vld [vmem:[%s2334_s4 + $0x8] sm:$0xff] }
  0x2b   :  { %1492 = vmatpush3.bf16.msra.mxu1 %v1758_v33  ;;  %1576 = vmatpush3.bf16.msra.mxu0 %v1759_v35  ;;  %v21_v33 = vld [vmem:[%s2334_s4] sm:$0xff]  ;;  %v23_v35 = vld [vmem:[%s2334_s4 + $0x10] sm:$0xff]  ;;  %v29_v40 = vsel %vm27_vm2, %v22_v34, 0.0 }
  0x2c   :  { %1493 = vmatprep.subr.bf16.mxu1 %v1798_v0  ;;  %1577 = vmatprep.subr.bf16.mxu0 %v1798_v0 }
  0x2d   :  { %1483 = vmatprep.mubr.msk.bf16.mxu1 %vm1799_vm0, %v1798_v0  ;;  %1567 = vmatprep.mubr.msk.bf16.mxu0 %vm1799_vm0, %v1798_v0 }
  0x2e   :  { %1070 = vperm.xlu0 %1736, %v21_v33   ;;  %1080 = vperm.xlu1 %1737, %v23_v35  }
  0x2f   :  { %1494 = vmatpush3.bf16.msra.mxu1 %v1760_v36  ;;  %1578 = vmatpush3.bf16.msra.mxu0 %v1761_v39  ;;  %v1772_v36 = vld [vmem:[%s2332_s1 + $0x88] sm:$0xff]   ;;  %v28_v39 = vsel %vm27_vm2, %v21_v33, 0.0  ;;  %v1785_v33 = vld [vmem:[%s2332_s1 + $0x178] sm:$0xff]  }
  0x30   :  { %1495 = vmatprep.subr.bf16.mxu1 %v1798_v0  ;;  %1579 = vmatprep.subr.bf16.mxu0 %v1798_v0 }
  0x32   :  { %1484 = vmatmul.mubr.bf16.gmra.mrb[8].mxu1 %v1990_v45  ;;  %1568 = vmatmul.mubr.bf16.gmra.mrb[8].mxu0 %v458_v47  ;;  %v31_v47 = vsel %vm27_vm2, %v23_v35, 0.0  ;;  %v1786_v35 = vld [vmem:[%s2332_s1 + $0x180] sm:$0xff]  }
  0x33   :  { %1496 = vmatpush3.bf16.msra.mxu1 %v1762_v44  ;;  %1580 = vmatpush3.bf16.msra.mxu0 %v1763_v46  ;;  %v948_v44 = vor.u32 %v946_v31, %v2099_v29  ;;  %v950_v46 = vshll.u32 %v908_v30, 16  ;;  %v1784_v30 = vld [vmem:[%s2332_s1 + $0xb8] sm:$0xff]  }
  0x34   :  { %1497 = vmatprep.subr.bf16.mxu1 %v1798_v0  ;;  %1581 = vmatprep.subr.bf16.mxu0 %v1798_v0 }
  0x35   :  { %1503 = vmatprep.mubr.msk.bf16.mxu1 %vm1799_vm0, %v1798_v0  ;;  %1587 = vmatprep.mubr.msk.bf16.mxu0 %vm1799_vm0, %v1798_v0  ;;  %v952_v50 = vrot.slane %v950_v46, 1 }
  0x36   :  { %1075 = vperm.xlu0 %1736, %v22_v34   ;;  %1085 = vperm.xlu1 %1737, %v24_v41  }
  0x37   :  { %1498 = vmatpush3.bf16.msra.mxu1 %v1764_v51  ;;  %1582 = vmatpush3.bf16.msra.mxu0 %v1765_v52  ;;  %v33_v51 = vsel %vm27_vm2, %v24_v41, 0.0  ;;  %v1774_v52 = vld [vmem:[%s2332_s1 + $0x90] sm:$0xff]   ;;  %v2147_v60 = vsel %vm605_vm1, %v948_v44, %v952_v50  ;;  %v784_v41 = vrot.slane %v782_v38, 1  ;;  %v786_v44 = vshrl.u32 %v1990_v45, 16  ;;  %v1790_v45 = vld [vmem:[%s2332_s1 + $0x1a0] sm:$0xff]  }
  0x38   :  { %1499 = vmatprep.subr.bf16.mxu1 %v1798_v0  ;;  %1583 = vmatprep.subr.bf16.mxu0 %v1798_v0 }
  0x3a   :  { %1090 = vperm.xlu0 %1736, %v25_v49  }
  0x3b   :  { %1500 = vmatpush3.bf16.msra.mxu1 %v1766_v55  ;;  %1584 = vmatpush3.bf16.msra.mxu0 %v1767_v56  ;;  %v26_v56 = vld [vmem:[%s2334_s4 + $0x28] sm:$0xff] }
  0x3c   :  { %1501 = vmatprep.subr.bf16.mxu1 %v1798_v0  ;;  %1585 = vmatprep.subr.bf16.mxu0 %v1798_v0  ;;  %v37_v63 = vsel %vm27_vm2, %v26_v56, 0.0 }
  0x3d   :  { %1095 = vperm.xlu1 %1737, %v26_v56  }
  0x3f   :  { %1502 = vmatpush3.bf16.msra.mxu1 %v1768_v6  ;;  %1586 = vmatpush3.bf16.msra.mxu0 %v1769_v9  ;;  %v632_v6 = vrot.slane %v630_v59, 1  ;;  %v1778_v9 = vld [vmem:[%s2332_s1 + $0xa0] sm:$0xff]  }
  0x40   :  { %1515 = vmatprep.subr.bf16.mxu1 %v1798_v0  ;;  %1599 = vmatprep.subr.bf16.mxu0 %v1798_v0 }
  0x41   :  { %v633_v12 = vsel %vm605_vm1, %v628_v5, %v632_v6 }
  0x42   :  { %1504 = vmatmul.mubr.bf16.vlgmr.msra.gmra.mrb[0].mxu1 %v1995_v48  ;;  %1588 = vmatmul.mubr.bf16.vlgmr.msra.gmra.mrb[0].mxu0 %v617_v23  ;;  %v30_v48 = vadd.f32 %v29_v40, %v28_v39  ;;  %v767_v23 = vshrl.u32 %v1911_v22, 16  ;;  %v776_v22 = vrot.slane %v774_v25, 1  ;;  %v1214_v39 = vld [vmem:[%s2333_s0 + $0x68] sm:$0x3] }
  0x43   :  { %1516 = vmatpush3.bf16.msra.mxu1 %v1770_v14  ;;  %1600 = vmatpush3.bf16.msra.mxu0 %v1771_v24  ;;  %v1780_v14 = vld [vmem:[%s2332_s1 + $0xa8] sm:$0xff]   ;;  %v771_v24 = vrot.slane %v769_v16, 1 }
  0x44   :  { %1517 = vmatprep.subr.bf16.mxu1 %v1798_v0  ;;  %1601 = vmatprep.subr.bf16.mxu0 %v1798_v0  ;;  %v32_v55 = vadd.f32 %v31_v47, %v30_v48  ;;  %v1787_v40 = vld [vmem:[%s2332_s1 + $0x188] sm:$0xff]   ;;  %v780_v32 = vor.u32 %v778_v37, %v776_v22  ;;  %v1789_v47 = vld [vmem:[%s2332_s1 + $0x198] sm:$0xff]   ;;  %v788_v48 = vor.u32 %v786_v44, %v784_v41 }
  0x45   :  { %1507 = vmatprep.mubr.msk.bf16.mxu1 %vm1799_vm0, %v1798_v0  ;;  %1591 = vmatprep.mubr.msk.bf16.mxu0 %vm1799_vm0, %v1798_v0  ;;  %v772_v34 = vor.u32 %v771_v24, %v767_v23 }
  0x46   :  { %v34_v62 = vadd.f32 %v33_v51, %v32_v55  ;;  %v785_v43 = vsel %vm605_vm1, %v780_v32, %v784_v41  ;;  %v1791_v51 = vld [vmem:[%s2332_s1 + $0x1a8] sm:$0xff]  }
  0x47   :  { %1518 = vmatpush3.bf16.msra.mxu1 %v1772_v36  ;;  %1602 = vmatpush3.bf16.msra.mxu0 %v1773_v42  ;;  %v777_v36 = vsel %vm605_vm1, %v772_v34, %v776_v22  ;;  %v748_v42 = vpack.c.bf16 %v1214_v39, %v1214_v39 }
  0x48   :  { %1519 = vmatprep.subr.bf16.mxu1 %v1798_v0  ;;  %1603 = vmatprep.subr.bf16.mxu0 %v1798_v0  ;;  %v36_v3 = vadd.f32 %v35_v61, %v34_v62 }
  0x49   :  { %v790_v46 = vshll.u32 %v748_v42, 16 }
  0x4a   :  { %1508 = vmatmul.mubr.bf16.gmra.mrb[4].mxu1 %v2014_v54  ;;  %1592 = vmatmul.mubr.bf16.gmra.mrb[4].mxu0 %v625_v58  ;;  %v38_v54 = vadd.f32 %v37_v63, %v36_v3 }
  0x4b   :  { %1520 = vmatpush3.bf16.msra.mxu1 %v1774_v52  ;;  %1604 = vmatpush3.bf16.msra.mxu0 %v1775_v57  ;;  %v792_v49 = vrot.slane %v790_v46, 1  ;;  %v938_v52 = vshrl.u32 %v2058_v8, 16 }
  0x4c   :  { %1521 = vmatprep.subr.bf16.mxu1 %v1798_v0  ;;  %1605 = vmatprep.subr.bf16.mxu0 %v1798_v0  ;;  %v39_v10 = vrot.slane %v38_v54, 4 }
  0x4d   :  { %1511 = vmatprep.mubr.msk.bf16.mxu1 %vm1799_vm0, %v1798_v0  ;;  %1595 = vmatprep.mubr.msk.bf16.mxu0 %vm1799_vm0, %v1798_v0  ;;  %v793_v50 = vsel %vm605_vm1, %v788_v48, %v792_v49  ;;  %v940_v55 = vor.u32 %v938_v52, %v2079_v21 }
  0x4e   :  { %v40_v13 = vadd.f32 %v39_v10, %v38_v54 }
  0x4f   :  { %1522 = vmatpush3.bf16.msra.mxu1 %v1776_v2  ;;  %1606 = vmatpush3.bf16.msra.mxu0 %v1777_v4 }
  0x50   :  { %1523 = vmatprep.subr.bf16.mxu1 %v1798_v0  ;;  %1607 = vmatprep.subr.bf16.mxu0 %v1798_v0  ;;  %v41_v15 = vrot.slane %v40_v13, 2 }
  0x52   :  { %1512 = vmatmul.mubr.bf16.gmra.mrb[8].mxu1 %v2056_v7  ;;  %1596 = vmatmul.mubr.bf16.gmra.mrb[8].mxu0 %v633_v12  ;;  %v42_v7 = vadd.f32 %v41_v15, %v40_v13 }
  0x53   :  { %1524 = vmatpush3.bf16.msra.mxu1 %v1778_v9  ;;  %1608 = vmatpush3.bf16.msra.mxu0 %v1779_v11 }
  0x54   :  { %1525 = vmatprep.subr.bf16.mxu1 %v1798_v0  ;;  %1609 = vmatprep.subr.bf16.mxu0 %v1798_v0  ;;  %v43_v20 = vrot.slane %v42_v7, 1 }
  0x55   :  { %1531 = vmatprep.mubr.msk.bf16.mxu1 %vm1799_vm0, %v1798_v0  ;;  %1615 = vmatprep.mubr.msk.bf16.mxu0 %vm1799_vm0, %v1798_v0 }
  0x56   :  { %v44_v28 = vadd.f32 %v43_v20, %v42_v7 }
  0x57   :  { %1526 = vmatpush3.bf16.msra.mxu1 %v1780_v14  ;;  %1610 = vmatpush3.bf16.msra.mxu0 %v1781_v17 }
  0x58   :  { %1527 = vmatprep.subr.bf16.mxu1 %v1798_v0  ;;  %1611 = vmatprep.subr.bf16.mxu0 %v1798_v0  ;;  %v45_v31 = vmax.f32 %v44_v28, 1.0 }
  0x5a   :  { %1117 = vperm.xlu0 %1736, %v45_v31  }
  0x5b   :  { %1528 = vmatpush3.bf16.msra.mxu1 %v1782_v19  ;;  %1612 = vmatpush3.bf16.msra.mxu0 %v1783_v26 }
  0x5c   :  { %1529 = vmatprep.subr.bf16.mxu1 %v1798_v0  ;;  %1613 = vmatprep.subr.bf16.mxu0 %v1798_v0 }
  0x5f   :  { %1530 = vmatpush3.bf16.msra.mxu1 %v1784_v30  ;;  %1614 = vmatpush3.bf16.msra.mxu0 %v1785_v33 }
  0x60   :  { %1655 = vmatprep.subr.bf16.mxu1 %v1798_v0  ;;  %1627 = vmatprep.subr.bf16.mxu0 %v1798_v0 }
  0x62   :  { %1532 = vmatmul.mubr.bf16.vlgmr.msra.gmra.mrb[0].mxu1 %v2042_v1  ;;  %1616 = vmatmul.mubr.bf16.vlgmr.msra.gmra.mrb[0].mxu0 %v777_v36  ;;  %v1788_v1 = vld [vmem:[%s2332_s1 + $0x190] sm:$0xff]  }
  0x63   :  { %1663 = vmatpush3.bf16.msra.mxu1 %v1786_v35  ;;  %1628 = vmatpush3.bf16.msra.mxu0 %v1786_v35 }
  0x64   :  { %1656 = vmatprep.subr.bf16.mxu1 %v1798_v0  ;;  %1629 = vmatprep.subr.bf16.mxu0 %v1798_v0 }
  0x65   :  { %1535 = vmatprep.mubr.msk.bf16.mxu1 %vm1799_vm0, %v1798_v0  ;;  %1619 = vmatprep.mubr.msk.bf16.mxu0 %vm1799_vm0, %v1798_v0 }
  0x67   :  { %1664 = vmatpush3.bf16.msra.mxu1 %v1787_v40  ;;  %1630 = vmatpush3.bf16.msra.mxu0 %v1787_v40 }
  0x68   :  { %1657 = vmatprep.subr.bf16.mxu1 %v1798_v0  ;;  %1631 = vmatprep.subr.bf16.mxu0 %v1798_v0 }
  0x6a   :  { %1536 = vmatmul.mubr.bf16.gmra.mrb[4].mxu1 %v2058_v8  ;;  %1620 = vmatmul.mubr.bf16.gmra.mrb[4].mxu0 %v785_v43  ;;  %v945_v8 = vsel %vm605_vm1, %v940_v55, %v2099_v29 }
  0x6b   :  { %1665 = vmatpush3.bf16.msra.mxu1 %v1788_v1  ;;  %1632 = vmatpush3.bf16.msra.mxu0 %v1788_v1 }
  0x6c   :  { %1658 = vmatprep.subr.bf16.mxu1 %v1798_v0  ;;  %1633 = vmatprep.subr.bf16.mxu0 %v1798_v0 }
  0x6d   :  { %1539 = vmatprep.mubr.msk.bf16.mxu1 %vm1799_vm0, %v1798_v0  ;;  %1623 = vmatprep.mubr.msk.bf16.mxu0 %vm1799_vm0, %v1798_v0 }
  0x6f   :  { %1666 = vmatpush3.bf16.msra.mxu1 %v1789_v47  ;;  %1634 = vmatpush3.bf16.msra.mxu0 %v1789_v47 }
  0x70   :  { %1659 = vmatprep.subr.bf16.mxu1 %v1798_v0  ;;  %1635 = vmatprep.subr.bf16.mxu0 %v1798_v0 }
  0x72   :  { %1540 = vmatmul.mubr.bf16.gmra.mrb[8].mxu1 %v2076_v18  ;;  %1624 = vmatmul.mubr.bf16.gmra.mrb[8].mxu0 %v793_v50  ;;  %v1792_v18 = vld [vmem:[%s2332_s1 + $0x1b0] sm:$0xff]  }
  0x73   :  { %1667 = vmatpush3.bf16.msra.mxu1 %v1790_v45  ;;  %1636 = vmatpush3.bf16.msra.mxu0 %v1790_v45 }
  0x74   :  { %1660 = vmatprep.subr.bf16.mxu1 %v1798_v0  ;;  %1637 = vmatprep.subr.bf16.mxu0 %v1798_v0 }
  0x75   :  { %1643 = vmatprep.mubr.msk.bf16.mxu0 %vm1799_vm0, %v1798_v0  ;;  %1647 = vmatprep.mubr.msk.bf16.mxu1 %vm1799_vm0, %v1798_v0 }
  0x77   :  { %1668 = vmatpush3.bf16.msra.mxu1 %v1791_v51  ;;  %1638 = vmatpush3.bf16.msra.mxu0 %v1791_v51 }
  0x78   :  { %1661 = vmatprep.subr.bf16.mxu1 %v1798_v0  ;;  %1639 = vmatprep.subr.bf16.mxu0 %v1798_v0 }
  0x7b   :  { %1669 = vmatpush3.bf16.msra.mxu1 %v1792_v18  ;;  %1640 = vmatpush3.bf16.msra.mxu0 %v1792_v18 }
  0x7c   :  { %1662 = vmatprep.subr.bf16.mxu1 %v1798_v0  ;;  %1641 = vmatprep.subr.bf16.mxu0 %v1798_v0 }
  0x7f   :  { %1670 = vmatpush3.bf16.msra.mxu1 %v1793_v53  ;;  %1642 = vmatpush3.bf16.msra.mxu0 %v1793_v53 }
  0x82   :  { %1648 = vmatmul.mubr.bf16.vlgmr.msra.gmra.mrb[12].mxu1 %v945_v8  ;;  %1644 = vmatmul.mubr.bf16.vlgmr.msra.gmra.mrb[0].mxu0 %v2093_v27 }
  0x83   :  { %1651 = vmatprep.mubr.msk.bf16.mxu1 %vm1799_vm0, %v1798_v0 }
  0x8a   :  { %1652 = vmatmul.mubr.bf16.gmra.mrb[16].mxu1 %v2147_v60 }
  0xad   :  { %v2278_v15 = vpop.permute.xlu0 %1070  ;;  %v2280_v16 = vpop.permute.xlu1 %1080 }
  0xb5   :  { %v2282_v31 = vpop.permute.xlu0 %1075  ;;  %v2284_v34 = vpop.permute.xlu1 %1085 }
  0xb9   :  { %v2289_v41 = vpop.permute.xlu0 %1090 }
  0xbc   :  { %v2293_v49 = vpop.permute.xlu1 %1095 }
  0xd9   :  { %v1118_v51 = vpop.permute.xlu0 %1117 }
  0xda   :  { %1794 = vrcp.f32 %v1118_v51 }
 0x135   :  { %v427_v56 = vpop.f32.mrb[0].mxu1 }
 0x136   :  { %v1533_v21 = vpop.f32.mrb[1].mxu1 }
 0x137   :  { %v430_v57 = vpop.f32.mrb[2].mxu1 }
 0x138   :  { %v1534_v58 = vpop.f32.mrb[3].mxu1 }
 0x13d   :  { %v435_v59 = vpop.f32.mrb[4].mxu1  ;;  %v887_v61 = vpop.f32.mrb[4].mxu0 }
 0x13e   :  { %v1537_v62 = vpop.f32.mrb[5].mxu1  ;;  %v1673_v63 = vadd.f32 %v887_v61, %v435_v59  ;;  %v1621_v2 = vpop.f32.mrb[5].mxu0 }
 0x13f   :  { %v438_v3 = vpop.f32.mrb[6].mxu1  ;;  %v890_v29 = vpop.f32.mrb[6].mxu0 }
 0x140   :  { %v1538_v4 = vpop.f32.mrb[7].mxu1  ;;  %v1675_v5 = vadd.f32 %v890_v29, %v438_v3  ;;  %v1622_v6 = vpop.f32.mrb[7].mxu0 }
 0x145   :  { %v443_v27 = vpop.f32.mrb[8].mxu1  ;;  %v895_v54 = vpop.f32.mrb[8].mxu0 }
 0x146   :  { %v1541_v9 = vpop.f32.mrb[9].mxu1  ;;  %v1677_v0 = vadd.f32 %v895_v54, %v443_v27  ;;  %v1625_v10 = vpop.f32.mrb[9].mxu0 }
 0x147   :  { %v446_v60 = vpop.f32.mrb[10].mxu1  ;;  %v898_v11 = vpop.f32.mrb[10].mxu0 }
 0x148   :  { %v1542_v12 = vpop.f32.mrb[11].mxu1  ;;  %v1679_v13 = vadd.f32 %v898_v11, %v446_v60  ;;  %v1626_v14 = vpop.f32.mrb[11].mxu0 }
 0x155   :  { %v1047_v17 = vpop.f32.mrb[12].mxu1  ;;  %v1039_v7 = vpop.f32.mrb[0].mxu0 }
 0x156   :  { %v1674_v19 = vadd.f32 %v1673_v63, %v1047_v17  ;;  %v1649_v20 = vpop.f32.mrb[13].mxu1  ;;  %v1671_v23 = vadd.f32 %v1039_v7, %v427_v56  ;;  %v1645_v24 = vpop.f32.mrb[1].mxu0 }
 0x157   :  { %v1050_v25 = vpop.f32.mrb[14].mxu1  ;;  %v1042_v26 = vpop.f32.mrb[2].mxu0 }
 0x158   :  { %v1676_v28 = vadd.f32 %v1675_v5, %v1050_v25  ;;  %v1650_v30 = vpop.f32.mrb[15].mxu1  ;;  %v1672_v22 = vadd.f32 %v1042_v26, %v430_v57  ;;  %v1646_v33 = vpop.f32.mrb[3].mxu0  ;;  %v1098_v35 = vmul.f32 %v1671_v23, %v2278_v15  ;;  %v1100_v37 = vmul.f32 %v1674_v19, %v2280_v16 }
 0x159   :  { %v1795_v57 = vpop.eup %1794 }
 0x15a   :  { %v1099_v36 = vmul.f32 %v1672_v22, %v2282_v31  ;;  %v1101_v42 = vmul.f32 %v1676_v28, %v2284_v34 }
 0x15c   :  { %v1104_v38 = vadd.f32 %v1099_v36, %v1098_v35  ;;  %v1380_v35 = vld [vmem:[%s2335_s2] ss:$0 sm:$0xff] }
 0x15d   :  { %v1055_v39 = vpop.f32.mrb[16].mxu1 }
 0x15e   :  { %v1678_v40 = vadd.f32 %v1677_v0, %v1055_v39  ;;  %v1653_v32 = vpop.f32.mrb[17].mxu1  ;;  %v1105_v1 = vadd.f32 %v1104_v38, %v1100_v37 }
 0x15f   :  { %v1058_v43 = vpop.f32.mrb[18].mxu1 }
 0x160   :  { %v1102_v44 = vmul.f32 %v1678_v40, %v2289_v41  ;;  %v1680_v46 = vadd.f32 %v1679_v13, %v1058_v43  ;;  %v1654_v47 = vpop.f32.mrb[19].mxu1  ;;  %v1106_v48 = vadd.f32 %v1105_v1, %v1101_v42  ;;  %v1381_v42 = vld [vmem:[%s2336_s3] ss:$0 sm:$0xff] }
 0x162   :  { %v1103_v45 = vmul.f32 %v1680_v46, %v2293_v49  ;;  %v1107_v50 = vadd.f32 %v1106_v48, %v1102_v44 }
 0x164   :  { %v1108_v52 = vadd.f32 %v1107_v50, %v1103_v45 }
 0x166   :  { %v1109_v18 = vrot.slane %v1108_v52, 4 }
 0x168   :  { %v1110_v53 = vadd.f32 %v1109_v18, %v1108_v52 }
 0x16a   :  { %v1111_v55 = vrot.slane %v1110_v53, 2 }
 0x16c   :  { %v1112_v8 = vadd.f32 %v1111_v55, %v1110_v53 }
 0x16e   :  { %v1113_v56 = vrot.slane %v1112_v8, 1 }
 0x170   :  { %v1114_v21 = vadd.f32 %v1113_v56, %v1112_v8 }
 0x172   :  { %v1121_v58 = vmul.f32 %v1795_v57, %v1114_v21 }
 0x174   :  { %v1122_v59 = vsub.f32 %v1671_v23, %v1121_v58  ;;  %v1123_v61 = vsub.f32 %v1672_v22, %v1121_v58  ;;  %v1124_v62 = vsub.f32 %v1674_v19, %v1121_v58  ;;  %v1125_v63 = vsub.f32 %v1676_v28, %v1121_v58 }
 0x175   :  { %v1126_v2 = vsub.f32 %v1678_v40, %v1121_v58  ;;  %v1127_v3 = vsub.f32 %v1680_v46, %v1121_v58 }
 0x176   :  { %v1128_v29 = vmul.f32 %v1122_v59, %v2278_v15  ;;  %v1129_v4 = vmul.f32 %v1123_v61, %v2282_v31  ;;  %v1130_v5 = vmul.f32 %v1124_v62, %v2280_v16  ;;  %v1131_v6 = vmul.f32 %v1125_v63, %v2284_v34 }
 0x177   :  { %v1132_v9 = vmul.f32 %v1126_v2, %v2289_v41  ;;  %v1133_v60 = vmul.f32 %v1127_v3, %v2293_v49 }
 0x178   :  { %v1134_v27 = vmul.f32 %v1128_v29, %v1128_v29  ;;  %v1135_v54 = vmul.f32 %v1129_v4, %v1129_v4  ;;  %v1136_v0 = vmul.f32 %v1130_v5, %v1130_v5  ;;  %v1137_v11 = vmul.f32 %v1131_v6, %v1131_v6 }
 0x179   :  { %v1138_v13 = vmul.f32 %v1132_v9, %v1132_v9  ;;  %v1139_v17 = vmul.f32 %v1133_v60, %v1133_v60 }
 0x17a   :  { %v1140_v10 = vadd.f32 %v1135_v54, %v1134_v27 }
 0x17c   :  { %v1141_v12 = vadd.f32 %v1140_v10, %v1136_v0 }
 0x17e   :  { %v1142_v14 = vadd.f32 %v1141_v12, %v1137_v11 }
 0x180   :  { %v1143_v7 = vadd.f32 %v1142_v14, %v1138_v13 }
 0x182   :  { %v1144_v19 = vadd.f32 %v1143_v7, %v1139_v17 }
 0x184   :  { %v1145_v20 = vrot.slane %v1144_v19, 4 }
 0x186   :  { %v1146_v23 = vadd.f32 %v1145_v20, %v1144_v19 }
 0x188   :  { %v1147_v24 = vrot.slane %v1146_v23, 2 }
 0x18a   :  { %v1148_v25 = vadd.f32 %v1147_v24, %v1146_v23 }
 0x18c   :  { %v1149_v26 = vrot.slane %v1148_v25, 1 }
 0x18e   :  { %v1150_v28 = vadd.f32 %v1149_v26, %v1148_v25 }
 0x190   :  { %v1151_v30 = vmul.f32 %v1795_v57, %v1150_v28 }
 0x192   :  { %v1152_v22 = vadd.f32 1e-05, %v1151_v30 }
 0x194   :  { %1796 = vrsqrt.f32 %v1152_v22 }
 0x19e   :  { %v1797_v33 = vpop.eup %1796 }
 0x19f   :  { %v1154_v36 = vmul.f32 %v1797_v33, %v1122_v59  ;;  %v1155_v37 = vmul.f32 %v1797_v33, %v1123_v61  ;;  %v1156_v38 = vmul.f32 %v1797_v33, %v1124_v62  ;;  %v1157_v39 = vmul.f32 %v1797_v33, %v1125_v63 }
 0x1a0   :  { %v1158_v40 = vmul.f32 %v1797_v33, %v1126_v2  ;;  %v1159_v32 = vmul.f32 %v1797_v33, %v1127_v3 }
 0x1a1   :  { %v1167_v1 = vmul.f32 %v1380_v35, %v1154_v36  ;;  %v1168_v43 = vmul.f32 %v1380_v35, %v1155_v37  ;;  %v1169_v44 = vmul.f32 %v1380_v35, %v1156_v38  ;;  %v1170_v46 = vmul.f32 %v1380_v35, %v1157_v39 }
 0x1a2   :  { %v1171_v47 = vmul.f32 %v1380_v35, %v1158_v40  ;;  %v1172_v48 = vmul.f32 %v1380_v35, %v1159_v32 }
 0x1a3   :  { %v1180_v45 = vadd.f32 %v1381_v42, %v1167_v1  ;;  %v1181_v50 = vadd.f32 %v1381_v42, %v1168_v43  ;;  %v1182_v51 = vadd.f32 %v1381_v42, %v1169_v44  ;;  %v1183_v52 = vadd.f32 %v1381_v42, %v1170_v46 }
 0x1a4   :  { %v1184_v18 = vadd.f32 %v1381_v42, %v1171_v47  ;;  %v1185_v53 = vadd.f32 %v1381_v42, %v1172_v48 }
 0x1a5   :  { %v1186_v55 = vmax.f32 %v1180_v45, 0.0  ;;  %v1187_v8 = vmax.f32 %v1181_v50, 0.0  ;;  %v1188_v56 = vmax.f32 %v1182_v51, 0.0  ;;  %v1189_v21 = vmax.f32 %v1183_v52, 0.0 }
 0x1a6   :  { %v1190_v57 = vmax.f32 %v1184_v18, 0.0  ;;  %v1191_v58 = vmax.f32 %v1185_v53, 0.0 }
 0x1a7   :  { %v1192_v59 = vmul.f32 %v1186_v55, %v2278_v15  ;;  %v1193_v61 = vmul.f32 %v1187_v8, %v2282_v31  ;;  %v1194_v62 = vmul.f32 %v1188_v56, %v2280_v16  ;;  %v1195_v63 = vmul.f32 %v1189_v21, %v2284_v34 }
 0x1a8   :  { %v1196_v2 = vmul.f32 %v1190_v57, %v2289_v41  ;;  %v1197_v3 = vmul.f32 %v1191_v58, %v2293_v49 }
 0x1a9   :  { %1198 = vst [vmem:[%s2337_s5] sm:$0xff] %v1192_v59  ;;  %1199 = vst [vmem:[%s2337_s5 + $0x8] sm:$0xff] %v1193_v61 }
 0x1aa   :  { %1200 = vst [vmem:[%s2337_s5 + $0x10] sm:$0xff] %v1194_v62  ;;  %1201 = vst [vmem:[%s2337_s5 + $0x18] sm:$0xff] %v1195_v63 }
 0x1ab   :  { %1202 = vst [vmem:[%s2337_s5 + $0x20] sm:$0xff] %v1196_v2  ;;  %1203 = vst [vmem:[%s2337_s5 + $0x28] sm:$0xff] %v1197_v3 }

// kernel: _forward_padded.8
= control target key start
LH: loop header
LB: loop body
LE: loop exit
PB: predicated region body
PF: predicated region fallthrough
CT: control target
= control target key end

     0   :  { %v1322_v0 = vmov 0.0   ;;  %vm1323_vm0 = vmmov 0   ;;  %v1324_v4 = vmov 0   ;;  %vm93_vm1 = vsmask.f32 7424  ;;  %s1749_s1 = inlined_call_operand.vmem [shape: bf16[5,128,128], index: 1, kind: input, shape index: {}]   ;;  %s1750_s0 = inlined_call_operand.vmem [shape: f32[1,53,128], index: 0, kind: input, shape index: {}]   ;;  %s1751_s4 = inlined_call_operand.vmem [shape: f32[48,1], index: 4, kind: input, shape index: {}]   ;;  %s1752_s2 = inlined_call_operand.vmem [shape: f32[1,128], index: 2, kind: input, shape index: {}]   ;;  %s1753_s3 = inlined_call_operand.vmem [shape: f32[1,128], index: 3, kind: input, shape index: {}]   ;;  %s1754_s5 = inlined_call_operand.vmem [shape: f32[48,128], index: 5, kind: input, shape index: {}]   ;;  %s1755_s6 = inlined_call_operand.vmem [shape: f32[48,128], index: 6, kind: output, shape index: {}]  }
   0x1   :  { %1079 = vmatprep.subr.bf16.mxu1 %v1322_v0  ;;  %1135 = vmatprep.subr.bf16.mxu0 %v1322_v0  ;;  %v1278_v1 = vld [vmem:[%s1749_s1 + $0x40] sm:$0xff]   ;;  %v1280_v3 = vld [vmem:[%s1749_s1 + $0x48] sm:$0xff]   ;;  %v1282_v6 = vld [vmem:[%s1749_s1 + $0x50] sm:$0xff]   ;;  %vm644_vm2 = vcmask 1045504   ;;  %vm356_vm3 = vcmask 1046528   ;;  %vm30_vm4 = vcmask 7168  }
   0x2   :  { %v1279_v2 = vld [vmem:[%s1749_s1 + $0x80] sm:$0xff]   ;;  %1095 = vmatprep.mubr.msk.bf16.mxu1 %vm1323_vm0, %v1322_v0  ;;  %1151 = vmatprep.mubr.msk.bf16.mxu0 %vm1323_vm0, %v1322_v0  ;;  %v1281_v5 = vld [vmem:[%s1749_s1 + $0x88] sm:$0xff]   ;;  %v1283_v7 = vld [vmem:[%s1749_s1 + $0x90] sm:$0xff]   ;;  %vm495_vm5 = vsmask.f32 6400 }
   0x3   :  { %1080 = vmatpush3.bf16.msra.mxu1 %v1278_v1  ;;  %1276 = vset.pattern.permute.xlu0 %v1324_v4  ;;  %v1284_v8 = vld [vmem:[%s1749_s1 + $0x58] sm:$0xff]   ;;  %v1286_v10 = vld [vmem:[%s1749_s1 + $0x60] sm:$0xff]   ;;  %v50_v13 = vld [vmem:[%s1750_s0 + $0x8] sm:$0xff] }
   0x4   :  { %1136 = vmatpush3.bf16.msra.mxu0 %v1279_v2  ;;  %1081 = vmatprep.subr.bf16.mxu1 %v1322_v0  ;;  %v1285_v9 = vld [vmem:[%s1749_s1 + $0x98] sm:$0xff]   ;;  %v1287_v11 = vld [vmem:[%s1749_s1 + $0xa0] sm:$0xff]   ;;  %v51_v14 = vld [vmem:[%s1750_s0 + $0x10] sm:$0xff] }
   0x5   :  { %1137 = vmatprep.subr.bf16.mxu0 %v1322_v0  ;;  %1277 = vset.pattern.permute.xlu1 %v1324_v4  ;;  %v49_v12 = vld [vmem:[%s1750_s0] sm:$0xff]  ;;  %v52_v15 = vld [vmem:[%s1750_s0 + $0x18] sm:$0xff]  ;;  %v1288_v17 = vld [vmem:[%s1749_s1 + $0x68] sm:$0xff]  }
   0x6   :  { %v1416_v16 = vpack.c.bf16 %v50_v13, %v49_v12  ;;  %v1421_v18 = vpack.c.bf16 %v52_v15, %v51_v14  ;;  %v1289_v19 = vld [vmem:[%s1749_s1 + $0xa8] sm:$0xff]   ;;  %v1290_v21 = vld [vmem:[%s1749_s1 + $0x70] sm:$0xff]   ;;  %v1292_v26 = vld [vmem:[%s1749_s1 + $0x78] sm:$0xff]  }
   0x7   :  { %1082 = vmatpush3.bf16.msra.mxu1 %v1280_v3  ;;  %v1291_v25 = vld [vmem:[%s1749_s1 + $0xb0] sm:$0xff]   ;;  %v1293_v27 = vld [vmem:[%s1749_s1 + $0xb8] sm:$0xff]   ;;  %v53_v30 = vld [vmem:[%s1750_s0 + $0x20] sm:$0xff] }
   0x8   :  { %1138 = vmatpush3.bf16.msra.mxu0 %v1281_v5  ;;  %1083 = vmatprep.subr.bf16.mxu1 %v1322_v0  ;;  %v97_v20 = vshll.u32 %v1416_v16, 16  ;;  %v95_v22 = vshrl.u32 %v1416_v16, 16  ;;  %v102_v24 = vshll.u32 %v1421_v18, 16  ;;  %v54_v31 = vld [vmem:[%s1750_s0 + $0x28] sm:$0xff]  ;;  %v645_v32 = vrot.slane %v1416_v16, 2  ;;  %v1294_v38 = vld [vmem:[%s1749_s1] sm:$0xff]  }
   0x9   :  { %1139 = vmatprep.subr.bf16.mxu0 %v1322_v0  ;;  %v646_v33 = vrot.slane %v1421_v18, 2  ;;  %v357_v34 = vrot.slane %v1416_v16, 1  ;;  %v358_v35 = vrot.slane %v1421_v18, 1  ;;  %v1462_v36 = vpack.c.bf16 %v54_v31, %v53_v30  ;;  %v1295_v43 = vld [vmem:[%s1749_s1 + $0xc0] sm:$0xff]   ;;  %v55_v44 = vld [vmem:[%s1750_s0 + $0x30] sm:$0x1f] }
   0xa   :  { %v99_v23 = vrot.slane %v97_v20, 1  ;;  %v104_v29 = vrot.slane %v102_v24, 1  ;;  %v106_v40 = vshrl.u32 %v1421_v18, 16  ;;  %v1296_v45 = vld [vmem:[%s1749_s1 + $0x8] sm:$0xff]   ;;  %v1496_v50 = vpack.c.bf16 %v55_v44, %v55_v44  ;;  %v1298_v51 = vld [vmem:[%s1749_s1 + $0x10] sm:$0xff]   ;;  %v1300_v57 = vld [vmem:[%s1749_s1 + $0x18] sm:$0xff]  }
   0xb   :  { %1084 = vmatpush3.bf16.msra.mxu1 %v1282_v6  ;;  %v1468_v37 = vsel %vm644_vm2, %v645_v32, %v646_v33  ;;  %v110_v41 = vshll.u32 %v1462_v36, 16  ;;  %v359_v42 = vsel %vm356_vm3, %v357_v34, %v358_v35  ;;  %v1297_v46 = vld [vmem:[%s1749_s1 + $0xc8] sm:$0xff]   ;;  %v360_v49 = vrot.slane %v1462_v36, 1  ;;  %v1299_v55 = vld [vmem:[%s1749_s1 + $0xd0] sm:$0xff]   ;;  %v1301_v60 = vld [vmem:[%s1749_s1 + $0xd8] sm:$0xff]  }
   0xc   :  { %1140 = vmatpush3.bf16.msra.mxu0 %v1283_v7  ;;  %1085 = vmatprep.subr.bf16.mxu1 %v1322_v0  ;;  %v100_v28 = vor.u32 %v99_v23, %v95_v22  ;;  %v108_v47 = vor.u32 %v106_v40, %v104_v29  ;;  %v114_v53 = vshrl.u32 %v1462_v36, 16  ;;  %v118_v54 = vshll.u32 %v1496_v50, 16  ;;  %v24_v62 = vld [vmem:[%s1751_s4] sm:$0xff]  ;;  %v25_v1 = vld [vmem:[%s1751_s4 + $0x8] sm:$0xff]  ;;  %v26_v2 = vld [vmem:[%s1751_s4 + $0x10] sm:$0xff] }
   0xd   :  { %1141 = vmatprep.subr.bf16.mxu0 %v1322_v0  ;;  %v112_v48 = vrot.slane %v110_v41, 1  ;;  %v361_v56 = vsel %vm356_vm3, %v358_v35, %v360_v49  ;;  %v362_v61 = vrot.slane %v1496_v50, 1  ;;  %v31_v63 = vsel %vm30_vm4, %v24_v62, 0.0  ;;  %768 = vperm.xlu0 %1276, %v24_v62   ;;  %v27_v5 = vld [vmem:[%s1751_s4 + $0x18] sm:$0xff]  ;;  %v1302_v6 = vld [vmem:[%s1749_s1 + $0x20] sm:$0xff]   ;;  %v29_v14 = vld [vmem:[%s1751_s4 + $0x28] sm:$0xff] }
   0xe   :  { %v105_v39 = vsel %vm93_vm1, %v100_v28, %v104_v29  ;;  %v120_v59 = vrot.slane %v118_v54, 1  ;;  %v32_v3 = vsel %vm30_vm4, %v25_v1, 0.0  ;;  %v34_v4 = vsel %vm30_vm4, %v26_v2, 0.0  ;;  %778 = vperm.xlu1 %1277, %v26_v2   ;;  %v1307_v31 = vld [vmem:[%s1749_s1 + $0xf0] sm:$0xff]   ;;  %v1309_v35 = vld [vmem:[%s1749_s1 + $0xf8] sm:$0xff]  }
   0xf   :  { %1086 = vmatpush3.bf16.msra.mxu1 %v1284_v8  ;;  %v113_v52 = vsel %vm93_vm1, %v108_v47, %v112_v48  ;;  %v116_v58 = vor.u32 %v114_v53, %v112_v48  ;;  %v33_v8 = vadd.f32 %v32_v3, %v31_v63  ;;  %v36_v12 = vsel %vm30_vm4, %v27_v5, 0.0  ;;  %v1311_v47 = vld [vmem:[%s1749_s1 + $0x108] sm:$0xff]  }
  0x10   :  { %1142 = vmatpush3.bf16.msra.mxu0 %v1285_v9  ;;  %1087 = vmatprep.subr.bf16.mxu1 %v1322_v0  ;;  %v28_v9 = vld [vmem:[%s1751_s4 + $0x20] sm:$0xff]  ;;  %v40_v23 = vsel %vm30_vm4, %v29_v14, 0.0  ;;  %v496_v28 = vrot.slane %v95_v22, 1  ;;  %v500_v29 = vrot.slane %v102_v24, 2  ;;  %v499_v30 = vrot.slane %v106_v40, 1  ;;  %v1308_v22 = vld [vmem:[%s1749_s1 + $0x38] sm:$0xff]  }
  0x11   :  { %1143 = vmatprep.subr.bf16.mxu0 %v1322_v0  ;;  %v121_v7 = vsel %vm93_vm1, %v116_v58, %v120_v59  ;;  %v35_v13 = vadd.f32 %v34_v4, %v33_v8  ;;  %773 = vperm.xlu0 %1276, %v25_v1   ;;  %v38_v15 = vsel %vm30_vm4, %v28_v9, 0.0  ;;  %v497_v32 = vrot.slane %v97_v20, 2  ;;  %v1310_v40 = vld [vmem:[%s1749_s1 + $0x100] sm:$0xff]   ;;  %v1315_v59 = vld [vmem:[%s1749_s1 + $0x128] sm:$0xff]  }
  0x12   :  { %783 = vperm.xlu1 %1277, %v27_v5   ;;  %v503_v44 = vrot.slane %v114_v53, 1  ;;  %v648_v62 = vrot.slane %v1462_v36, 2  ;;  %v650_v1 = vrot.slane %v1496_v50, 2 }
  0x13   :  { %1088 = vmatpush3.bf16.msra.mxu1 %v1286_v10  ;;  %v1303_v10 = vld [vmem:[%s1749_s1 + $0xe0] sm:$0xff]  }
  0x14   :  { %1144 = vmatpush3.bf16.msra.mxu0 %v1287_v11  ;;  %1089 = vmatprep.subr.bf16.mxu1 %v1322_v0  ;;  %v363_v11 = vsel %vm356_vm3, %v360_v49, %v362_v61  ;;  %v1317_v61 = vld [vmem:[%s1749_s1 + $0x138] sm:$0xff]   ;;  %v649_v63 = vsel %vm644_vm2, %v646_v33, %v648_v62 }
  0x15   :  { %1145 = vmatprep.subr.bf16.mxu0 %v1322_v0  ;;  %788 = vperm.xlu0 %1276, %v28_v9  }
  0x16   :  { %793 = vperm.xlu1 %1277, %v29_v14  }
  0x17   :  { %1090 = vmatpush3.bf16.msra.mxu1 %v1288_v17  ;;  %v1304_v17 = vld [vmem:[%s1749_s1 + $0x28] sm:$0xff]  }
  0x18   :  { %1146 = vmatpush3.bf16.msra.mxu0 %v1289_v19  ;;  %1091 = vmatprep.subr.bf16.mxu1 %v1322_v0  ;;  %v37_v19 = vadd.f32 %v36_v12, %v35_v13 }
  0x19   :  { %1147 = vmatprep.subr.bf16.mxu0 %v1322_v0 }
  0x1b   :  { %1092 = vmatpush3.bf16.msra.mxu1 %v1290_v21  ;;  %v1305_v21 = vld [vmem:[%s1749_s1 + $0xe8] sm:$0xff]  }
  0x1c   :  { %1148 = vmatpush3.bf16.msra.mxu0 %v1291_v25  ;;  %1093 = vmatprep.subr.bf16.mxu1 %v1322_v0  ;;  %v39_v25 = vadd.f32 %v38_v15, %v37_v19 }
  0x1d   :  { %1149 = vmatprep.subr.bf16.mxu0 %v1322_v0 }
  0x1f   :  { %1094 = vmatpush3.bf16.msra.mxu1 %v1292_v26  ;;  %v1306_v26 = vld [vmem:[%s1749_s1 + $0x30] sm:$0xff]  }
  0x20   :  { %1150 = vmatpush3.bf16.msra.mxu0 %v1293_v27  ;;  %1107 = vmatprep.subr.bf16.mxu1 %v1322_v0  ;;  %v41_v27 = vadd.f32 %v40_v23, %v39_v25 }
  0x21   :  { %1163 = vmatprep.subr.bf16.mxu0 %v1322_v0 }
  0x22   :  { %1096 = vmatmul.mubr.bf16.vlgmr.msra.gmra.mrb[0].mxu1 %v105_v39  ;;  %v42_v34 = vrot.slane %v41_v27, 4  ;;  %v501_v39 = vor.u32 %v500_v29, %v499_v30 }
  0x23   :  { %1108 = vmatpush3.bf16.msra.mxu1 %v1294_v38  ;;  %1152 = vmatmul.mubr.bf16.vlgmr.msra.gmra.mrb[0].mxu0 %v359_v42  ;;  %v498_v38 = vor.u32 %v497_v32, %v496_v28 }
  0x24   :  { %1164 = vmatpush3.bf16.msra.mxu0 %v1295_v43  ;;  %1109 = vmatprep.subr.bf16.mxu1 %v1322_v0  ;;  %v43_v24 = vadd.f32 %v42_v34, %v41_v27 }
  0x25   :  { %1165 = vmatprep.subr.bf16.mxu0 %v1322_v0  ;;  %1099 = vmatprep.mubr.msk.bf16.mxu1 %vm1323_vm0, %v1322_v0  ;;  %v502_v43 = vsel %vm495_vm5, %v498_v38, %v501_v39 }
  0x26   :  { %1155 = vmatprep.mubr.msk.bf16.mxu0 %vm1323_vm0, %v1322_v0  ;;  %v44_v20 = vrot.slane %v43_v24, 2 }
  0x27   :  { %1110 = vmatpush3.bf16.msra.mxu1 %v1296_v45  ;;  %v504_v45 = vrot.slane %v110_v41, 2 }
  0x28   :  { %1166 = vmatpush3.bf16.msra.mxu0 %v1297_v46  ;;  %1111 = vmatprep.subr.bf16.mxu1 %v1322_v0  ;;  %v45_v42 = vadd.f32 %v44_v20, %v43_v24 }
  0x29   :  { %1167 = vmatprep.subr.bf16.mxu0 %v1322_v0  ;;  %v505_v49 = vor.u32 %v504_v45, %v503_v44 }
  0x2a   :  { %1100 = vmatmul.mubr.bf16.gmra.mrb[4].mxu1 %v113_v52  ;;  %v46_v46 = vrot.slane %v45_v42, 1 }
  0x2b   :  { %1112 = vmatpush3.bf16.msra.mxu1 %v1298_v51  ;;  %1156 = vmatmul.mubr.bf16.gmra.mrb[4].mxu0 %v361_v56  ;;  %v507_v51 = vshrl.u32 %v1496_v50, 16  ;;  %v506_v52 = vsel %vm495_vm5, %v501_v39, %v505_v49  ;;  %v1313_v56 = vld [vmem:[%s1749_s1 + $0x118] sm:$0xff]  }
  0x2c   :  { %1168 = vmatpush3.bf16.msra.mxu0 %v1299_v55  ;;  %1113 = vmatprep.subr.bf16.mxu1 %v1322_v0  ;;  %v47_v48 = vadd.f32 %v46_v46, %v45_v42  ;;  %v510_v55 = vrot.slane %v118_v54, 2  ;;  %v1314_v54 = vld [vmem:[%s1749_s1 + $0x120] sm:$0xff]  }
  0x2d   :  { %1169 = vmatprep.subr.bf16.mxu0 %v1322_v0  ;;  %1103 = vmatprep.mubr.msk.bf16.mxu1 %vm1323_vm0, %v1322_v0  ;;  %v509_v53 = vrot.slane %v507_v51, 1 }
  0x2e   :  { %1159 = vmatprep.mubr.msk.bf16.mxu0 %vm1323_vm0, %v1322_v0  ;;  %v48_v41 = vmax.f32 %v47_v48, 1.0 }
  0x2f   :  { %1114 = vmatpush3.bf16.msra.mxu1 %v1300_v57  ;;  %v511_v57 = vor.u32 %v510_v55, %v509_v53 }
  0x30   :  { %1170 = vmatpush3.bf16.msra.mxu0 %v1301_v60  ;;  %1115 = vmatprep.subr.bf16.mxu1 %v1322_v0  ;;  %v1316_v60 = vld [vmem:[%s1749_s1 + $0x130] sm:$0xff]  }
  0x31   :  { %1171 = vmatprep.subr.bf16.mxu0 %v1322_v0  ;;  %815 = vperm.xlu0 %1276, %v48_v41   ;;  %v512_v58 = vsel %vm495_vm5, %v505_v49, %v511_v57 }
  0x32   :  { %1104 = vmatmul.mubr.bf16.gmra.mrb[8].mxu1 %v121_v7 }
  0x33   :  { %1116 = vmatpush3.bf16.msra.mxu1 %v1302_v6  ;;  %1160 = vmatmul.mubr.bf16.gmra.mrb[8].mxu0 %v363_v11 }
  0x34   :  { %1172 = vmatpush3.bf16.msra.mxu0 %v1303_v10  ;;  %1117 = vmatprep.subr.bf16.mxu1 %v1322_v0 }
  0x35   :  { %1173 = vmatprep.subr.bf16.mxu0 %v1322_v0  ;;  %1123 = vmatprep.mubr.msk.bf16.mxu1 %vm1323_vm0, %v1322_v0 }
  0x36   :  { %1179 = vmatprep.mubr.msk.bf16.mxu0 %vm1323_vm0, %v1322_v0 }
  0x37   :  { %1118 = vmatpush3.bf16.msra.mxu1 %v1304_v17 }
  0x38   :  { %1174 = vmatpush3.bf16.msra.mxu0 %v1305_v21  ;;  %1119 = vmatprep.subr.bf16.mxu1 %v1322_v0 }
  0x39   :  { %1175 = vmatprep.subr.bf16.mxu0 %v1322_v0 }
  0x3b   :  { %1120 = vmatpush3.bf16.msra.mxu1 %v1306_v26 }
  0x3c   :  { %1176 = vmatpush3.bf16.msra.mxu0 %v1307_v31  ;;  %1121 = vmatprep.subr.bf16.mxu1 %v1322_v0 }
  0x3d   :  { %1177 = vmatprep.subr.bf16.mxu0 %v1322_v0 }
  0x3f   :  { %1122 = vmatpush3.bf16.msra.mxu1 %v1308_v22 }
  0x40   :  { %1178 = vmatpush3.bf16.msra.mxu0 %v1309_v35  ;;  %1219 = vmatprep.subr.bf16.mxu1 %v1322_v0 }
  0x41   :  { %1191 = vmatprep.subr.bf16.mxu0 %v1322_v0 }
  0x42   :  { %1124 = vmatmul.mubr.bf16.vlgmr.msra.gmra.mrb[0].mxu1 %v1416_v16  ;;  %v1312_v16 = vld [vmem:[%s1749_s1 + $0x110] sm:$0xff]  }
  0x43   :  { %1180 = vmatmul.mubr.bf16.vlgmr.msra.gmra.mrb[0].mxu0 %v502_v43  ;;  %1227 = vmatpush3.bf16.msra.mxu1 %v1310_v40 }
  0x44   :  { %1192 = vmatpush3.bf16.msra.mxu0 %v1310_v40  ;;  %1220 = vmatprep.subr.bf16.mxu1 %v1322_v0 }
  0x45   :  { %1193 = vmatprep.subr.bf16.mxu0 %v1322_v0  ;;  %1127 = vmatprep.mubr.msk.bf16.mxu1 %vm1323_vm0, %v1322_v0 }
  0x46   :  { %1183 = vmatprep.mubr.msk.bf16.mxu0 %vm1323_vm0, %v1322_v0 }
  0x47   :  { %1228 = vmatpush3.bf16.msra.mxu1 %v1311_v47 }
  0x48   :  { %1194 = vmatpush3.bf16.msra.mxu0 %v1311_v47  ;;  %1221 = vmatprep.subr.bf16.mxu1 %v1322_v0 }
  0x49   :  { %1195 = vmatprep.subr.bf16.mxu0 %v1322_v0 }
  0x4a   :  { %1128 = vmatmul.mubr.bf16.gmra.mrb[4].mxu1 %v1421_v18 }
  0x4b   :  { %1184 = vmatmul.mubr.bf16.gmra.mrb[4].mxu0 %v506_v52  ;;  %1229 = vmatpush3.bf16.msra.mxu1 %v1312_v16 }
  0x4c   :  { %1196 = vmatpush3.bf16.msra.mxu0 %v1312_v16  ;;  %1222 = vmatprep.subr.bf16.mxu1 %v1322_v0 }
  0x4d   :  { %1197 = vmatprep.subr.bf16.mxu0 %v1322_v0  ;;  %1131 = vmatprep.mubr.msk.bf16.mxu1 %vm1323_vm0, %v1322_v0 }
  0x4e   :  { %1187 = vmatprep.mubr.msk.bf16.mxu0 %vm1323_vm0, %v1322_v0 }
  0x4f   :  { %1230 = vmatpush3.bf16.msra.mxu1 %v1313_v56 }
  0x50   :  { %1198 = vmatpush3.bf16.msra.mxu0 %v1313_v56  ;;  %1223 = vmatprep.subr.bf16.mxu1 %v1322_v0 }
  0x51   :  { %1199 = vmatprep.subr.bf16.mxu0 %v1322_v0 }
  0x52   :  { %1132 = vmatmul.mubr.bf16.gmra.mrb[8].mxu1 %v1462_v36  ;;  %v651_v36 = vsel %vm644_vm2, %v648_v62, %v650_v1 }
  0x53   :  { %1188 = vmatmul.mubr.bf16.gmra.mrb[8].mxu0 %v512_v58  ;;  %1231 = vmatpush3.bf16.msra.mxu1 %v1314_v54 }
  0x54   :  { %1200 = vmatpush3.bf16.msra.mxu0 %v1314_v54  ;;  %1224 = vmatprep.subr.bf16.mxu1 %v1322_v0 }
  0x55   :  { %1201 = vmatprep.subr.bf16.mxu0 %v1322_v0  ;;  %1207 = vmatprep.mubr.msk.bf16.mxu0 %vm1323_vm0, %v1322_v0 }
  0x56   :  { %1211 = vmatprep.mubr.msk.bf16.mxu1 %vm1323_vm0, %v1322_v0 }
  0x57   :  { %1232 = vmatpush3.bf16.msra.mxu1 %v1315_v59 }
  0x58   :  { %1202 = vmatpush3.bf16.msra.mxu0 %v1315_v59  ;;  %1225 = vmatprep.subr.bf16.mxu1 %v1322_v0 }
  0x59   :  { %1203 = vmatprep.subr.bf16.mxu0 %v1322_v0 }
  0x5b   :  { %1233 = vmatpush3.bf16.msra.mxu1 %v1316_v60 }
  0x5c   :  { %1204 = vmatpush3.bf16.msra.mxu0 %v1316_v60  ;;  %1226 = vmatprep.subr.bf16.mxu1 %v1322_v0 }
  0x5d   :  { %1205 = vmatprep.subr.bf16.mxu0 %v1322_v0 }
  0x5f   :  { %1234 = vmatpush3.bf16.msra.mxu1 %v1317_v61 }
  0x60   :  { %1206 = vmatpush3.bf16.msra.mxu0 %v1317_v61 }
  0x62   :  { %1212 = vmatmul.mubr.bf16.vlgmr.msra.gmra.mrb[12].mxu1 %v649_v63 }
  0x63   :  { %1208 = vmatmul.mubr.bf16.vlgmr.msra.gmra.mrb[0].mxu0 %v1468_v37  ;;  %1215 = vmatprep.mubr.msk.bf16.mxu1 %vm1323_vm0, %v1322_v0 }
  0x6a   :  { %1216 = vmatmul.mubr.bf16.gmra.mrb[16].mxu1 %v651_v36 }
  0x8c   :  { %v1677_v26 = vpop.permute.xlu0 %768 }
  0x8d   :  { %v1679_v27 = vpop.permute.xlu1 %778 }
  0x90   :  { %v1681_v39 = vpop.permute.xlu0 %773 }
  0x91   :  { %v1683_v42 = vpop.permute.xlu1 %783 }
  0x94   :  { %v1688_v51 = vpop.permute.xlu0 %788 }
  0x95   :  { %v1692_v54 = vpop.permute.xlu1 %793 }
  0xb0   :  { %v816_v60 = vpop.permute.xlu0 %815 }
  0xb1   :  { %1318 = vrcp.f32 %v816_v60 }
 0x115   :  { %v312_v2 = vpop.f32.mrb[0].mxu1 }
 0x116   :  { %v1125_v3 = vpop.f32.mrb[1].mxu1 }
 0x117   :  { %v315_v4 = vpop.f32.mrb[2].mxu1 }
 0x118   :  { %v1126_v5 = vpop.f32.mrb[3].mxu1 }
 0x11d   :  { %v320_v6 = vpop.f32.mrb[4].mxu1 }
 0x11e   :  { %v606_v18 = vpop.f32.mrb[4].mxu0  ;;  %v1129_v7 = vpop.f32.mrb[5].mxu1 }
 0x11f   :  { %v1237_v33 = vadd.f32 %v606_v18, %v320_v6  ;;  %v1185_v8 = vpop.f32.mrb[5].mxu0  ;;  %v323_v9 = vpop.f32.mrb[6].mxu1 }
 0x120   :  { %v609_v10 = vpop.f32.mrb[6].mxu0  ;;  %v1130_v37 = vpop.f32.mrb[7].mxu1 }
 0x121   :  { %v1239_v11 = vadd.f32 %v609_v10, %v323_v9  ;;  %v1186_v12 = vpop.f32.mrb[7].mxu0 }
 0x125   :  { %v328_v0 = vpop.f32.mrb[8].mxu1 }
 0x126   :  { %v614_v13 = vpop.f32.mrb[8].mxu0  ;;  %v1133_v50 = vpop.f32.mrb[9].mxu1 }
 0x127   :  { %v1241_v14 = vadd.f32 %v614_v13, %v328_v0  ;;  %v1189_v15 = vpop.f32.mrb[9].mxu0  ;;  %v331_v17 = vpop.f32.mrb[10].mxu1 }
 0x128   :  { %v617_v19 = vpop.f32.mrb[10].mxu0  ;;  %v1134_v21 = vpop.f32.mrb[11].mxu1 }
 0x129   :  { %v1243_v23 = vadd.f32 %v617_v19, %v331_v17  ;;  %v1190_v25 = vpop.f32.mrb[11].mxu0 }
 0x135   :  { %v745_v28 = vpop.f32.mrb[12].mxu1 }
 0x136   :  { %v737_v29 = vpop.f32.mrb[0].mxu0  ;;  %v1238_v30 = vadd.f32 %v1237_v33, %v745_v28  ;;  %v1213_v31 = vpop.f32.mrb[13].mxu1 }
 0x137   :  { %v1235_v32 = vadd.f32 %v737_v29, %v312_v2  ;;  %v1209_v34 = vpop.f32.mrb[1].mxu0  ;;  %v748_v22 = vpop.f32.mrb[14].mxu1 }
 0x138   :  { %v740_v24 = vpop.f32.mrb[2].mxu0  ;;  %v1240_v35 = vadd.f32 %v1239_v11, %v748_v22  ;;  %v1214_v38 = vpop.f32.mrb[15].mxu1  ;;  %v798_v45 = vmul.f32 %v1238_v30, %v1679_v27 }
 0x139   :  { %v1236_v20 = vadd.f32 %v740_v24, %v315_v4  ;;  %v1210_v40 = vpop.f32.mrb[3].mxu0  ;;  %v796_v43 = vmul.f32 %v1235_v32, %v1677_v26  ;;  %v1319_v4 = vpop.eup %1318 }
 0x13a   :  { %v799_v41 = vmul.f32 %v1240_v35, %v1683_v42 }
 0x13b   :  { %v797_v44 = vmul.f32 %v1236_v20, %v1681_v39 }
 0x13d   :  { %v802_v46 = vadd.f32 %v797_v44, %v796_v43  ;;  %v753_v47 = vpop.f32.mrb[16].mxu1  ;;  %v1022_v43 = vld [vmem:[%s1752_s2] ss:$0 sm:$0xff] }
 0x13e   :  { %v1242_v48 = vadd.f32 %v1241_v14, %v753_v47  ;;  %v1217_v49 = vpop.f32.mrb[17].mxu1 }
 0x13f   :  { %v803_v16 = vadd.f32 %v802_v46, %v798_v45  ;;  %v756_v52 = vpop.f32.mrb[18].mxu1 }
 0x140   :  { %v800_v53 = vmul.f32 %v1242_v48, %v1688_v51  ;;  %v1244_v55 = vadd.f32 %v1243_v23, %v756_v52  ;;  %v1218_v56 = vpop.f32.mrb[19].mxu1 }
 0x141   :  { %v804_v57 = vadd.f32 %v803_v16, %v799_v41  ;;  %v1023_v41 = vld [vmem:[%s1753_s3] ss:$0 sm:$0xff] }
 0x142   :  { %v801_v58 = vmul.f32 %v1244_v55, %v1692_v54 }
 0x143   :  { %v805_v59 = vadd.f32 %v804_v57, %v800_v53 }
 0x145   :  { %v806_v61 = vadd.f32 %v805_v59, %v801_v58 }
 0x147   :  { %v807_v62 = vrot.slane %v806_v61, 4 }
 0x149   :  { %v808_v63 = vadd.f32 %v807_v62, %v806_v61  ;;  %v890_v62 = vld [vmem:[%s1754_s5] sm:$0xff] }
 0x14b   :  { %v809_v1 = vrot.slane %v808_v63, 2 }
 0x14d   :  { %v810_v36 = vadd.f32 %v809_v1, %v808_v63 }
 0x14f   :  { %v811_v2 = vrot.slane %v810_v36, 1 }
 0x151   :  { %v812_v3 = vadd.f32 %v811_v2, %v810_v36  ;;  %v891_v36 = vld [vmem:[%s1754_s5 + $0x8] sm:$0xff]  ;;  %v892_v2 = vld [vmem:[%s1754_s5 + $0x10] sm:$0xff] }
 0x153   :  { %v819_v5 = vmul.f32 %v1319_v4, %v812_v3  ;;  %v893_v3 = vld [vmem:[%s1754_s5 + $0x18] sm:$0xff] }
 0x155   :  { %v820_v6 = vsub.f32 %v1235_v32, %v819_v5  ;;  %v821_v18 = vsub.f32 %v1236_v20, %v819_v5  ;;  %v822_v7 = vsub.f32 %v1238_v30, %v819_v5  ;;  %v823_v33 = vsub.f32 %v1240_v35, %v819_v5 }
 0x156   :  { %v824_v8 = vsub.f32 %v1242_v48, %v819_v5  ;;  %v825_v9 = vsub.f32 %v1244_v55, %v819_v5 }
 0x157   :  { %v826_v10 = vmul.f32 %v820_v6, %v1677_v26  ;;  %v827_v37 = vmul.f32 %v821_v18, %v1681_v39  ;;  %v828_v11 = vmul.f32 %v822_v7, %v1679_v27  ;;  %v829_v12 = vmul.f32 %v823_v33, %v1683_v42 }
 0x158   :  { %v830_v50 = vmul.f32 %v824_v8, %v1688_v51  ;;  %v831_v17 = vmul.f32 %v825_v9, %v1692_v54 }
 0x159   :  { %v832_v0 = vmul.f32 %v826_v10, %v826_v10  ;;  %v833_v13 = vmul.f32 %v827_v37, %v827_v37  ;;  %v834_v14 = vmul.f32 %v828_v11, %v828_v11  ;;  %v835_v19 = vmul.f32 %v829_v12, %v829_v12 }
 0x15a   :  { %v836_v23 = vmul.f32 %v830_v50, %v830_v50  ;;  %v837_v28 = vmul.f32 %v831_v17, %v831_v17 }
 0x15b   :  { %v838_v15 = vadd.f32 %v833_v13, %v832_v0 }
 0x15d   :  { %v839_v21 = vadd.f32 %v838_v15, %v834_v14 }
 0x15f   :  { %v840_v25 = vadd.f32 %v839_v21, %v835_v19 }
 0x161   :  { %v841_v29 = vadd.f32 %v840_v25, %v836_v23 }
 0x163   :  { %v842_v30 = vadd.f32 %v841_v29, %v837_v28 }
 0x165   :  { %v843_v31 = vrot.slane %v842_v30, 4 }
 0x167   :  { %v844_v32 = vadd.f32 %v843_v31, %v842_v30 }
 0x169   :  { %v845_v34 = vrot.slane %v844_v32, 2 }
 0x16b   :  { %v846_v22 = vadd.f32 %v845_v34, %v844_v32 }
 0x16d   :  { %v847_v24 = vrot.slane %v846_v22, 1 }
 0x16f   :  { %v848_v35 = vadd.f32 %v847_v24, %v846_v22 }
 0x171   :  { %v849_v38 = vmul.f32 %v1319_v4, %v848_v35 }
 0x173   :  { %v850_v20 = vadd.f32 1e-05, %v849_v38 }
 0x175   :  { %1320 = vrsqrt.f32 %v850_v20 }
 0x17f   :  { %v1321_v40 = vpop.eup %1320 }
 0x180   :  { %v852_v44 = vmul.f32 %v1321_v40, %v820_v6  ;;  %v853_v45 = vmul.f32 %v1321_v40, %v821_v18  ;;  %v854_v46 = vmul.f32 %v1321_v40, %v822_v7  ;;  %v855_v47 = vmul.f32 %v1321_v40, %v823_v33  ;;  %v894_v7 = vld [vmem:[%s1754_s5 + $0x20] sm:$0xff]  ;;  %v895_v33 = vld [vmem:[%s1754_s5 + $0x28] sm:$0xff] }
 0x181   :  { %v856_v48 = vmul.f32 %v1321_v40, %v824_v8  ;;  %v857_v49 = vmul.f32 %v1321_v40, %v825_v9 }
 0x182   :  { %v865_v16 = vmul.f32 %v1022_v43, %v852_v44  ;;  %v866_v52 = vmul.f32 %v1022_v43, %v853_v45  ;;  %v867_v53 = vmul.f32 %v1022_v43, %v854_v46  ;;  %v868_v55 = vmul.f32 %v1022_v43, %v855_v47 }
 0x183   :  { %v869_v56 = vmul.f32 %v1022_v43, %v856_v48  ;;  %v870_v57 = vmul.f32 %v1022_v43, %v857_v49 }
 0x184   :  { %v878_v58 = vadd.f32 %v1023_v41, %v865_v16  ;;  %v879_v59 = vadd.f32 %v1023_v41, %v866_v52  ;;  %v880_v60 = vadd.f32 %v1023_v41, %v867_v53  ;;  %v881_v61 = vadd.f32 %v1023_v41, %v868_v55 }
 0x185   :  { %v882_v63 = vadd.f32 %v1023_v41, %v869_v56  ;;  %v883_v1 = vadd.f32 %v1023_v41, %v870_v57 }
 0x186   :  { %v884_v4 = vmax.f32 %v878_v58, 0.0  ;;  %v885_v5 = vmax.f32 %v879_v59, 0.0  ;;  %v886_v6 = vmax.f32 %v880_v60, 0.0  ;;  %v887_v18 = vmax.f32 %v881_v61, 0.0 }
 0x187   :  { %v888_v8 = vmax.f32 %v882_v63, 0.0  ;;  %v889_v9 = vmax.f32 %v883_v1, 0.0 }
 0x188   :  { %v896_v10 = vadd.f32 %v890_v62, %v884_v4  ;;  %v897_v37 = vadd.f32 %v891_v36, %v885_v5  ;;  %v898_v11 = vadd.f32 %v892_v2, %v886_v6  ;;  %v899_v12 = vadd.f32 %v893_v3, %v887_v18 }
 0x189   :  { %v900_v0 = vadd.f32 %v894_v7, %v888_v8  ;;  %v901_v13 = vadd.f32 %v895_v33, %v889_v9 }
 0x18a   :  { %v902_v50 = vmul.f32 %v896_v10, %v1677_v26  ;;  %v903_v14 = vmul.f32 %v897_v37, %v1681_v39  ;;  %v904_v15 = vmul.f32 %v898_v11, %v1679_v27  ;;  %v905_v17 = vmul.f32 %v899_v12, %v1683_v42 }
 0x18b   :  { %v906_v19 = vmul.f32 %v900_v0, %v1688_v51  ;;  %v907_v21 = vmul.f32 %v901_v13, %v1692_v54 }
 0x18c   :  { %908 = vst [vmem:[%s1755_s6] sm:$0xff] %v902_v50  ;;  %909 = vst [vmem:[%s1755_s6 + $0x8] sm:$0xff] %v903_v14 }
 0x18d   :  { %910 = vst [vmem:[%s1755_s6 + $0x10] sm:$0xff] %v904_v15  ;;  %911 = vst [vmem:[%s1755_s6 + $0x18] sm:$0xff] %v905_v17 }
 0x18e   :  { %912 = vst [vmem:[%s1755_s6 + $0x20] sm:$0xff] %v906_v19  ;;  %913 = vst [vmem:[%s1755_s6 + $0x28] sm:$0xff] %v907_v21 }

// kernel: _forward_padded.7
= control target key start
LH: loop header
LB: loop body
LE: loop exit
PB: predicated region body
PF: predicated region fallthrough
CT: control target
= control target key end

     0   :  { %v2106_v33 = vmov 0   ;;  %vm596_vm0 = vcmask 1046528   ;;  %vm311_vm1 = vsmask.f32 7424  ;;  %vm36_vm2 = vcmask 7168   ;;  %s2567_s1 = inlined_call_operand.vmem [shape: bf16[5,128,128], index: 1, kind: input, shape index: {}]   ;;  %s2568_s2 = inlined_call_operand.vmem [shape: bf16[5,128,128], index: 2, kind: input, shape index: {}]   ;;  %s2569_s0 = inlined_call_operand.vmem [shape: f32[2,35,128], index: 0, kind: input, shape index: {}]   ;;  %s2570_s7 = inlined_call_operand.vmem [shape: f32[32,1], index: 7, kind: input, shape index: {}]   ;;  %s2571_s3 = inlined_call_operand.vmem [shape: f32[1,128], index: 3, kind: input, shape index: {}]   ;;  %s2572_s4 = inlined_call_operand.vmem [shape: f32[1,128], index: 4, kind: input, shape index: {}]   ;;  %s2573_s5 = inlined_call_operand.vmem [shape: f32[1,128], index: 5, kind: input, shape index: {}]   ;;  %s2574_s6 = inlined_call_operand.vmem [shape: f32[1,128], index: 6, kind: input, shape index: {}]   ;;  %s2575_s8 = inlined_call_operand.vmem [shape: f32[32,128], index: 8, kind: output, shape index: {0}]   ;;  %s2576_s9 = inlined_call_operand.vmem [shape: f32[32,128], index: 9, kind: output, shape index: {1}]  }
   0x1   :  { %v2020_v0 = vld [vmem:[%s2567_s1 + $0x40] sm:$0xff]   ;;  %v2022_v2 = vld [vmem:[%s2567_s1 + $0x48] sm:$0xff]   ;;  %v2024_v4 = vld [vmem:[%s2567_s1 + $0x50] sm:$0xff]   ;;  %2018 = vset.pattern.permute.xlu0 %v2106_v33  ;;  %2019 = vset.pattern.permute.xlu1 %v2106_v33 }
   0x2   :  { %v2021_v1 = vld [vmem:[%s2568_s2 + $0x40] sm:$0xff]   ;;  %1785 = vmatprep.subr.bf16.mxu0 %v2020_v0  ;;  %v2023_v3 = vld [vmem:[%s2568_s2 + $0x48] sm:$0xff]   ;;  %v2025_v5 = vld [vmem:[%s2568_s2 + $0x50] sm:$0xff]  }
   0x3   :  { %1885 = vmatprep.subr.bf16.mxu1 %v2021_v1  ;;  %1786 = vmatpush3.bf16.msra.mxu0 %v2020_v0  ;;  %v2026_v6 = vld [vmem:[%s2567_s1 + $0x58] sm:$0xff]   ;;  %v2028_v8 = vld [vmem:[%s2567_s1 + $0x60] sm:$0xff]   ;;  %v2030_v10 = vld [vmem:[%s2567_s1 + $0x68] sm:$0xff]  }
   0x4   :  { %1886 = vmatpush3.bf16.msra.mxu1 %v2021_v1  ;;  %1787 = vmatprep.subr.bf16.mxu0 %v2022_v2  ;;  %v2027_v7 = vld [vmem:[%s2568_s2 + $0x58] sm:$0xff]   ;;  %v2029_v9 = vld [vmem:[%s2568_s2 + $0x60] sm:$0xff]   ;;  %v1468_v11 = vld [vmem:[%s2569_s0 + $0x28] sm:$0xff] }
   0x5   :  { %1887 = vmatprep.subr.bf16.mxu1 %v2023_v3  ;;  %v1469_v12 = vld [vmem:[%s2569_s0 + $0x30] sm:$0xff]  ;;  %v2031_v13 = vld [vmem:[%s2568_s2 + $0x68] sm:$0xff]   ;;  %v2034_v17 = vld [vmem:[%s2567_s1 + $0x78] sm:$0xff]  }
   0x6   :  { %v2199_v14 = vpack.c.bf16 %v1469_v12, %v1468_v11  ;;  %v2032_v15 = vld [vmem:[%s2567_s1 + $0x70] sm:$0xff]   ;;  %v2035_v18 = vld [vmem:[%s2568_s2 + $0x78] sm:$0xff]   ;;  %v1471_v20 = vld [vmem:[%s2569_s0 + $0x40] sm:$0xff] }
   0x7   :  { %1788 = vmatpush3.bf16.msra.mxu0 %v2022_v2  ;;  %v2033_v16 = vld [vmem:[%s2568_s2 + $0x70] sm:$0xff]   ;;  %v1470_v19 = vld [vmem:[%s2569_s0 + $0x38] sm:$0xff]  ;;  %v2036_v21 = vld [vmem:[%s2567_s1] sm:$0xff]  }
   0x8   :  { %1888 = vmatpush3.bf16.msra.mxu1 %v2023_v3  ;;  %1789 = vmatprep.subr.bf16.mxu0 %v2024_v4  ;;  %v2037_v22 = vld [vmem:[%s2568_s2] sm:$0xff]   ;;  %v2227_v23 = vpack.c.bf16 %v1471_v20, %v1470_v19  ;;  %v2038_v24 = vld [vmem:[%s2567_s1 + $0x8] sm:$0xff]   ;;  %v2040_v29 = vld [vmem:[%s2567_s1 + $0x10] sm:$0xff]  }
   0x9   :  { %1889 = vmatprep.subr.bf16.mxu1 %v2025_v5  ;;  %1801 = vmatprep.mubr.bf16.mxu0 %v2199_v14  ;;  %v2039_v25 = vld [vmem:[%s2568_s2 + $0x8] sm:$0xff]   ;;  %v51_v26 = vld [vmem:[%s2569_s0] sm:$0xff]  ;;  %v2041_v30 = vld [vmem:[%s2568_s2 + $0x10] sm:$0xff]  }
   0xa   :  { %1901 = vmatprep.mubr.bf16.mxu1 %v2199_v14  ;;  %v52_v27 = vld [vmem:[%s2569_s0 + $0x8] sm:$0xff]  ;;  %v53_v31 = vld [vmem:[%s2569_s0 + $0x10] sm:$0xff]  ;;  %v54_v32 = vld [vmem:[%s2569_s0 + $0x18] sm:$0xff]  ;;  %v461_v61 = vshll.u32 %v2227_v23, 16  ;;  %v465_v1 = vshrl.u32 %v2227_v23, 16 }
   0xb   :  { %1790 = vmatpush3.bf16.msra.mxu0 %v2024_v4  ;;  %v2242_v28 = vpack.c.bf16 %v52_v27, %v51_v26  ;;  %v2042_v34 = vld [vmem:[%s2567_s1 + $0x18] sm:$0xff]   ;;  %v2262_v35 = vpack.c.bf16 %v54_v32, %v53_v31  ;;  %v2044_v39 = vld [vmem:[%s2567_s1 + $0x20] sm:$0xff]   ;;  %v2046_v42 = vld [vmem:[%s2567_s1 + $0x28] sm:$0xff]   ;;  %v456_v27 = vshll.u32 %v2199_v14, 16 }
   0xc   :  { %1890 = vmatpush3.bf16.msra.mxu1 %v2025_v5  ;;  %1791 = vmatprep.subr.bf16.mxu0 %v2026_v6  ;;  %v2043_v37 = vld [vmem:[%s2568_s2 + $0x18] sm:$0xff]   ;;  %v2045_v41 = vld [vmem:[%s2568_s2 + $0x20] sm:$0xff]   ;;  %v2047_v43 = vld [vmem:[%s2568_s2 + $0x28] sm:$0xff]   ;;  %v2334_v3 = vrot.slane %v461_v61, 1 }
   0xd   :  { %1891 = vmatprep.subr.bf16.mxu1 %v2027_v7  ;;  %v597_v36 = vrot.slane %v2242_v28, 1  ;;  %v598_v38 = vrot.slane %v2262_v35, 1  ;;  %v2048_v44 = vld [vmem:[%s2567_s1 + $0x30] sm:$0xff]   ;;  %v55_v45 = vld [vmem:[%s2569_s0 + $0x20] sm:$0x7]  ;;  %v315_v47 = vshll.u32 %v2242_v28, 16 }
   0xe   :  { %v2049_v46 = vld [vmem:[%s2568_s2 + $0x30] sm:$0xff]   ;;  %v2294_v48 = vpack.c.bf16 %v55_v45, %v55_v45  ;;  %v2050_v49 = vld [vmem:[%s2567_s1 + $0x38] sm:$0xff]   ;;  %v313_v52 = vshrl.u32 %v2242_v28, 16  ;;  %v320_v54 = vshll.u32 %v2262_v35, 16  ;;  %v2052_v56 = vld [vmem:[%s2567_s1 + $0x80] sm:$0xff]  }
   0xf   :  { %1792 = vmatpush3.bf16.msra.mxu0 %v2026_v6  ;;  %v2273_v40 = vsel %vm596_vm0, %v597_v36, %v598_v38  ;;  %v2051_v51 = vld [vmem:[%s2568_s2 + $0x38] sm:$0xff]   ;;  %v317_v53 = vrot.slane %v315_v47, 1  ;;  %v2053_v57 = vld [vmem:[%s2568_s2 + $0x80] sm:$0xff]   ;;  %v2054_v60 = vld [vmem:[%s2567_s1 + $0x88] sm:$0xff]   ;;  %v454_v36 = vshrl.u32 %v2199_v14, 16 }
  0x10   :  { %1892 = vmatpush3.bf16.msra.mxu1 %v2027_v7  ;;  %1793 = vmatprep.subr.bf16.mxu0 %v2028_v8  ;;  %v600_v50 = vrot.slane %v2294_v48, 1  ;;  %v2314_v59 = vrot.slane %v320_v54, 1  ;;  %v2055_v62 = vld [vmem:[%s2568_s2 + $0x88] sm:$0xff]   ;;  %v2056_v0 = vld [vmem:[%s2567_s1 + $0x90] sm:$0xff]   ;;  %v2058_v6 = vld [vmem:[%s2567_s1 + $0x98] sm:$0xff]   ;;  %v467_v7 = vor.u32 %v465_v1, %v2334_v3 }
  0x11   :  { %1893 = vmatprep.subr.bf16.mxu1 %v2029_v9  ;;  %v318_v58 = vor.u32 %v317_v53, %v313_v52  ;;  %v2057_v2 = vld [vmem:[%s2568_s2 + $0x90] sm:$0xff]   ;;  %v1472_v4 = vld [vmem:[%s2569_s0 + $0x48] sm:$0x7]  ;;  %v2060_v11 = vld [vmem:[%s2567_s1 + $0xa0] sm:$0xff]  }
  0x12   :  { %v2306_v55 = vsel %vm596_vm0, %v598_v38, %v600_v50  ;;  %v435_v5 = vpack.c.bf16 %v1472_v4, %v1472_v4  ;;  %v2064_v19 = vld [vmem:[%s2567_s1 + $0xb0] sm:$0xff]   ;;  %v2066_v32 = vld [vmem:[%s2567_s1 + $0xb8] sm:$0xff]   ;;  %v2071_v47 = vld [vmem:[%s2568_s2 + $0xc8] sm:$0xff]  }
  0x13   :  { %1794 = vmatpush3.bf16.msra.mxu0 %v2028_v8  ;;  %v323_v63 = vsel %vm311_vm1, %v318_v58, %v2314_v59  ;;  %v2067_v33 = vld [vmem:[%s2568_s2 + $0xb8] sm:$0xff]   ;;  %v2073_v52 = vld [vmem:[%s2568_s2 + $0xd0] sm:$0xff]   ;;  %v2076_v58 = vld [vmem:[%s2567_s1 + $0xe0] sm:$0xff]  }
  0x14   :  { %1894 = vmatpush3.bf16.msra.mxu1 %v2029_v9  ;;  %1795 = vmatprep.subr.bf16.mxu0 %v2030_v10  ;;  %v469_v8 = vshll.u32 %v435_v5, 16  ;;  %v2059_v9 = vld [vmem:[%s2568_s2 + $0x98] sm:$0xff]   ;;  %v2079_v61 = vld [vmem:[%s2568_s2 + $0xe8] sm:$0xff]  }
  0x15   :  { %1895 = vmatprep.subr.bf16.mxu1 %v2031_v13  ;;  %v2083_v1 = vld [vmem:[%s2568_s2 + $0xf8] sm:$0xff]   ;;  %v2086_v4 = vld [vmem:[%s2567_s1 + $0x108] sm:$0xff]  }
  0x16   :  { %v2087_v5 = vld [vmem:[%s2568_s2 + $0x108] sm:$0xff]  }
  0x17   :  { %1796 = vmatpush3.bf16.msra.mxu0 %v2030_v10  ;;  %v471_v10 = vrot.slane %v469_v8, 1  ;;  %v2090_v8 = vld [vmem:[%s2567_s1 + $0x118] sm:$0xff]  }
  0x18   :  { %1896 = vmatpush3.bf16.msra.mxu1 %v2031_v13  ;;  %1797 = vmatprep.subr.bf16.mxu0 %v2032_v15  ;;  %v2061_v13 = vld [vmem:[%s2568_s2 + $0xa0] sm:$0xff]  }
  0x19   :  { %1897 = vmatprep.subr.bf16.mxu1 %v2033_v16  ;;  %v2350_v12 = vsel %vm311_vm1, %v467_v7, %v471_v10  ;;  %v2089_v7 = vld [vmem:[%s2568_s2 + $0x110] sm:$0xff]   ;;  %v2092_v10 = vld [vmem:[%s2567_s1 + $0x120] sm:$0xff]  }
  0x1b   :  { %1798 = vmatpush3.bf16.msra.mxu0 %v2032_v15  ;;  %v2062_v15 = vld [vmem:[%s2567_s1 + $0xa8] sm:$0xff]  }
  0x1c   :  { %1898 = vmatpush3.bf16.msra.mxu1 %v2033_v16  ;;  %1799 = vmatprep.subr.bf16.mxu0 %v2034_v17  ;;  %v2063_v16 = vld [vmem:[%s2568_s2 + $0xa8] sm:$0xff]  }
  0x1d   :  { %1899 = vmatprep.subr.bf16.mxu1 %v2035_v18 }
  0x1f   :  { %1800 = vmatpush3.bf16.msra.mxu0 %v2034_v17  ;;  %v32_v17 = vld [vmem:[%s2570_s7] sm:$0xff] }
  0x20   :  { %1900 = vmatpush3.bf16.msra.mxu1 %v2035_v18  ;;  %1805 = vmatprep.subr.bf16.mxu0 %v2036_v21  ;;  %v33_v18 = vld [vmem:[%s2570_s7 + $0x8] sm:$0xff]  ;;  %v37_v20 = vsel %vm36_vm2, %v32_v17, 0.0 }
  0x21   :  { %1905 = vmatprep.subr.bf16.mxu1 %v2037_v22  ;;  %707 = vperm.xlu0 %2018, %v32_v17   ;;  %v2099_v17 = vld [vmem:[%s2568_s2 + $0x138] sm:$0xff]  }
  0x22   :  { %1802 = vmatmul.mubr.bf16.vlgmr.msra.gmra.mrb[0].mxu0 %v2227_v23 }
  0x23   :  { %1806 = vmatpush3.bf16.msra.mxu0 %v2036_v21  ;;  %1902 = vmatmul.mubr.bf16.vlgmr.msra.gmra.mrb[0].mxu1 %v2227_v23  ;;  %v38_v21 = vsel %vm36_vm2, %v33_v18, 0.0  ;;  %v35_v23 = vld [vmem:[%s2570_s7 + $0x18] sm:$0xff] }
  0x24   :  { %1906 = vmatpush3.bf16.msra.mxu1 %v2037_v22  ;;  %1807 = vmatprep.subr.bf16.mxu0 %v2038_v24  ;;  %v34_v22 = vld [vmem:[%s2570_s7 + $0x10] sm:$0xff] }
  0x25   :  { %1907 = vmatprep.subr.bf16.mxu1 %v2039_v25  ;;  %1821 = vmatprep.mubr.bf16.mxu0 %v2242_v28  ;;  %v40_v26 = vsel %vm36_vm2, %v34_v22, 0.0 }
  0x26   :  { %1921 = vmatprep.mubr.bf16.mxu1 %v2242_v28  ;;  %v42_v28 = vsel %vm36_vm2, %v35_v23, 0.0  ;;  %717 = vperm.xlu1 %2019, %v34_v22  }
  0x27   :  { %1808 = vmatpush3.bf16.msra.mxu0 %v2038_v24  ;;  %v2065_v24 = vld [vmem:[%s2568_s2 + $0xb0] sm:$0xff]   ;;  %712 = vperm.xlu0 %2018, %v33_v18  }
  0x28   :  { %1908 = vmatpush3.bf16.msra.mxu1 %v2039_v25  ;;  %1809 = vmatprep.subr.bf16.mxu0 %v2040_v29  ;;  %v39_v25 = vadd.f32 %v38_v21, %v37_v20 }
  0x29   :  { %1909 = vmatprep.subr.bf16.mxu1 %v2041_v30 }
  0x2a   :  { %v41_v31 = vadd.f32 %v40_v26, %v39_v25  ;;  %722 = vperm.xlu1 %2019, %v35_v23  }
  0x2b   :  { %1810 = vmatpush3.bf16.msra.mxu0 %v2040_v29  ;;  %v324_v29 = vshrl.u32 %v2262_v35, 16 }
  0x2c   :  { %1910 = vmatpush3.bf16.msra.mxu1 %v2041_v30  ;;  %1811 = vmatprep.subr.bf16.mxu0 %v2042_v34  ;;  %v328_v30 = vshll.u32 %v2294_v48, 16 }
  0x2d   :  { %1911 = vmatprep.subr.bf16.mxu1 %v2043_v37 }
  0x2e   :  { %v330_v38 = vrot.slane %v328_v30, 1 }
  0x2f   :  { %1812 = vmatpush3.bf16.msra.mxu0 %v2042_v34  ;;  %v43_v34 = vadd.f32 %v42_v28, %v41_v31 }
  0x30   :  { %1912 = vmatpush3.bf16.msra.mxu1 %v2043_v37  ;;  %1813 = vmatprep.subr.bf16.mxu0 %v2044_v39  ;;  %v458_v37 = vrot.slane %v456_v27, 1 }
  0x31   :  { %1913 = vmatprep.subr.bf16.mxu1 %v2045_v41 }
  0x32   :  { %v459_v14 = vor.u32 %v458_v37, %v454_v36 }
  0x33   :  { %1814 = vmatpush3.bf16.msra.mxu0 %v2044_v39  ;;  %v44_v39 = vrot.slane %v43_v34, 4 }
  0x34   :  { %1914 = vmatpush3.bf16.msra.mxu1 %v2045_v41  ;;  %1815 = vmatprep.subr.bf16.mxu0 %v2046_v42  ;;  %v2068_v41 = vld [vmem:[%s2567_s1 + $0xc0] sm:$0xff]  }
  0x35   :  { %1915 = vmatprep.subr.bf16.mxu1 %v2047_v43 }
  0x37   :  { %1816 = vmatpush3.bf16.msra.mxu0 %v2046_v42  ;;  %v2069_v42 = vld [vmem:[%s2568_s2 + $0xc0] sm:$0xff]  }
  0x38   :  { %1916 = vmatpush3.bf16.msra.mxu1 %v2047_v43  ;;  %1817 = vmatprep.subr.bf16.mxu0 %v2048_v44  ;;  %v45_v43 = vadd.f32 %v44_v39, %v43_v34 }
  0x39   :  { %1917 = vmatprep.subr.bf16.mxu1 %v2049_v46 }
  0x3a   :  { %v46_v45 = vrot.slane %v45_v43, 2 }
  0x3b   :  { %1818 = vmatpush3.bf16.msra.mxu0 %v2048_v44 }
  0x3c   :  { %1918 = vmatpush3.bf16.msra.mxu1 %v2049_v46  ;;  %1819 = vmatprep.subr.bf16.mxu0 %v2050_v49  ;;  %v2070_v46 = vld [vmem:[%s2567_s1 + $0xc8] sm:$0xff]   ;;  %v47_v48 = vadd.f32 %v46_v45, %v45_v43 }
  0x3d   :  { %1919 = vmatprep.subr.bf16.mxu1 %v2051_v51 }
  0x3e   :  { %v48_v50 = vrot.slane %v47_v48, 1 }
  0x3f   :  { %1820 = vmatpush3.bf16.msra.mxu0 %v2050_v49  ;;  %v464_v49 = vsel %vm311_vm1, %v459_v14, %v2334_v3  ;;  %v2085_v3 = vld [vmem:[%s2568_s2 + $0x100] sm:$0xff]  }
  0x40   :  { %1920 = vmatpush3.bf16.msra.mxu1 %v2051_v51  ;;  %1825 = vmatprep.subr.bf16.mxu0 %v2052_v56  ;;  %v2072_v51 = vld [vmem:[%s2567_s1 + $0xd0] sm:$0xff]   ;;  %v49_v53 = vadd.f32 %v48_v50, %v47_v48 }
  0x41   :  { %1925 = vmatprep.subr.bf16.mxu1 %v2053_v57 }
  0x42   :  { %1822 = vmatmul.mubr.bf16.vlgmr.msra.gmra.mrb[0].mxu0 %v2262_v35  ;;  %v50_v54 = vmax.f32 %v49_v53, 1.0 }
  0x43   :  { %1826 = vmatpush3.bf16.msra.mxu0 %v2052_v56  ;;  %1922 = vmatmul.mubr.bf16.vlgmr.msra.gmra.mrb[0].mxu1 %v2262_v35  ;;  %v326_v35 = vor.u32 %v324_v29, %v2314_v59  ;;  %v2074_v56 = vld [vmem:[%s2567_s1 + $0xd8] sm:$0xff]   ;;  %v2077_v59 = vld [vmem:[%s2568_s2 + $0xe0] sm:$0xff]  }
  0x44   :  { %1926 = vmatpush3.bf16.msra.mxu1 %v2053_v57  ;;  %1827 = vmatprep.subr.bf16.mxu0 %v2054_v60  ;;  %v2075_v57 = vld [vmem:[%s2568_s2 + $0xd8] sm:$0xff]  }
  0x45   :  { %1927 = vmatprep.subr.bf16.mxu1 %v2055_v62  ;;  %1841 = vmatprep.mubr.bf16.mxu0 %v323_v63  ;;  %v331_v44 = vsel %vm311_vm1, %v326_v35, %v330_v38 }
  0x46   :  { %1941 = vmatprep.mubr.bf16.mxu1 %v323_v63  ;;  %740 = vperm.xlu0 %2018, %v50_v54   ;;  %v2081_v63 = vld [vmem:[%s2568_s2 + $0xf0] sm:$0xff]  }
  0x47   :  { %1828 = vmatpush3.bf16.msra.mxu0 %v2054_v60  ;;  %v2078_v60 = vld [vmem:[%s2567_s1 + $0xe8] sm:$0xff]  }
  0x48   :  { %1928 = vmatpush3.bf16.msra.mxu1 %v2055_v62  ;;  %1829 = vmatprep.subr.bf16.mxu0 %v2056_v0  ;;  %v2080_v62 = vld [vmem:[%s2567_s1 + $0xf0] sm:$0xff]  }
  0x49   :  { %1929 = vmatprep.subr.bf16.mxu1 %v2057_v2 }
  0x4b   :  { %1830 = vmatpush3.bf16.msra.mxu0 %v2056_v0  ;;  %v2082_v0 = vld [vmem:[%s2567_s1 + $0xf8] sm:$0xff]  }
  0x4c   :  { %1930 = vmatpush3.bf16.msra.mxu1 %v2057_v2  ;;  %1831 = vmatprep.subr.bf16.mxu0 %v2058_v6  ;;  %v2084_v2 = vld [vmem:[%s2567_s1 + $0x100] sm:$0xff]  }
  0x4d   :  { %1931 = vmatprep.subr.bf16.mxu1 %v2059_v9 }
  0x4f   :  { %1832 = vmatpush3.bf16.msra.mxu0 %v2058_v6  ;;  %v2088_v6 = vld [vmem:[%s2567_s1 + $0x110] sm:$0xff]  }
  0x50   :  { %1932 = vmatpush3.bf16.msra.mxu1 %v2059_v9  ;;  %1833 = vmatprep.subr.bf16.mxu0 %v2060_v11  ;;  %v2091_v9 = vld [vmem:[%s2568_s2 + $0x118] sm:$0xff]  }
  0x51   :  { %1933 = vmatprep.subr.bf16.mxu1 %v2061_v13 }
  0x53   :  { %1834 = vmatpush3.bf16.msra.mxu0 %v2060_v11  ;;  %v2094_v11 = vld [vmem:[%s2567_s1 + $0x128] sm:$0xff]  }
  0x54   :  { %1934 = vmatpush3.bf16.msra.mxu1 %v2061_v13  ;;  %1835 = vmatprep.subr.bf16.mxu0 %v2062_v15  ;;  %v2096_v13 = vld [vmem:[%s2567_s1 + $0x130] sm:$0xff]  }
  0x55   :  { %1935 = vmatprep.subr.bf16.mxu1 %v2063_v16 }
  0x57   :  { %1836 = vmatpush3.bf16.msra.mxu0 %v2062_v15  ;;  %v2097_v15 = vld [vmem:[%s2568_s2 + $0x130] sm:$0xff]  }
  0x58   :  { %1936 = vmatpush3.bf16.msra.mxu1 %v2063_v16  ;;  %1837 = vmatprep.subr.bf16.mxu0 %v2064_v19  ;;  %v2098_v16 = vld [vmem:[%s2567_s1 + $0x138] sm:$0xff]  }
  0x59   :  { %1937 = vmatprep.subr.bf16.mxu1 %v2065_v24 }
  0x5b   :  { %1838 = vmatpush3.bf16.msra.mxu0 %v2064_v19 }
  0x5c   :  { %1938 = vmatpush3.bf16.msra.mxu1 %v2065_v24  ;;  %1839 = vmatprep.subr.bf16.mxu0 %v2066_v32 }
  0x5d   :  { %1939 = vmatprep.subr.bf16.mxu1 %v2067_v33 }
  0x5f   :  { %1840 = vmatpush3.bf16.msra.mxu0 %v2066_v32 }
  0x60   :  { %1940 = vmatpush3.bf16.msra.mxu1 %v2067_v33  ;;  %1845 = vmatprep.subr.bf16.mxu0 %v2068_v41 }
  0x61   :  { %1945 = vmatprep.subr.bf16.mxu1 %v2069_v42 }
  0x62   :  { %1842 = vmatmul.mubr.bf16.vlgmr.msra.gmra.mrb[0].mxu0 %v331_v44 }
  0x63   :  { %1846 = vmatpush3.bf16.msra.mxu0 %v2068_v41  ;;  %1942 = vmatmul.mubr.bf16.vlgmr.msra.gmra.mrb[0].mxu1 %v331_v44 }
  0x64   :  { %1946 = vmatpush3.bf16.msra.mxu1 %v2069_v42  ;;  %1847 = vmatprep.subr.bf16.mxu0 %v2070_v46 }
  0x65   :  { %1947 = vmatprep.subr.bf16.mxu1 %v2071_v47  ;;  %1861 = vmatprep.mubr.bf16.mxu0 %v464_v49 }
  0x66   :  { %1961 = vmatprep.mubr.bf16.mxu1 %v464_v49 }
  0x67   :  { %1848 = vmatpush3.bf16.msra.mxu0 %v2070_v46 }
  0x68   :  { %1948 = vmatpush3.bf16.msra.mxu1 %v2071_v47  ;;  %1849 = vmatprep.subr.bf16.mxu0 %v2072_v51 }
  0x69   :  { %1949 = vmatprep.subr.bf16.mxu1 %v2073_v52 }
  0x6b   :  { %1850 = vmatpush3.bf16.msra.mxu0 %v2072_v51 }
  0x6c   :  { %1950 = vmatpush3.bf16.msra.mxu1 %v2073_v52  ;;  %1851 = vmatprep.subr.bf16.mxu0 %v2074_v56 }
  0x6d   :  { %1951 = vmatprep.subr.bf16.mxu1 %v2075_v57 }
  0x6f   :  { %1852 = vmatpush3.bf16.msra.mxu0 %v2074_v56 }
  0x70   :  { %1952 = vmatpush3.bf16.msra.mxu1 %v2075_v57  ;;  %1853 = vmatprep.subr.bf16.mxu0 %v2076_v58 }
  0x71   :  { %1953 = vmatprep.subr.bf16.mxu1 %v2077_v59 }
  0x73   :  { %1854 = vmatpush3.bf16.msra.mxu0 %v2076_v58 }
  0x74   :  { %1954 = vmatpush3.bf16.msra.mxu1 %v2077_v59  ;;  %1855 = vmatprep.subr.bf16.mxu0 %v2078_v60 }
  0x75   :  { %1955 = vmatprep.subr.bf16.mxu1 %v2079_v61 }
  0x77   :  { %1856 = vmatpush3.bf16.msra.mxu0 %v2078_v60 }
  0x78   :  { %1956 = vmatpush3.bf16.msra.mxu1 %v2079_v61  ;;  %1857 = vmatprep.subr.bf16.mxu0 %v2080_v62 }
  0x79   :  { %1957 = vmatprep.subr.bf16.mxu1 %v2081_v63 }
  0x7b   :  { %1858 = vmatpush3.bf16.msra.mxu0 %v2080_v62 }
  0x7c   :  { %1958 = vmatpush3.bf16.msra.mxu1 %v2081_v63  ;;  %1859 = vmatprep.subr.bf16.mxu0 %v2082_v0 }
  0x7d   :  { %1959 = vmatprep.subr.bf16.mxu1 %v2083_v1 }
  0x7f   :  { %1860 = vmatpush3.bf16.msra.mxu0 %v2082_v0 }
  0x80   :  { %1960 = vmatpush3.bf16.msra.mxu1 %v2083_v1  ;;  %1865 = vmatprep.subr.bf16.mxu0 %v2084_v2 }
  0x81   :  { %1965 = vmatprep.subr.bf16.mxu1 %v2085_v3 }
  0x82   :  { %1862 = vmatmul.mubr.bf16.vlgmr.msra.gmra.mrb[0].mxu0 %v2350_v12 }
  0x83   :  { %1866 = vmatpush3.bf16.msra.mxu0 %v2084_v2  ;;  %1962 = vmatmul.mubr.bf16.vlgmr.msra.gmra.mrb[0].mxu1 %v2350_v12  ;;  %v2095_v12 = vld [vmem:[%s2568_s2 + $0x128] sm:$0xff]  }
  0x84   :  { %1966 = vmatpush3.bf16.msra.mxu1 %v2085_v3  ;;  %1867 = vmatprep.subr.bf16.mxu0 %v2086_v4 }
  0x85   :  { %1967 = vmatprep.subr.bf16.mxu1 %v2087_v5  ;;  %1881 = vmatprep.mubr.bf16.mxu0 %v2273_v40 }
  0x86   :  { %1981 = vmatprep.mubr.bf16.mxu1 %v2273_v40  ;;  %v2093_v40 = vld [vmem:[%s2568_s2 + $0x120] sm:$0xff]  }
  0x87   :  { %1868 = vmatpush3.bf16.msra.mxu0 %v2086_v4 }
  0x88   :  { %1968 = vmatpush3.bf16.msra.mxu1 %v2087_v5  ;;  %1869 = vmatprep.subr.bf16.mxu0 %v2088_v6 }
  0x89   :  { %1969 = vmatprep.subr.bf16.mxu1 %v2089_v7 }
  0x8b   :  { %1870 = vmatpush3.bf16.msra.mxu0 %v2088_v6 }
  0x8c   :  { %1970 = vmatpush3.bf16.msra.mxu1 %v2089_v7  ;;  %1871 = vmatprep.subr.bf16.mxu0 %v2090_v8 }
  0x8d   :  { %1971 = vmatprep.subr.bf16.mxu1 %v2091_v9 }
  0x8f   :  { %1872 = vmatpush3.bf16.msra.mxu0 %v2090_v8 }
  0x90   :  { %1972 = vmatpush3.bf16.msra.mxu1 %v2091_v9  ;;  %1873 = vmatprep.subr.bf16.mxu0 %v2092_v10 }
  0x91   :  { %1973 = vmatprep.subr.bf16.mxu1 %v2093_v40 }
  0x93   :  { %1874 = vmatpush3.bf16.msra.mxu0 %v2092_v10 }
  0x94   :  { %1974 = vmatpush3.bf16.msra.mxu1 %v2093_v40  ;;  %1875 = vmatprep.subr.bf16.mxu0 %v2094_v11 }
  0x95   :  { %1975 = vmatprep.subr.bf16.mxu1 %v2095_v12 }
  0x97   :  { %1876 = vmatpush3.bf16.msra.mxu0 %v2094_v11 }
  0x98   :  { %1976 = vmatpush3.bf16.msra.mxu1 %v2095_v12  ;;  %1877 = vmatprep.subr.bf16.mxu0 %v2096_v13 }
  0x99   :  { %1977 = vmatprep.subr.bf16.mxu1 %v2097_v15 }
  0x9b   :  { %1878 = vmatpush3.bf16.msra.mxu0 %v2096_v13 }
  0x9c   :  { %1978 = vmatpush3.bf16.msra.mxu1 %v2097_v15  ;;  %1879 = vmatprep.subr.bf16.mxu0 %v2098_v16 }
  0x9d   :  { %1979 = vmatprep.subr.bf16.mxu1 %v2099_v17 }
  0x9f   :  { %1880 = vmatpush3.bf16.msra.mxu0 %v2098_v16 }
  0xa0   :  { %1980 = vmatpush3.bf16.msra.mxu1 %v2099_v17  ;;  %v2499_v18 = vpop.permute.xlu0 %707 }
  0xa2   :  { %1882 = vmatmul.mubr.bf16.vlgmr.msra.gmra.mrb[0].mxu0 %v2306_v55 }
  0xa3   :  { %1982 = vmatmul.mubr.bf16.vlgmr.msra.gmra.mrb[0].mxu1 %v2306_v55 }
  0xa5   :  { %v2501_v19 = vpop.permute.xlu1 %717 }
  0xa6   :  { %v2503_v20 = vpop.permute.xlu0 %712 }
  0xa9   :  { %v2508_v31 = vpop.permute.xlu1 %722 }
  0xc5   :  { %v741_v42 = vpop.permute.xlu0 %740 }
  0xc6   :  { %2100 = vrcp.f32 %v741_v42 }
  0xd0   :  { %v2101_v56 = vpop.eup %2100 }
 0x175   :  { %v1883_v21 = vpop.f32.mrb[0].mxu0 }
 0x176   :  { %v1983_v22 = vpop.f32.mrb[0].mxu1  ;;  %v686_v23 = vpop.f32.mrb[1].mxu0  ;;  %v727_v33 = vmul.f32 %v1883_v21, %v2501_v19 }
 0x177   :  { %v1365_v24 = vpop.f32.mrb[1].mxu1  ;;  %v1884_v25 = vpop.f32.mrb[2].mxu0  ;;  %v725_v28 = vmul.f32 %v2499_v18, %v686_v23  ;;  %v1386_v36 = vmul.f32 %v1983_v22, %v2501_v19 }
 0x178   :  { %v1984_v26 = vpop.f32.mrb[2].mxu1  ;;  %v689_v27 = vpop.f32.mrb[3].mxu0  ;;  %v1384_v55 = vmul.f32 %v1365_v24, %v2499_v18  ;;  %v728_v35 = vmul.f32 %v1884_v25, %v2508_v31 }
 0x179   :  { %v726_v29 = vmul.f32 %v2503_v20, %v689_v27  ;;  %v1368_v30 = vpop.f32.mrb[3].mxu1  ;;  %v1387_v39 = vmul.f32 %v1984_v26, %v2508_v31 }
 0x17a   :  { %v1385_v32 = vmul.f32 %v1368_v30, %v2503_v20 }
 0x17b   :  { %v729_v34 = vadd.f32 %v726_v29, %v725_v28 }
 0x17c   :  { %v1388_v37 = vadd.f32 %v1385_v32, %v1384_v55 }
 0x17d   :  { %v730_v38 = vadd.f32 %v729_v34, %v727_v33 }
 0x17e   :  { %v1389_v41 = vadd.f32 %v1388_v37, %v1386_v36 }
 0x17f   :  { %v731_v43 = vadd.f32 %v730_v38, %v728_v35 }
 0x180   :  { %v1390_v14 = vadd.f32 %v1389_v41, %v1387_v39 }
 0x181   :  { %v732_v44 = vrot.slane %v731_v43, 4 }
 0x182   :  { %v1391_v45 = vrot.slane %v1390_v14, 4 }
 0x183   :  { %v733_v46 = vadd.f32 %v732_v44, %v731_v43 }
 0x184   :  { %v1392_v47 = vadd.f32 %v1391_v45, %v1390_v14 }
 0x185   :  { %v734_v48 = vrot.slane %v733_v46, 2 }
 0x186   :  { %v1393_v49 = vrot.slane %v1392_v47, 2 }
 0x187   :  { %v735_v50 = vadd.f32 %v734_v48, %v733_v46  ;;  %v1577_v46 = vld [vmem:[%s2571_s3] ss:$0 sm:$0xff] }
 0x188   :  { %v1394_v51 = vadd.f32 %v1393_v49, %v1392_v47 }
 0x189   :  { %v736_v52 = vrot.slane %v735_v50, 1 }
 0x18a   :  { %v1395_v53 = vrot.slane %v1394_v51, 1 }
 0x18b   :  { %v737_v54 = vadd.f32 %v736_v52, %v735_v50  ;;  %v1683_v52 = vld [vmem:[%s2572_s4] ss:$0 sm:$0xff] }
 0x18c   :  { %v1396_v57 = vadd.f32 %v1395_v53, %v1394_v51  ;;  %v1578_v53 = vld [vmem:[%s2573_s5] ss:$0 sm:$0xff] }
 0x18d   :  { %v744_v58 = vmul.f32 %v2101_v56, %v737_v54 }
 0x18e   :  { %v1397_v59 = vmul.f32 %v2101_v56, %v1396_v57 }
 0x18f   :  { %v745_v60 = vsub.f32 %v686_v23, %v744_v58  ;;  %v746_v61 = vsub.f32 %v689_v27, %v744_v58  ;;  %v747_v62 = vsub.f32 %v1883_v21, %v744_v58  ;;  %v748_v63 = vsub.f32 %v1884_v25, %v744_v58 }
 0x190   :  { %v1398_v0 = vsub.f32 %v1365_v24, %v1397_v59  ;;  %v1399_v1 = vsub.f32 %v1368_v30, %v1397_v59  ;;  %v1400_v2 = vsub.f32 %v1983_v22, %v1397_v59  ;;  %v1401_v3 = vsub.f32 %v1984_v26, %v1397_v59 }
 0x191   :  { %v749_v4 = vmul.f32 %v745_v60, %v2499_v18  ;;  %v750_v5 = vmul.f32 %v746_v61, %v2503_v20  ;;  %v751_v6 = vmul.f32 %v747_v62, %v2501_v19  ;;  %v752_v10 = vmul.f32 %v748_v63, %v2508_v31 }
 0x192   :  { %v1402_v7 = vmul.f32 %v1398_v0, %v2499_v18  ;;  %v1403_v8 = vmul.f32 %v1399_v1, %v2503_v20  ;;  %v1404_v9 = vmul.f32 %v1400_v2, %v2501_v19  ;;  %v1405_v12 = vmul.f32 %v1401_v3, %v2508_v31 }
 0x193   :  { %v753_v40 = vmul.f32 %v749_v4, %v749_v4  ;;  %v754_v11 = vmul.f32 %v750_v5, %v750_v5  ;;  %v755_v16 = vmul.f32 %v751_v6, %v751_v6  ;;  %v756_v23 = vmul.f32 %v752_v10, %v752_v10 }
 0x194   :  { %v1406_v13 = vmul.f32 %v1402_v7, %v1402_v7  ;;  %v1407_v15 = vmul.f32 %v1403_v8, %v1403_v8  ;;  %v1408_v21 = vmul.f32 %v1404_v9, %v1404_v9  ;;  %v1409_v25 = vmul.f32 %v1405_v12, %v1405_v12 }
 0x195   :  { %v757_v17 = vadd.f32 %v754_v11, %v753_v40 }
 0x196   :  { %v1410_v22 = vadd.f32 %v1407_v15, %v1406_v13 }
 0x197   :  { %v758_v24 = vadd.f32 %v757_v17, %v755_v16 }
 0x198   :  { %v1411_v26 = vadd.f32 %v1410_v22, %v1408_v21 }
 0x199   :  { %v759_v27 = vadd.f32 %v758_v24, %v756_v23 }
 0x19a   :  { %v1412_v28 = vadd.f32 %v1411_v26, %v1409_v25 }
 0x19b   :  { %v760_v29 = vrot.slane %v759_v27, 4 }
 0x19c   :  { %v1413_v30 = vrot.slane %v1412_v28, 4 }
 0x19d   :  { %v761_v55 = vadd.f32 %v760_v29, %v759_v27 }
 0x19e   :  { %v1414_v32 = vadd.f32 %v1413_v30, %v1412_v28 }
 0x19f   :  { %v762_v33 = vrot.slane %v761_v55, 2 }
 0x1a0   :  { %v1415_v34 = vrot.slane %v1414_v32, 2 }
 0x1a1   :  { %v763_v36 = vadd.f32 %v762_v33, %v761_v55 }
 0x1a2   :  { %v1416_v37 = vadd.f32 %v1415_v34, %v1414_v32 }
 0x1a3   :  { %v764_v35 = vrot.slane %v763_v36, 1 }
 0x1a4   :  { %v1417_v38 = vrot.slane %v1416_v37, 1 }
 0x1a5   :  { %v765_v39 = vadd.f32 %v764_v35, %v763_v36 }
 0x1a6   :  { %v1418_v41 = vadd.f32 %v1417_v38, %v1416_v37 }
 0x1a7   :  { %v766_v42 = vmul.f32 %v2101_v56, %v765_v39 }
 0x1a8   :  { %v1419_v43 = vmul.f32 %v2101_v56, %v1418_v41 }
 0x1a9   :  { %v767_v14 = vadd.f32 1e-05, %v766_v42 }
 0x1aa   :  { %v1420_v44 = vadd.f32 1e-05, %v1419_v43 }
 0x1ab   :  { %2102 = vrsqrt.f32 %v767_v14 }
 0x1ac   :  { %2104 = vrsqrt.f32 %v1420_v44 }
 0x1b5   :  { %v2103_v45 = vpop.eup %2102 }
 0x1b6   :  { %v2105_v47 = vpop.eup %2104  ;;  %v769_v48 = vmul.f32 %v2103_v45, %v745_v60  ;;  %v770_v49 = vmul.f32 %v2103_v45, %v746_v61  ;;  %v771_v50 = vmul.f32 %v2103_v45, %v747_v62  ;;  %v772_v51 = vmul.f32 %v2103_v45, %v748_v63  ;;  %v1684_v60 = vld [vmem:[%s2574_s6] ss:$0 sm:$0xff] }
 0x1b7   :  { %v1422_v54 = vmul.f32 %v2105_v47, %v1398_v0  ;;  %v1423_v56 = vmul.f32 %v2105_v47, %v1399_v1  ;;  %v1424_v57 = vmul.f32 %v2105_v47, %v1400_v2  ;;  %v1425_v58 = vmul.f32 %v2105_v47, %v1401_v3 }
 0x1b8   :  { %v780_v59 = vmul.f32 %v1577_v46, %v769_v48  ;;  %v781_v4 = vmul.f32 %v1577_v46, %v770_v49  ;;  %v782_v5 = vmul.f32 %v1577_v46, %v771_v50  ;;  %v783_v6 = vmul.f32 %v1577_v46, %v772_v51 }
 0x1b9   :  { %v1433_v61 = vmul.f32 %v1683_v52, %v1422_v54  ;;  %v1434_v62 = vmul.f32 %v1683_v52, %v1423_v56  ;;  %v1435_v63 = vmul.f32 %v1683_v52, %v1424_v57  ;;  %v1436_v7 = vmul.f32 %v1683_v52, %v1425_v58 }
 0x1ba   :  { %v791_v8 = vadd.f32 %v1578_v53, %v780_v59  ;;  %v792_v9 = vadd.f32 %v1578_v53, %v781_v4  ;;  %v793_v10 = vadd.f32 %v1578_v53, %v782_v5  ;;  %v794_v40 = vadd.f32 %v1578_v53, %v783_v6 }
 0x1bb   :  { %v1444_v0 = vadd.f32 %v1684_v60, %v1433_v61  ;;  %v1445_v1 = vadd.f32 %v1684_v60, %v1434_v62  ;;  %v1446_v2 = vadd.f32 %v1684_v60, %v1435_v63  ;;  %v1447_v3 = vadd.f32 %v1684_v60, %v1436_v7 }
 0x1bc   :  { %v795_v11 = vmul.f32 %v791_v8, %v2499_v18  ;;  %v796_v12 = vmul.f32 %v792_v9, %v2503_v20  ;;  %v797_v13 = vmul.f32 %v793_v10, %v2501_v19  ;;  %v798_v15 = vmul.f32 %v794_v40, %v2508_v31 }
 0x1bd   :  { %v1448_v16 = vmax.f32 %v1444_v0, 0.0  ;;  %v1449_v17 = vmax.f32 %v1445_v1, 0.0  ;;  %v1450_v21 = vmax.f32 %v1446_v2, 0.0  ;;  %v1451_v22 = vmax.f32 %v1447_v3, 0.0 }
 0x1be   :  { %799 = vst [vmem:[%s2575_s8] sm:$0xff] %v795_v11  ;;  %800 = vst [vmem:[%s2575_s8 + $0x8] sm:$0xff] %v796_v12 }
 0x1bf   :  { %801 = vst [vmem:[%s2575_s8 + $0x10] sm:$0xff] %v797_v13  ;;  %802 = vst [vmem:[%s2575_s8 + $0x18] sm:$0xff] %v798_v15  ;;  %v1452_v23 = vmul.f32 %v1448_v16, %v2499_v18  ;;  %v1453_v24 = vmul.f32 %v1449_v17, %v2503_v20  ;;  %v1454_v25 = vmul.f32 %v1450_v21, %v2501_v19 }
 0x1c0   :  { %v1455_v26 = vmul.f32 %v1451_v22, %v2508_v31 }
 0x1c1   :  { %1456 = vst [vmem:[%s2576_s9] sm:$0xff] %v1452_v23  ;;  %1457 = vst [vmem:[%s2576_s9 + $0x8] sm:$0xff] %v1453_v24 }
 0x1c2   :  { %1458 = vst [vmem:[%s2576_s9 + $0x10] sm:$0xff] %v1454_v25  ;;  %1459 = vst [vmem:[%s2576_s9 + $0x18] sm:$0xff] %v1455_v26 }

// kernel: _forward_padded.11
= control target key start
LH: loop header
LB: loop body
LE: loop exit
PB: predicated region body
PF: predicated region fallthrough
CT: control target
= control target key end

     0   :  { %vm83_vm0 = vcmask 7168   ;;  %v869_v0 = vmov 0   ;;  %v870_v12 = vmov 0.0   ;;  %vm871_vm7 = vmmov 0   ;;  %s1189_s1 = inlined_call_operand.vmem [shape: f32[48,1], index: 1, kind: input, shape index: {}]   ;;  %s1190_s3 = inlined_call_operand.vmem [shape: bf16[128,128], index: 3, kind: input, shape index: {}]   ;;  %s1191_s2 = inlined_call_operand.vmem [shape: bf16[128,128], index: 2, kind: input, shape index: {}]   ;;  %s1192_s5 = inlined_call_operand.vmem [shape: bf16[128,128], index: 5, kind: input, shape index: {}]   ;;  %s1193_s0 = inlined_call_operand.vmem [shape: f32[48,128], index: 0, kind: input, shape index: {}]   ;;  %s1194_s4 = inlined_call_operand.vmem [shape: f32[1,128], index: 4, kind: input, shape index: {}]   ;;  %s1195_s6 = inlined_call_operand.vmem [shape: f32[1,128], index: 6, kind: input, shape index: {}]   ;;  %s1196_s7 = inlined_call_operand.vmem [shape: f32[2,128], index: 7, kind: output, shape index: {}]  }
   0x1   :  { %840 = vset.pattern.permute.xlu1 %v869_v0  ;;  %839 = vset.pattern.permute.xlu0 %v869_v0  ;;  %v82_v1 = vld [vmem:[%s1189_s1 + $0x10] sm:$0xff]  ;;  %v80_v2 = vld [vmem:[%s1189_s1] sm:$0xff]  ;;  %v81_v3 = vld [vmem:[%s1189_s1 + $0x8] sm:$0xff] }
   0x2   :  { %108 = vperm.xlu1 %840, %v82_v1   ;;  %v87_v4 = vsel %vm83_vm0, %v82_v1, 0.0  ;;  %98 = vperm.xlu0 %839, %v80_v2   ;;  %v84_v5 = vsel %vm83_vm0, %v80_v2, 0.0  ;;  %v85_v6 = vsel %vm83_vm0, %v81_v3, 0.0  ;;  %vm129_vm1 = vcmp.gt.f32.partialorder %v80_v2, 0.0  ;;  %v929_v7 = vld [vmem:[%s1189_s1 + $0x18] sm:$0xff]  ;;  %v934_v8 = vld [vmem:[%s1189_s1 + $0x20] sm:$0xff] }
   0x3   :  { %v86_v9 = vadd.f32 %v85_v6, %v84_v5  ;;  %v132_v10 = vsel %vm129_vm1, 1, %v869_v0  ;;  %vm130_vm2 = vcmp.gt.f32.partialorder %v81_v3, 0.0  ;;  %v940_v11 = vld [vmem:[%s1189_s1 + $0x28] sm:$0xff]  ;;  %716 = vmatprep.subr.bf16.mxu0 %v870_v12  ;;  %736 = vmatprep.subr.bf16.mxu1 %v870_v12  ;;  %vm131_vm3 = vcmp.gt.f32.partialorder %v82_v1, 0.0  ;;  %v953_v18 = vld [vmem:[%s1190_s3] sm:$0xff]   ;;  %v979_v30 = vld [vmem:[%s1190_s3 + $0x10] sm:$0xff]  }
   0x4   :  { %v434_v13 = vsel %vm83_vm0, %v929_v7, 0.0  ;;  %v435_v14 = vsel %vm83_vm0, %v934_v8, 0.0  ;;  %v437_v17 = vsel %vm83_vm0, %v940_v11, 0.0  ;;  %v133_v19 = vsel %vm130_vm2, 1, %v869_v0  ;;  %717 = vmatpush3.bf16.msra.mxu0 %v953_v18  ;;  %v961_v23 = vld [vmem:[%s1190_s3 + $0x8] sm:$0xff]   ;;  %v966_v24 = vld [vmem:[%s1191_s2] sm:$0xff]   ;;  %732 = vmatprep.mubr.msk.bf16.mxu0 %vm871_vm7, %v870_v12 }
   0x5   :  { %v88_v15 = vadd.f32 %v87_v4, %v86_v9  ;;  %v436_v16 = vadd.f32 %v435_v14, %v434_v13  ;;  %v134_v21 = vsel %vm131_vm3, 1, %v869_v0  ;;  %718 = vmatprep.subr.bf16.mxu0 %v870_v12  ;;  %737 = vmatpush3.bf16.msra.mxu1 %v966_v24  ;;  %v973_v27 = vld [vmem:[%s1191_s2 + $0x8] sm:$0xff]   ;;  %v987_v33 = vld [vmem:[%s1191_s2 + $0x10] sm:$0xff]   ;;  %vm480_vm4 = vcmp.gt.f32.partialorder %v934_v8, 0.0  ;;  %v996_v36 = vld [vmem:[%s1190_s3 + $0x18] sm:$0xff]  }
   0x6   :  { %103 = vperm.xlu0 %839, %v81_v3   ;;  %136 = vperm.xlu1 %840, %v132_v10   ;;  %v1003_v39 = vld [vmem:[%s1191_s2 + $0x18] sm:$0xff]   ;;  %v483_v40 = vsel %vm480_vm4, 1, %v869_v0  ;;  %v1012_v43 = vld [vmem:[%s1190_s3 + $0x20] sm:$0xff]   ;;  %vm479_vm5 = vcmp.gt.f32.partialorder %v929_v7, 0.0  ;;  %v1027_v46 = vld [vmem:[%s1190_s3 + $0x28] sm:$0xff]   ;;  %vm481_vm6 = vcmp.gt.f32.partialorder %v940_v11, 0.0 }
   0x7   :  { %v89_v20 = vrot.slane %v88_v15, 4  ;;  %v438_v22 = vadd.f32 %v437_v17, %v436_v16  ;;  %738 = vmatprep.subr.bf16.mxu1 %v870_v12  ;;  %v1019_v44 = vld [vmem:[%s1191_s2 + $0x20] sm:$0xff]   ;;  %v1035_v47 = vld [vmem:[%s1191_s2 + $0x28] sm:$0xff]   ;;  %v482_v48 = vsel %vm479_vm5, 1, %v869_v0  ;;  %v1044_v49 = vld [vmem:[%s1190_s3 + $0x30] sm:$0xff]   ;;  %v484_v51 = vsel %vm481_vm6, 1, %v869_v0  ;;  %752 = vmatprep.mubr.msk.bf16.mxu1 %vm871_vm7, %v870_v12 }
   0x8   :  { %719 = vmatpush3.bf16.msra.mxu0 %v961_v23  ;;  %v1051_v50 = vld [vmem:[%s1191_s2 + $0x30] sm:$0xff]   ;;  %v1061_v52 = vld [vmem:[%s1190_s3 + $0x38] sm:$0xff]   ;;  %v77_v56 = vld [vmem:[%s1193_s0] sm:$0xff] }
   0x9   :  { %v439_v25 = vrot.slane %v438_v22, 4  ;;  %v90_v26 = vadd.f32 %v89_v20, %v88_v15  ;;  %720 = vmatprep.subr.bf16.mxu0 %v870_v12  ;;  %739 = vmatpush3.bf16.msra.mxu1 %v973_v27  ;;  %v1070_v53 = vld [vmem:[%s1191_s2 + $0x38] sm:$0xff]   ;;  %v79_v57 = vld [vmem:[%s1193_s0 + $0x10] sm:$0xff]  ;;  %v78_v58 = vld [vmem:[%s1193_s0 + $0x8] sm:$0xff] }
   0xa   :  { %139 = vperm.xlu0 %839, %v133_v19   ;;  %142 = vperm.xlu1 %840, %v134_v21   ;;  %v428_v6 = vld [vmem:[%s1193_s0 + $0x18] sm:$0xff]  ;;  %v430_v15 = vld [vmem:[%s1193_s0 + $0x28] sm:$0xff] }
   0xb   :  { %v440_v28 = vadd.f32 %v439_v25, %v438_v22  ;;  %v91_v29 = vrot.slane %v90_v26, 2  ;;  %740 = vmatprep.subr.bf16.mxu1 %v870_v12 }
   0xc   :  { %721 = vmatpush3.bf16.msra.mxu0 %v979_v30 }
   0xd   :  { %v92_v31 = vadd.f32 %v91_v29, %v90_v26  ;;  %v441_v32 = vrot.slane %v440_v28, 2  ;;  %722 = vmatprep.subr.bf16.mxu0 %v870_v12  ;;  %741 = vmatpush3.bf16.msra.mxu1 %v987_v33  ;;  %v429_v29 = vld [vmem:[%s1193_s0 + $0x20] sm:$0xff] }
   0xe   :  { %448 = vperm.xlu1 %840, %v929_v7   ;;  %742 = vmatprep.subr.bf16.mxu1 %v870_v12 }
   0xf   :  { %v93_v34 = vrot.slane %v92_v31, 1  ;;  %v442_v35 = vadd.f32 %v441_v32, %v440_v28 }
  0x10   :  { %723 = vmatpush3.bf16.msra.mxu0 %v996_v36 }
  0x11   :  { %v94_v37 = vadd.f32 %v93_v34, %v92_v31  ;;  %v443_v38 = vrot.slane %v442_v35, 1  ;;  %724 = vmatprep.subr.bf16.mxu0 %v870_v12  ;;  %743 = vmatpush3.bf16.msra.mxu1 %v1003_v39 }
  0x12   :  { %458 = vperm.xlu1 %840, %v940_v11   ;;  %744 = vmatprep.subr.bf16.mxu1 %v870_v12 }
  0x13   :  { %v95_v41 = vmax.f32 %v94_v37, 1.0  ;;  %v444_v42 = vadd.f32 %v443_v38, %v442_v35 }
  0x14   :  { %725 = vmatpush3.bf16.msra.mxu0 %v1012_v43 }
  0x15   :  { %124 = vperm.xlu0 %839, %v95_v41   ;;  %v445_v45 = vmax.f32 %v444_v42, 1.0  ;;  %726 = vmatprep.subr.bf16.mxu0 %v870_v12 }
  0x16   :  { %489 = vperm.xlu1 %840, %v483_v40   ;;  %745 = vmatpush3.bf16.msra.mxu1 %v1019_v44  ;;  %v857_v40 = vld [vmem:[%s1192_s5] sm:$0xff]  }
  0x17   :  { %746 = vmatprep.subr.bf16.mxu1 %v870_v12 }
  0x18   :  { %727 = vmatpush3.bf16.msra.mxu0 %v1027_v46 }
  0x19   :  { %453 = vperm.xlu0 %839, %v934_v8   ;;  %728 = vmatprep.subr.bf16.mxu0 %v870_v12 }
  0x1a   :  { %474 = vperm.xlu1 %840, %v445_v45   ;;  %747 = vmatpush3.bf16.msra.mxu1 %v1035_v47 }
  0x1b   :  { %748 = vmatprep.subr.bf16.mxu1 %v870_v12 }
  0x1c   :  { %729 = vmatpush3.bf16.msra.mxu0 %v1044_v49 }
  0x1d   :  { %486 = vperm.xlu0 %839, %v482_v48   ;;  %730 = vmatprep.subr.bf16.mxu0 %v870_v12 }
  0x1e   :  { %749 = vmatpush3.bf16.msra.mxu1 %v1051_v50 }
  0x1f   :  { %750 = vmatprep.subr.bf16.mxu1 %v870_v12 }
  0x20   :  { %731 = vmatpush3.bf16.msra.mxu0 %v1061_v52 }
  0x21   :  { %492 = vperm.xlu0 %839, %v484_v51   ;;  %756 = vmatprep.subr.bf16.mxu0 %v870_v12 }
  0x22   :  { %751 = vmatpush3.bf16.msra.mxu1 %v1070_v53 }
  0x23   :  { %776 = vmatprep.subr.bf16.mxu1 %v870_v12 }
  0x81   :  { %v109_v54 = vpop.permute.xlu1 %108  ;;  %v99_v55 = vpop.permute.xlu0 %98 }
  0x82   :  { %v111_v59 = vmul.f32 %v99_v55, %v77_v56  ;;  %v113_v62 = vmul.f32 %v109_v54, %v79_v57  ;;  %v858_v55 = vld [vmem:[%s1192_s5 + $0x8] sm:$0xff]  }
  0x85   :  { %v104_v60 = vpop.permute.xlu0 %103  ;;  %v137_v61 = vpop.permute.xlu1 %136 }
  0x86   :  { %v112_v63 = vmul.f32 %v104_v60, %v78_v58  ;;  %vm144_vm8 = vcmp.eq.s32.totalorder %v137_v61, 1 }
  0x87   :  { %v147_v1 = vsel %vm144_vm8, %v77_v56, -1e+30 }
  0x88   :  { %v114_v0 = vadd.f32 %v112_v63, %v111_v59 }
  0x89   :  { %v140_v2 = vpop.permute.xlu0 %139  ;;  %v143_v3 = vpop.permute.xlu1 %142 }
  0x8a   :  { %v115_v4 = vadd.f32 %v114_v0, %v113_v62  ;;  %vm145_vm9 = vcmp.eq.s32.totalorder %v140_v2, 1  ;;  %vm146_vm10 = vcmp.eq.s32.totalorder %v143_v3, 1  ;;  %v859_v62 = vld [vmem:[%s1192_s5 + $0x10] sm:$0xff]  }
  0x8b   :  { %v148_v5 = vsel %vm145_vm9, %v78_v58, -1e+30  ;;  %v149_v9 = vsel %vm146_vm10, %v79_v57, -1e+30 }
  0x8c   :  { %v116_v7 = vrot.slane %v115_v4, 4  ;;  %v150_v8 = vmax.f32 %v147_v1, %v148_v5  ;;  %v860_v1 = vld [vmem:[%s1192_s5 + $0x18] sm:$0xff]  }
  0x8d   :  { %v449_v10 = vpop.permute.xlu1 %448 }
  0x8e   :  { %v117_v11 = vadd.f32 %v116_v7, %v115_v4  ;;  %v151_v13 = vmax.f32 %v150_v8, %v149_v9  ;;  %v461_v14 = vmul.f32 %v449_v10, %v428_v6  ;;  %v75_v9 = vld [vmem:[%s1194_s4] sm:$0x1] }
  0x90   :  { %v152_v16 = vrot.slane %v151_v13, 4  ;;  %v118_v19 = vrot.slane %v117_v11, 2 }
  0x91   :  { %v459_v17 = vpop.permute.xlu1 %458 }
  0x92   :  { %v153_v20 = vmax.f32 %v151_v13, %v152_v16  ;;  %v463_v21 = vmul.f32 %v459_v17, %v430_v15  ;;  %v119_v28 = vadd.f32 %v118_v19, %v117_v11 }
  0x94   :  { %v154_v22 = vrot.slane %v153_v20, 2  ;;  %v125_v25 = vpop.permute.xlu0 %124  ;;  %v120_v37 = vrot.slane %v119_v28, 1 }
  0x95   :  { %865 = vrcp.f32 %v125_v25  ;;  %v490_v45 = vpop.permute.xlu1 %489 }
  0x96   :  { %v155_v26 = vmax.f32 %v153_v20, %v154_v22  ;;  %v121_v51 = vadd.f32 %v120_v37, %v119_v28  ;;  %vm495_vm12 = vcmp.eq.s32.totalorder %v490_v45, 1 }
  0x97   :  { %v498_v60 = vsel %vm495_vm12, %v429_v29, -1e+30 }
  0x98   :  { %v454_v31 = vpop.permute.xlu0 %453  ;;  %v156_v32 = vrot.slane %v155_v26, 1 }
  0x99   :  { %v462_v34 = vmul.f32 %v454_v31, %v429_v29  ;;  %v475_v25 = vpop.permute.xlu1 %474 }
  0x9a   :  { %v157_v35 = vmax.f32 %v155_v26, %v156_v32  ;;  %867 = vrcp.f32 %v475_v25 }
  0x9b   :  { %v464_v38 = vadd.f32 %v462_v34, %v461_v14 }
  0x9c   :  { %v487_v41 = vpop.permute.xlu0 %486  ;;  %v159_v42 = vpack.c.bf16 %v157_v35, %v157_v35 }
  0x9d   :  { %v1098_v48 = vadd.f32 %v464_v38, %v463_v21  ;;  %vm494_vm11 = vcmp.eq.s32.totalorder %v487_v41, 1 }
  0x9e   :  { %733 = vmatmul.mubr.bf16.vlgmr.msra.gmra.mrb[0].mxu0 %v159_v42  ;;  %v497_v58 = vsel %vm494_vm11, %v428_v6, -1e+30 }
  0x9f   :  { %v866_v54 = vpop.eup %865  ;;  %757 = vmatpush3.bf16.msra.mxu0 %v857_v40  ;;  %772 = vmatprep.mubr.msk.bf16.mxu0 %vm871_vm7, %v870_v12  ;;  %v500_v63 = vmax.f32 %v497_v58, %v498_v60  ;;  %v466_v20 = vrot.slane %v1098_v48, 4 }
  0xa0   :  { %v493_v56 = vpop.permute.xlu0 %492  ;;  %v128_v57 = vmul.f32 %v866_v54, %v121_v51  ;;  %758 = vmatprep.subr.bf16.mxu0 %v870_v12 }
  0xa1   :  { %vm496_vm13 = vcmp.eq.s32.totalorder %v493_v56, 1  ;;  %v467_v21 = vadd.f32 %v466_v20, %v1098_v48 }
  0xa2   :  { %v158_v59 = vpack.c.bf16 %v128_v57, %v128_v57  ;;  %v499_v61 = vsel %vm496_vm13, %v430_v15, -1e+30 }
  0xa3   :  { %759 = vmatpush3.bf16.msra.mxu0 %v858_v55  ;;  %v501_v0 = vmax.f32 %v500_v63, %v499_v61  ;;  %v468_v22 = vrot.slane %v467_v21, 2 }
  0xa4   :  { %753 = vmatmul.mubr.bf16.vlgmr.msra.gmra.mrb[0].mxu1 %v158_v59  ;;  %760 = vmatprep.subr.bf16.mxu0 %v870_v12  ;;  %v868_v29 = vpop.eup %867 }
  0xa5   :  { %777 = vmatpush3.bf16.msra.mxu1 %v953_v18  ;;  %792 = vmatprep.mubr.msk.bf16.mxu1 %vm871_vm7, %v870_v12  ;;  %v502_v2 = vrot.slane %v501_v0, 4  ;;  %v861_v18 = vld [vmem:[%s1192_s5 + $0x20] sm:$0xff]  }
  0xa6   :  { %778 = vmatprep.subr.bf16.mxu1 %v870_v12 }
  0xa7   :  { %761 = vmatpush3.bf16.msra.mxu0 %v859_v62  ;;  %v503_v3 = vmax.f32 %v501_v0, %v502_v2 }
  0xa8   :  { %762 = vmatprep.subr.bf16.mxu0 %v870_v12 }
  0xa9   :  { %779 = vmatpush3.bf16.msra.mxu1 %v961_v23  ;;  %v504_v23 = vrot.slane %v503_v3, 2 }
  0xaa   :  { %780 = vmatprep.subr.bf16.mxu1 %v870_v12 }
  0xab   :  { %763 = vmatpush3.bf16.msra.mxu0 %v860_v1  ;;  %v505_v4 = vmax.f32 %v503_v3, %v504_v23 }
  0xac   :  { %764 = vmatprep.subr.bf16.mxu0 %v870_v12 }
  0xad   :  { %781 = vmatpush3.bf16.msra.mxu1 %v979_v30  ;;  %v506_v5 = vrot.slane %v505_v4, 1 }
  0xae   :  { %782 = vmatprep.subr.bf16.mxu1 %v870_v12 }
  0xaf   :  { %765 = vmatpush3.bf16.msra.mxu0 %v861_v18  ;;  %v507_v30 = vmax.f32 %v505_v4, %v506_v5 }
  0xb0   :  { %766 = vmatprep.subr.bf16.mxu0 %v870_v12 }
  0xb1   :  { %783 = vmatpush3.bf16.msra.mxu1 %v996_v36  ;;  %v509_v36 = vpack.c.bf16 %v507_v30, %v507_v30 }
  0xb2   :  { %784 = vmatprep.subr.bf16.mxu1 %v870_v12 }
  0xb5   :  { %785 = vmatpush3.bf16.msra.mxu1 %v1012_v43  ;;  %v862_v43 = vld [vmem:[%s1192_s5 + $0x28] sm:$0xff]  }
  0xb6   :  { %786 = vmatprep.subr.bf16.mxu1 %v870_v12  ;;  %767 = vmatpush3.bf16.msra.mxu0 %v862_v43 }
  0xb7   :  { %768 = vmatprep.subr.bf16.mxu0 %v870_v12 }
  0xb9   :  { %787 = vmatpush3.bf16.msra.mxu1 %v1027_v46  ;;  %v863_v46 = vld [vmem:[%s1192_s5 + $0x30] sm:$0xff]  }
  0xba   :  { %788 = vmatprep.subr.bf16.mxu1 %v870_v12  ;;  %769 = vmatpush3.bf16.msra.mxu0 %v863_v46 }
  0xbb   :  { %770 = vmatprep.subr.bf16.mxu0 %v870_v12 }
  0xbd   :  { %789 = vmatpush3.bf16.msra.mxu1 %v1044_v49  ;;  %v864_v49 = vld [vmem:[%s1192_s5 + $0x38] sm:$0xff]  }
  0xbe   :  { %790 = vmatprep.subr.bf16.mxu1 %v870_v12  ;;  %771 = vmatpush3.bf16.msra.mxu0 %v864_v49 }
  0xbf   :  { %796 = vmatprep.subr.bf16.mxu0 %v870_v12 }
  0xc1   :  { %791 = vmatpush3.bf16.msra.mxu1 %v1061_v52 }
  0xc2   :  { %816 = vmatprep.subr.bf16.mxu1 %v870_v12 }
  0xc4   :  { %793 = vmatmul.mubr.bf16.vlgmr.msra.gmra.mrb[4].mxu1 %v509_v36 }
  0xc5   :  { %817 = vmatpush3.bf16.msra.mxu1 %v857_v40  ;;  %832 = vmatprep.mubr.msk.bf16.mxu1 %vm871_vm7, %v870_v12 }
  0xc6   :  { %818 = vmatprep.subr.bf16.mxu1 %v870_v12 }
  0xc9   :  { %819 = vmatpush3.bf16.msra.mxu1 %v858_v55 }
  0xca   :  { %820 = vmatprep.subr.bf16.mxu1 %v870_v12 }
  0xcd   :  { %821 = vmatpush3.bf16.msra.mxu1 %v859_v62 }
  0xce   :  { %822 = vmatprep.subr.bf16.mxu1 %v870_v12 }
  0xd1   :  { %823 = vmatpush3.bf16.msra.mxu1 %v860_v1 }
  0xd2   :  { %824 = vmatprep.subr.bf16.mxu1 %v870_v12 }
  0xd5   :  { %825 = vmatpush3.bf16.msra.mxu1 %v861_v18 }
  0xd6   :  { %826 = vmatprep.subr.bf16.mxu1 %v870_v12 }
  0xd9   :  { %827 = vmatpush3.bf16.msra.mxu1 %v862_v43 }
  0xda   :  { %828 = vmatprep.subr.bf16.mxu1 %v870_v12 }
  0xdd   :  { %829 = vmatpush3.bf16.msra.mxu1 %v863_v46 }
  0xde   :  { %830 = vmatprep.subr.bf16.mxu1 %v870_v12 }
  0xe1   :  { %831 = vmatpush3.bf16.msra.mxu1 %v864_v49 }
 0x171   :  { %v242_v52 = vpop.f32.mrb[0].mxu0 }
 0x172   :  { %v734_v6 = vpop.f32.mrb[1].mxu0 }
 0x173   :  { %v245_v7 = vpop.f32.mrb[2].mxu0 }
 0x174   :  { %v735_v8 = vpop.f32.mrb[3].mxu0 }
 0x177   :  { %v330_v10 = vpop.f32.mrb[0].mxu1 }
 0x178   :  { %v331_v11 = vadd.f32 %v330_v10, %v242_v52  ;;  %v754_v13 = vpop.f32.mrb[1].mxu1 }
 0x179   :  { %v333_v14 = vpop.f32.mrb[2].mxu1 }
 0x17a   :  { %v336_v15 = vadd.f32 %v331_v11, %v75_v9  ;;  %v755_v16 = vpop.f32.mrb[3].mxu1 }
 0x17c   :  { %v337_v17 = vmax.f32 %v336_v15, 0.0 }
 0x17e   :  { %v338_v19 = vpack.c.bf16 %v337_v17, %v337_v17 }
 0x180   :  { %773 = vmatmul.mubr.bf16.vlgmr.msra.gmra.mrb[4].mxu0 %v338_v19 }
 0x181   :  { %797 = vmatpush3.bf16.msra.mxu0 %v966_v24  ;;  %812 = vmatprep.mubr.msk.bf16.mxu0 %vm871_vm7, %v870_v12  ;;  %v469_v24 = vadd.f32 %v468_v22, %v467_v21 }
 0x182   :  { %798 = vmatprep.subr.bf16.mxu0 %v870_v12 }
 0x183   :  { %v470_v26 = vrot.slane %v469_v24, 1 }
 0x185   :  { %799 = vmatpush3.bf16.msra.mxu0 %v973_v27  ;;  %v471_v27 = vadd.f32 %v470_v26, %v469_v24 }
 0x186   :  { %800 = vmatprep.subr.bf16.mxu0 %v870_v12 }
 0x187   :  { %v478_v32 = vmul.f32 %v868_v29, %v471_v27 }
 0x189   :  { %801 = vmatpush3.bf16.msra.mxu0 %v987_v33 }
 0x18a   :  { %802 = vmatprep.subr.bf16.mxu0 %v870_v12 }
 0x18d   :  { %803 = vmatpush3.bf16.msra.mxu0 %v1003_v39 }
 0x18e   :  { %804 = vmatprep.subr.bf16.mxu0 %v870_v12 }
 0x191   :  { %805 = vmatpush3.bf16.msra.mxu0 %v1019_v44  ;;  %v508_v44 = vpack.c.bf16 %v478_v32, %v478_v32 }
 0x192   :  { %806 = vmatprep.subr.bf16.mxu0 %v870_v12 }
 0x195   :  { %807 = vmatpush3.bf16.msra.mxu0 %v1035_v47  ;;  %v76_v47 = vld [vmem:[%s1195_s6] sm:$0x1] }
 0x196   :  { %808 = vmatprep.subr.bf16.mxu0 %v870_v12 }
 0x197   :  { %v544_v33 = vpop.f32.mrb[4].mxu1 }
 0x198   :  { %v794_v28 = vpop.f32.mrb[5].mxu1 }
 0x199   :  { %v547_v31 = vpop.f32.mrb[6].mxu1  ;;  %809 = vmatpush3.bf16.msra.mxu0 %v1051_v50 }
 0x19a   :  { %v795_v39 = vpop.f32.mrb[7].mxu1  ;;  %810 = vmatprep.subr.bf16.mxu0 %v870_v12 }
 0x19d   :  { %811 = vmatpush3.bf16.msra.mxu0 %v1070_v53 }
 0x1a0   :  { %813 = vmatmul.mubr.bf16.vlgmr.msra.gmra.mrb[8].mxu0 %v508_v44 }
 0x253   :  { %v421_v34 = vpop.f32.mrb[4].mxu0 }
 0x254   :  { %v422_v35 = vadd.f32 %v421_v34, %v76_v47  ;;  %v774_v37 = vpop.f32.mrb[5].mxu0 }
 0x255   :  { %v424_v38 = vpop.f32.mrb[6].mxu0 }
 0x256   :  { %427 = vst [vmem:[%s1196_s7] sm:$0x1] %v422_v35  ;;  %v775_v50 = vpop.f32.mrb[7].mxu0 }
 0x273   :  { %v584_v40 = vpop.f32.mrb[8].mxu0 }
 0x274   :  { %v585_v12 = vadd.f32 %v584_v40, %v544_v33  ;;  %v814_v41 = vpop.f32.mrb[9].mxu0 }
 0x275   :  { %v587_v42 = vpop.f32.mrb[10].mxu0 }
 0x276   :  { %v590_v53 = vadd.f32 %v585_v12, %v75_v9  ;;  %v815_v45 = vpop.f32.mrb[11].mxu0 }
 0x278   :  { %v591_v48 = vmax.f32 %v590_v53, 0.0 }
 0x27a   :  { %v592_v51 = vpack.c.bf16 %v591_v48, %v591_v48 }
 0x27c   :  { %833 = vmatmul.mubr.bf16.vlgmr.msra.gmra.mrb[8].mxu1 %v592_v51 }
 0x34f   :  { %v627_v54 = vpop.f32.mrb[8].mxu1 }
 0x350   :  { %v628_v55 = vadd.f32 %v627_v54, %v76_v47  ;;  %v834_v56 = vpop.f32.mrb[9].mxu1 }
 0x351   :  { %v630_v57 = vpop.f32.mrb[10].mxu1 }
 0x352   :  { %633 = vst [vmem:[%s1196_s7 + $0x1] sm:$0x1] %v628_v55  ;;  %v835_v58 = vpop.f32.mrb[11].mxu1 }

</bundles_post_ra>
